<compile_context>
chip_gen: v7x
topology: tpu7x:2x2x1
jax: 0.10.0
libtpu: 0.0.40
codegen_flags: <defaults>
</compile_context>

<pallas_src>
import functools

import jax
import jax.numpy as jnp
from jax.experimental import pallas as pl
from jax.experimental.pallas import tpu as pltpu

_EPS = 1e-5  # torch.nn.LayerNorm default


# ---------------------------------------------------------------------------
# VMEM budgeting (generation-aware: 64 MiB/TC on v7x, 128 MiB on v5e/v6e)
# ---------------------------------------------------------------------------
def _query_vmem_capacity_bytes():
    try:
        info = pltpu.get_tpu_info()
        cap = getattr(info, "vmem_capacity_bytes", None)
        if cap:
            return int(cap)
    except Exception:
        pass
    try:
        # device_kind-based fallback: only v7x has 64 MiB per TensorCore.
        kind = jax.devices()[0].device_kind.lower()
        if "v7" in kind:
            return 64 * 1024 * 1024
    except Exception:
        pass
    return 128 * 1024 * 1024  # v5e / v6e per-TensorCore VMEM


_VMEM_CAP = _query_vmem_capacity_bytes()
if _VMEM_CAP <= 64 * 1024 * 1024:
    # 64 MiB parts (v7x): keep ~25% headroom for compiler-internal scratch/semaphores.
    _VMEM_LIMIT = int(_VMEM_CAP * 0.75)
else:
    _VMEM_LIMIT = min(int(_VMEM_CAP * 0.85), 100 * 1024 * 1024)
_VMEM_BUDGET = int(_VMEM_LIMIT * 0.6)  # tile-sizing budget (headroom under the limit)


def _cparams(*semantics):
    return pltpu.CompilerParams(
        dimension_semantics=semantics, vmem_limit_bytes=_VMEM_LIMIT
    )


# ---------------------------------------------------------------------------
# Tiling plans
# ---------------------------------------------------------------------------
def _row_plan(rows, d, itemsize, n_streams, budget=_VMEM_BUDGET):
    """(block_rows, row_padding) for row-wise elementwise/LN kernels."""
    cands = (4096, 2048, 1024, 512, 256, 128, 64, 32, 16, 8)

    def fits(blk):
        return n_streams * 2 * blk * d * itemsize + 2 * blk * d * 4 <= budget

    for blk in cands:
        if rows % blk == 0 and fits(blk):
            return blk, 0
    if fits(rows):
        return rows, 0                       # full-extent block (always legal)
    blk = next((c for c in cands if fits(c)), 8)
    return blk, (-rows) % blk                # pad rows instead of bypassing the budget


def _mm_footprint(tm, tn, tk, itemsize):
    # double-buffered x / w / (bias, ln params) / residual / out streams + f32 acc
    return (2 * (tm * tk + tk * tn + 2 * tm * tn + 3 * tk + tn) * itemsize
            + tm * tn * 4)


def _matmul_tiles(M, N, K, itemsize, budget=_VMEM_BUDGET, force_full_k=False):
    cand = (1024, 512, 256, 128)

    def pick(dim):
        return next((c for c in cand if dim % c == 0), dim)

    tm, tn = pick(M), pick(N)
    tk = K if force_full_k else pick(K)

    while _mm_footprint(tm, tn, tk, itemsize) > budget:
        # shrink tk first: it leaves total HBM traffic unchanged (review item)
        if not force_full_k and tk > 256 and K % (tk // 2) == 0:
            tk //= 2
            continue
        halved = False
        for cur, name in sorted(((tn, "n"), (tm, "m")), reverse=True):
            dim = N if name == "n" else M
            if cur > 128 and dim % (cur // 2) == 0:
                if name == "n":
                    tn = cur // 2
                else:
                    tm = cur // 2
                halved = True
                break
        if not halved:
            break

    pad_m = 0
    if tm == M and _mm_footprint(tm, tn, tk, itemsize) > budget:
        # large non-divisible M: pad rows so a budget-sized tile applies
        tm = 256
        while tm > 8 and _mm_footprint(tm, tn, tk, itemsize) > budget:
            tm //= 2
        pad_m = (-M) % tm

    return tm, tn, tk, pad_m, _mm_footprint(tm, tn, tk, itemsize) <= budget


def _pad_rows(arr, pad):
    if pad == 0:
        return arr
    return jnp.pad(arr, ((0, pad), (0, 0)))


# ---------------------------------------------------------------------------
# Elementwise / LayerNorm kernels  (slab layout [rows, d_model], d on lanes)
# ---------------------------------------------------------------------------
def _ln_stats(xf):
    # two-pass (centered) variance: avoids E[x^2]-mean^2 cancellation (review concern)
    mean = jnp.mean(xf, axis=-1, keepdims=True)
    xc = xf - mean
    var = jnp.mean(xc * xc, axis=-1, keepdims=True)
    return xc, var


def _ln_kernel(x_ref, w_ref, b_ref, o_ref):
    xc, var = _ln_stats(x_ref[...].astype(jnp.float32))
    y = xc * jax.lax.rsqrt(var + _EPS)
    o_ref[...] = (y * w_ref[...].astype(jnp.float32)
                  + b_ref[...].astype(jnp.float32)).astype(o_ref.dtype)


def _add_ln_kernel(x_ref, r_ref, w_ref, b_ref, o_ref):
    xf = x_ref[...].astype(jnp.float32) + r_ref[...].astype(jnp.float32)
    xc, var = _ln_stats(xf)
    y = xc * jax.lax.rsqrt(var + _EPS)
    o_ref[...] = (y * w_ref[...].astype(jnp.float32)
                  + b_ref[...].astype(jnp.float32)).astype(o_ref.dtype)


def _add_kernel(x_ref, r_ref, o_ref):
    o_ref[...] = x_ref[...] + r_ref[...]


def _layer_norm(x2d, w, b, residual2d=None):
    rows, d = x2d.shape
    itemsize = jnp.dtype(x2d.dtype).itemsize
    n_streams = 3 if residual2d is None else 4
    blk, pad = _row_plan(rows, d, itemsize, n_streams)
    x2d = _pad_rows(x2d, pad)
    if residual2d is not None:
        residual2d = _pad_rows(residual2d, pad)
    prows = rows + pad
    data = pl.BlockSpec((blk, d), lambda i: (i, 0))
    param = pl.BlockSpec((1, d), lambda i: (0, 0))
    w2, b2 = w.reshape(1, d), b.reshape(1, d)
    if residual2d is None:
        out = pl.pallas_call(
            _ln_kernel,
            out_shape=jax.ShapeDtypeStruct((prows, d), x2d.dtype),
            grid_spec=pltpu.PrefetchScalarGridSpec(
                num_scalar_prefetch=0, grid=(prows // blk,),
                in_specs=[data, param, param], out_specs=data),
            compiler_params=_cparams("parallel"),
        )(x2d, w2, b2)
    else:
        out = pl.pallas_call(
            _add_ln_kernel,
            out_shape=jax.ShapeDtypeStruct((prows, d), x2d.dtype),
            grid_spec=pltpu.PrefetchScalarGridSpec(
                num_scalar_prefetch=0, grid=(prows // blk,),
                in_specs=[data, data, param, param], out_specs=data),
            compiler_params=_cparams("parallel"),
        )(x2d, residual2d, w2, b2)
    return out[:rows] if pad else out


def _add(x2d, r2d):
    rows, d = x2d.shape
    blk, pad = _row_plan(rows, d, jnp.dtype(x2d.dtype).itemsize, 3)
    x2d, r2d = _pad_rows(x2d, pad), _pad_rows(r2d, pad)
    prows = rows + pad
    data = pl.BlockSpec((blk, d), lambda i: (i, 0))
    out = pl.pallas_call(
        _add_kernel,
        out_shape=jax.ShapeDtypeStruct((prows, d), x2d.dtype),
        grid_spec=pltpu.PrefetchScalarGridSpec(
            num_scalar_prefetch=0, grid=(prows // blk,),
            in_specs=[data, data], out_specs=data),
        compiler_params=_cparams("parallel"),
    )(x2d, r2d)
    return out[:rows] if pad else out


# ---------------------------------------------------------------------------
# Linear kernel: [LayerNorm(x)] @ W [+ b] [ReLU] [+ residual]
# ---------------------------------------------------------------------------
def _make_linear_kernel(*, relu, has_bias, has_res, has_ln, single_k):
    def kernel(*refs):
        idx = 0
        x_ref = refs[idx]; idx += 1
        w_ref = refs[idx]; idx += 1
        if has_ln:
            lnw_ref, lnb_ref = refs[idx], refs[idx + 1]
            idx += 2
        if has_bias:
            b_ref = refs[idx]; idx += 1
        if has_res:
            r_ref = refs[idx]; idx += 1
        o_ref = refs[idx]; idx += 1
        acc_ref = None if single_k else refs[idx]

        x = x_ref[...]
        if has_ln:
            # fused pre-LayerNorm on the x tile (requires tk == K, enforced by wrapper)
            xc, var = _ln_stats(x.astype(jnp.float32))
            x = ((xc * jax.lax.rsqrt(var + _EPS))
                 * lnw_ref[...].astype(jnp.float32)
                 + lnb_ref[...].astype(jnp.float32)).astype(x_ref.dtype)

        part = jnp.dot(x, w_ref[...], preferred_element_type=jnp.float32)

        def epilogue(acc):
            y = acc
            if has_bias:
                y = y + b_ref[...].astype(jnp.float32)
            if relu:
                y = jnp.maximum(y, 0.0)   # relu_dropout(training=False) = identity
            if has_res:
                y = y + r_ref[...].astype(jnp.float32)   # fused postprocess residual
            o_ref[...] = y.astype(o_ref.dtype)

        if single_k:
            epilogue(part)
        else:
            k = pl.program_id(2)

            @pl.when(k == 0)
            def _():
                acc_ref[...] = jnp.zeros_like(acc_ref)

            acc_ref[...] += part

            @pl.when(k == pl.num_programs(2) - 1)
            def _():
                epilogue(acc_ref[...])

    return kernel


def _linear(x2d, w, b=None, residual=None, relu=False, ln=None):
    M0, K = x2d.shape
    _, N = w.shape
    out_dtype = x2d.dtype
    itemsize = jnp.dtype(out_dtype).itemsize

    tm, tn, tk, pad_m, fits = _matmul_tiles(M0, N, K, itemsize,
                                            force_full_k=(ln is not None))
    if ln is not None and not fits:
        # K too large to keep in one tile under the budget -> standalone LN fallback.
        x2d = _layer_norm(x2d, ln[0], ln[1])
        ln = None
        tm, tn, tk, pad_m, _ = _matmul_tiles(M0, N, K, itemsize)

    x2d = _pad_rows(x2d, pad_m)
    if residual is not None:
        residual = _pad_rows(residual, pad_m)
    M = x2d.shape[0]
    single_k = (tk == K)
    grid = (M // tm, N // tn, K // tk)

    x_spec = pl.BlockSpec((tm, tk), lambda i, j, k: (i, k))
    w_spec = pl.BlockSpec((tk, tn), lambda i, j, k: (k, j))
    o_spec = pl.BlockSpec((tm, tn), lambda i, j, k: (i, j))
    in_specs = [x_spec, w_spec]
    args = [x2d, w]
    if ln is not None:
        ln_spec = pl.BlockSpec((1, tk), lambda i, j, k: (0, k))
        in_specs += [ln_spec, ln_spec]
        args += [ln[0].reshape(1, K), ln[1].reshape(1, K)]
    if b is not None:
        in_specs.append(pl.BlockSpec((1, tn), lambda i, j, k: (0, j)))
        args.append(b.reshape(1, N))
    if residual is not None:
        in_specs.append(pl.BlockSpec((tm, tn), lambda i, j, k: (i, j)))
        args.append(residual)

    kernel = _make_linear_kernel(relu=relu, has_bias=b is not None,
                                 has_res=residual is not None,
                                 has_ln=ln is not None, single_k=single_k)
    scratch = [] if single_k else [pltpu.VMEM((tm, tn), jnp.float32)]

    out = pl.pallas_call(
        kernel,
        out_shape=jax.ShapeDtypeStruct((M, N), out_dtype),
        grid_spec=pltpu.PrefetchScalarGridSpec(
            num_scalar_prefetch=0, grid=grid,
            in_specs=in_specs, out_specs=o_spec, scratch_shapes=scratch),
        compiler_params=_cparams("parallel", "parallel", "arbitrary"),
    )(*args)
    return out[:M0] if pad_m else out


# ---------------------------------------------------------------------------
# Attention: grid over (batch, query block); all heads handled per step in VMEM
# ---------------------------------------------------------------------------
def _attn_kernel(q_ref, k_ref, v_ref, b_ref, o_ref, *, scale, n_head, d_key, d_value):
    H, dk, dv = n_head, d_key, d_value
    Hb = b_ref.shape[0]
    bias0 = b_ref[0].astype(jnp.float32) if Hb == 1 else None
    outs = []
    for h in range(H):
        # per-head column slices of the fused QKV block (static lane slices, no HBM copies)
        qh = q_ref[:, h * dk:(h + 1) * dk] * scale      # scale folded into q
        kh = k_ref[:, h * dk:(h + 1) * dk]
        vh = v_ref[:, h * dv:(h + 1) * dv]
        s = jax.lax.dot_general(qh, kh, (((1,), (1,)), ((), ())),
                                preferred_element_type=jnp.float32)     # (tq, S)
        bh = bias0 if Hb == 1 else b_ref[h].astype(jnp.float32)
        s = s + bh                                       # broadcasts over compact dims
        m = jnp.max(s, axis=-1, keepdims=True)
        p = jnp.exp(s - m)
        denom = jnp.sum(p, axis=-1, keepdims=True)
        o = jnp.dot(p.astype(vh.dtype), vh, preferred_element_type=jnp.float32)
        outs.append(o * pl.reciprocal(denom, approx=True))   # divide on the EUP slot
    # TODO(synk): attention dropout (training=False -> identity) not implemented.
    o_ref[...] = jnp.concatenate(outs, axis=-1).astype(o_ref.dtype)


def _attn_q_block(S, H, dk, dv, hb, sq_full, itemsize, b_itemsize,
                  budget=_VMEM_BUDGET):
    def fp(tq):
        kv = 2 * S * H * (dk + dv) * itemsize                 # K/V streams (dbl-buffered)
        qo = 2 * tq * H * (dk + dv) * itemsize                # Q in + O out streams
        bias = 2 * hb * (tq if sq_full else 1) * S * b_itemsize
        inter = 2 * tq * S * 4 + 2 * tq * max(dk, dv) * 4     # per-head f32 intermediates
        return kv + qo + bias + inter

    if fp(S) <= budget:
        return S
    for tq in (512, 256, 128, 64, 32, 16, 8):
        if S % tq == 0 and fp(tq) <= budget:
            return tq
    # TODO(synk): flash-style online-softmax K/V streaming for very long sequences.
    return S


def _mha_attention(qkv2d, bias4, B, S, H, dk, dv, scale):
    qn, vn = H * dk, H * dv
    total = qkv2d.shape[1]
    dtype = qkv2d.dtype
    itemsize = jnp.dtype(dtype).itemsize

    Bb, Hb = bias4.shape[0], bias4.shape[1]
    sq_full = bias4.shape[2] != 1
    b_itemsize = jnp.dtype(bias4.dtype).itemsize

    tq = _attn_q_block(S, H, dk, dv, Hb, sq_full, itemsize, b_itemsize)
    grid = (B, S // tq)

    # Read q/k/v straight out of the fused-QKV slab when the per-group column widths are
    # 128-lane aligned (no XLA column-slice copies, no head transposes).
    slab_ok = (qn % 128 == 0 and vn % 128 == 0 and (2 * qn) % vn == 0)
    if slab_ok:
        src = qkv2d.reshape(B, S, total)
        q_src = k_src = v_src = src
        q_col, k_col, v_col = 0, 1, (2 * qn) // vn
    else:
        # TODO(synk): head widths not 128-lane aligned -> XLA column slices (extra copies).
        q_src = qkv2d[:, :qn].reshape(B, S, qn)
        k_src = qkv2d[:, qn:2 * qn].reshape(B, S, qn)
        v_src = qkv2d[:, 2 * qn:].reshape(B, S, vn)
        q_col = k_col = v_col = 0

    q_spec = pl.BlockSpec((None, tq, qn), lambda b, qi: (b, qi, q_col))
    k_spec = pl.BlockSpec((None, S, qn), lambda b, qi: (b, 0, k_col))
    v_spec = pl.BlockSpec((None, S, vn), lambda b, qi: (b, 0, v_col))

    # compact bias: only index the dims the caller actually provided (no dense B*H*S*S DMA)
    if Bb > 1 and sq_full:
        bmap = lambda b, qi: (b, 0, qi, 0)
    elif Bb > 1:
        bmap = lambda b, qi: (b, 0, 0, 0)
    elif sq_full:
        bmap = lambda b, qi: (0, 0, qi, 0)
    else:
        bmap = lambda b, qi: (0, 0, 0, 0)
    b_spec = pl.BlockSpec((None, Hb, tq if sq_full else 1, S), bmap)

    o_spec = pl.BlockSpec((None, tq, vn), lambda b, qi: (b, qi, 0))

    out = pl.pallas_call(
        functools.partial(_attn_kernel, scale=float(scale),
                          n_head=H, d_key=dk, d_value=dv),
        out_shape=jax.ShapeDtypeStruct((B, S, vn), dtype),
        grid_spec=pltpu.PrefetchScalarGridSpec(
            num_scalar_prefetch=0, grid=grid,
            in_specs=[q_spec, k_spec, v_spec, b_spec], out_specs=o_spec),
        compiler_params=_cparams("parallel", "arbitrary"),
    )(q_src, k_src, v_src, bias4)
    return out.reshape(B * S, vn)


# ---------------------------------------------------------------------------
# PrePostProcessLayer ('a' add-residual, 'n' LayerNorm, 'd' dropout[eval]=identity)
# ---------------------------------------------------------------------------
class PrePostProcess:
    def __init__(self, cmd, d_model, dropout_rate, dtype):
        self.cmd = cmd
        self.dropout_rate = dropout_rate
        # LayerNorm default init (weight=1, bias=0) matching torch.nn.LayerNorm.
        self.ln_params = [(jnp.ones((d_model,), dtype), jnp.zeros((d_model,), dtype))
                          for c in cmd if c == "n"]

    def __call__(self, x2d, residual2d=None):
        ln_idx = 0
        pending = None
        for i, c in enumerate(self.cmd):
            if c == "a":
                if residual2d is not None:
                    if i + 1 < len(self.cmd) and self.cmd[i + 1] == "n":
                        pending = residual2d       # fuse the add into the next LayerNorm
                    else:
                        x2d = _add(x2d, residual2d)
            elif c == "n":
                w, b = self.ln_params[ln_idx]
                ln_idx += 1
                x2d = _layer_norm(x2d, w, b, residual2d=pending)
                pending = None
            elif c == "d":
                pass  # TODO(synk): training-mode dropout; F.dropout(training=False) is identity
        return x2d

    def ref(self, x, residual=None):
        ln_idx = 0
        for c in self.cmd:
            if c == "a" and residual is not None:
                x = x + residual
            elif c == "n":
                w, b = self.ln_params[ln_idx]
                ln_idx += 1
                xf = x.astype(jnp.float32)
                mean = jnp.mean(xf, -1, keepdims=True)
                var = jnp.mean((xf - mean) ** 2, -1, keepdims=True)
                x = ((xf - mean) * jax.lax.rsqrt(var + _EPS)
                     * w.astype(jnp.float32) + b.astype(jnp.float32)).astype(x.dtype)
        return x


# ---------------------------------------------------------------------------
# Encoder layer / WrapEncoder
# ---------------------------------------------------------------------------
class EncoderLayer:
    def __init__(self, n_head, d_key, d_value, d_model, d_inner_hid,
                 prepost_dropout, attn_dropout, relu_dropout,
                 preprocess_cmd, postprocess_cmd, key, dtype):
        self.n_head, self.d_key, self.d_value, self.d_model = n_head, d_key, d_value, d_model
        self.pre1 = PrePostProcess(preprocess_cmd, d_model, prepost_dropout, dtype)
        self.post1 = PrePostProcess(postprocess_cmd, d_model, prepost_dropout, dtype)
        self.pre2 = PrePostProcess(preprocess_cmd, d_model, prepost_dropout, dtype)
        self.post2 = PrePostProcess(postprocess_cmd, d_model, prepost_dropout, dtype)
        # preprocess that is a single LayerNorm (+dropout) -> fuse into the next matmul
        self._fuse_pre = (set(preprocess_cmd) <= set("nd")
                          and preprocess_cmd.count("n") == 1)
        # postprocess that is only dropout + one residual add -> fuse into matmul epilogue
        self._fuse_post_add = (set(postprocess_cmd) <= set("ad")
                               and postprocess_cmd.count("a") == 1)

        ks = jax.random.split(key, 6)

        def dense(k, fan_in, fan_out):
            return (jax.random.normal(k, (fan_in, fan_out), jnp.float32)
                    / (fan_in ** 0.5)).astype(dtype)

        qn, vn = n_head * d_key, n_head * d_value
        # fused QKV projection weight: one matmul instead of three (all bias=False)
        self.w_qkv = jnp.concatenate(
            [dense(ks[0], d_model, qn), dense(ks[1], d_model, qn),
             dense(ks[2], d_model, vn)], axis=1)
        self.w_proj = dense(ks[3], vn, d_model)
        self.fc1_w = dense(ks[4], d_model, d_inner_hid)
        self.fc1_b = jnp.zeros((d_inner_hid,), dtype)
        self.fc2_w = dense(ks[5], d_inner_hid, d_model)
        self.fc2_b = jnp.zeros((d_model,), dtype)

    def __call__(self, x2d, bias4, B, S):
        H, dk, dv, d = self.n_head, self.d_key, self.d_value, self.d_model

        # QKV projection with the pre-LayerNorm fused into the x-tile load.
        if self._fuse_pre:
            qkv = _linear(x2d, self.w_qkv, ln=self.pre1.ln_params[0])
        else:
            qkv = _linear(self.pre1(x2d), self.w_qkv)

        ctx2d = _mha_attention(qkv, bias4, B, S, H, dk, dv, float(d) ** -0.5)

        if self._fuse_post_add:
            attn_out = _linear(ctx2d, self.w_proj, residual=x2d)
        else:
            attn_out = self.post1(_linear(ctx2d, self.w_proj), x2d)

        # FFN with pre-LayerNorm fused into fc1 and residual fused into fc2 epilogue.
        if self._fuse_pre:
            h = _linear(attn_out, self.fc1_w, self.fc1_b, relu=True,
                        ln=self.pre2.ln_params[0])
        else:
            h = _linear(self.pre2(attn_out), self.fc1_w, self.fc1_b, relu=True)
        if self._fuse_post_add:
            out = _linear(h, self.fc2_w, self.fc2_b, residual=attn_out)
        else:
            out = self.post2(_linear(h, self.fc2_w, self.fc2_b), attn_out)
        return out

    def reference(self, x2d, bias4, B, S, precision):
        H, dk, dv, d = self.n_head, self.d_key, self.d_value, self.d_model
        y = self.pre1.ref(x2d)
        qkv = jnp.dot(y, self.w_qkv, precision=precision)
        qn = H * dk
        q, k, v = qkv[:, :qn], qkv[:, qn:2 * qn], qkv[:, 2 * qn:]
        qh = q.reshape(B, S, H, dk).transpose(0, 2, 1, 3)
        kh = k.reshape(B, S, H, dk).transpose(0, 2, 1, 3)
        vh = v.reshape(B, S, H, dv).transpose(0, 2, 1, 3)
        s = jnp.einsum("bhqd,bhkd->bhqk", qh, kh,
                       precision=precision).astype(jnp.float32) * (float(d) ** -0.5)
        s = s + bias4.astype(jnp.float32)
        p = jax.nn.softmax(s, axis=-1).astype(x2d.dtype)
        ctx = jnp.einsum("bhqk,bhkd->bhqd", p, vh, precision=precision)
        ctx2d = ctx.transpose(0, 2, 1, 3).reshape(B * S, H * dv)
        attn_out = self.post1.ref(jnp.dot(ctx2d, self.w_proj, precision=precision), x2d)
        y2 = self.pre2.ref(attn_out)
        h = jnp.maximum(jnp.dot(y2, self.fc1_w, precision=precision) + self.fc1_b, 0.0)
        return self.post2.ref(jnp.dot(h, self.fc2_w, precision=precision) + self.fc2_b,
                              attn_out)


class WrapEncoder:
    def __init__(self, src_vocab_size, max_length, n_layer, n_head, d_key, d_value,
                 d_model, d_inner_hid, prepostprocess_dropout, attention_dropout,
                 relu_dropout, preprocess_cmd="n", postprocess_cmd="da",
                 weight_sharing=False, bos_idx=0, *, key, dtype=jnp.float32):
        del weight_sharing  # accepted but unused (matches the reference snippet)
        self.d_model, self.n_head = d_model, n_head
        keys = jax.random.split(key, 2 + n_layer)
        emb0 = 0.02 * jax.random.normal(keys[0], (src_vocab_size, d_model), jnp.float32)
        emb0 = emb0.at[bos_idx].set(0.0)   # nn.Embedding padding_idx row is zero
        self.emb0 = emb0.astype(dtype)
        self.emb1 = (0.02 * jax.random.normal(keys[1], (max_length, d_model),
                                              jnp.float32)).astype(dtype)
        self.layers = [
            EncoderLayer(n_head, d_key, d_value, d_model, d_inner_hid,
                         prepostprocess_dropout, attention_dropout, relu_dropout,
                         preprocess_cmd, postprocess_cmd, keys[2 + i], dtype)
            for i in range(n_layer)
        ]
        self.final = PrePostProcess(preprocess_cmd, d_model, prepostprocess_dropout, dtype)
        self._jit_forward = jax.jit(self._forward)

    @staticmethod
    def _normalize_bias(attn_bias, S):
        # Keep the caller's compact (broadcastable) shape; the attention kernel
        # broadcasts it in VMEM instead of DMAing a dense (B*H, S, S) bias.
        if attn_bias is None:
            return jnp.zeros((1, 1, 1, S), jnp.float32)
        b = jnp.asarray(attn_bias)
        if b.ndim < 4:
            b = b.reshape((1,) * (4 - b.ndim) + b.shape)
        return b

    # ---- Pallas path (jit-compiled as one program) ----
    def _forward(self, src_word, src_pos, attn_bias):
        B, S = src_word.shape[0], src_word.shape[1]
        d = self.d_model
        dtype = self.emb0.dtype
        word_ids = src_word.reshape(B, S).astype(jnp.int32)
        pos_ids = src_pos.reshape(B, S).astype(jnp.int32)
        # Embedding gathers + sqrt(d)*w_emb + p_emb stay in XLA: the multiply-add fuses
        # with the gather output in one pass (a pallas_call here would force an extra
        # HBM round trip of both embedding outputs).
        w_emb = jnp.take(self.emb0, word_ids, axis=0)
        p_emb = jnp.take(self.emb1, pos_ids, axis=0)
        x2d = (w_emb.astype(jnp.float32) * (float(d) ** 0.5)
               + p_emb.astype(jnp.float32)).astype(dtype).reshape(B * S, d)
        bias4 = self._normalize_bias(attn_bias, S)
        for layer in self.layers:
            x2d = layer(x2d, bias4, B, S)
        x2d = self.final(x2d)
        return x2d.reshape(B, S, d)

    def __call__(self, enc_inputs):
        src_word, src_pos, attn_bias = enc_inputs
        return self._jit_forward(src_word, src_pos, attn_bias)

    # ---- pure-JAX reference for correctness checking ----
    def reference(self, enc_inputs):
        src_word, src_pos, attn_bias = enc_inputs
        hp = jax.lax.Precision.HIGHEST
        B, S = src_word.shape[0], src_word.shape[1]
        d = self.d_model
        dtype = self.emb0.dtype
        word_ids = src_word.reshape(B, S).astype(jnp.int32)
        pos_ids = src_pos.reshape(B, S).astype(jnp.int32)
        w_emb = jnp.take(self.emb0, word_ids, axis=0)
        p_emb = jnp.take(self.emb1, pos_ids, axis=0)
        x = (w_emb.astype(jnp.float32) * (float(d) ** 0.5)
             + p_emb.astype(jnp.float32)).astype(dtype).reshape(B * S, d)
        bias4 = self._normalize_bias(attn_bias, S)
        for layer in self.layers:
            x = layer.reference(x, bias4, B, S, hp)
        x = self.final.ref(x)
        return x.reshape(B, S, d)


# ---------------------------------------------------------------------------
# Demo
# ---------------------------------------------------------------------------
if __name__ == "__main__":
    key = jax.random.PRNGKey(0)
    k_model, k_word = jax.random.split(key, 2)

    B, S = 2, 16
    vocab, max_len = 64, 32
    n_layer, n_head, d_key, d_value = 2, 2, 64, 64
    d_model, d_inner = 128, 256      # lane-dense last dims (multiples of 128)

    # dtype is configurable (bf16-ready: f32 accumulation / LN stats inside kernels);
    # the demo stays f32 to match the PyTorch module's default semantics.
    model = WrapEncoder(
        vocab, max_len, n_layer, n_head, d_key, d_value, d_model, d_inner,
        prepostprocess_dropout=0.1, attention_dropout=0.1, relu_dropout=0.1,
        preprocess_cmd="n", postprocess_cmd="da",
        weight_sharing=False, bos_idx=0, key=k_model, dtype=jnp.float32)

    src_word = jax.random.randint(k_word, (B, S, 1), 0, vocab, jnp.int32)
    src_pos = jnp.tile(jnp.arange(S, dtype=jnp.int32).reshape(1, S, 1), (B, 1, 1))
    # additive attention bias in compact broadcastable form (B, 1, 1, S): mask out the
    # last 4 key positions of every sequence (the kernel broadcasts it over heads/queries).
    mask = (jnp.arange(S) >= S - 4).astype(jnp.float32) * -1e9
    src_slf_attn_bias = jnp.broadcast_to(mask.reshape(1, 1, 1, S), (B, 1, 1, S))

    out = model((src_word, src_pos, src_slf_attn_bias))
    out = jax.block_until_ready(out)

    ref = model.reference((src_word, src_pos, src_slf_attn_bias))
    ref = jax.block_until_ready(ref)

    assert out.shape == (B, S, d_model)
    err = float(jnp.max(jnp.abs(out.astype(jnp.float32) - ref.astype(jnp.float32))))
    # loose tolerance accommodates MXU vs HIGHEST-precision XLA matmuls + approx reciprocal
    assert err < 1e-1, f"max abs err {err}"
    print("KERNEL_OK")
</pallas_src>

<mosaic_0001>
module attributes {stable_mosaic.version = 11 : i64} {
  func.func @_attn_kernel(%arg0: i32, %arg1: i32, %arg2: memref<1x16x128xf32, #tpu.memory_space<vmem>>, %arg3: memref<1x16x128xf32, #tpu.memory_space<vmem>>, %arg4: memref<1x16x128xf32, #tpu.memory_space<vmem>>, %arg5: memref<1x1x1x16xf32, #tpu.memory_space<vmem>>, %arg6: memref<1x16x128xf32, #tpu.memory_space<vmem>>) attributes {dimension_semantics = [#tpu.dimension_semantics<parallel>, #tpu.dimension_semantics<arbitrary>], iteration_bounds = array<i64: 2, 1>, scalar_prefetch = 0 : i64, scratch_operands = 0 : i64, tpu.core_type = #tpu.core_type<tc>, window_params = [{transform_indices = @transform_0, window_bounds = array<i64: 1, 16, 128>}, {transform_indices = @transform_1, window_bounds = array<i64: 1, 16, 128>}, {transform_indices = @transform_2, window_bounds = array<i64: 1, 16, 128>}, {transform_indices = @transform_3, window_bounds = array<i64: 1, 1, 1, 16>}, {transform_indices = @transform_4, window_bounds = array<i64: 1, 16, 128>}]} {
    %c0 = arith.constant 0 : index
    %c0_0 = arith.constant 0 : index
    %c0_1 = arith.constant 0 : index
    %c0_2 = arith.constant 0 : index
    %0 = vector.load %arg5[%c0, %c0_0, %c0_1, %c0_2] : memref<1x1x1x16xf32, #tpu.memory_space<vmem>>, vector<1x1x1x16xf32>
    %1 = vector.shape_cast %0 : vector<1x1x1x16xf32> to vector<1x16xf32>
    %c0_3 = arith.constant 0 : index
    %c0_4 = arith.constant 0 : index
    %c0_5 = arith.constant 0 : index
    %2 = vector.load %arg2[%c0_3, %c0_4, %c0_5] : memref<1x16x128xf32, #tpu.memory_space<vmem>>, vector<1x16x64xf32>
    %3 = vector.shape_cast %2 : vector<1x16x64xf32> to vector<16x64xf32>
    %cst = arith.constant 0.0883883461 : f32
    %4 = vector.broadcast %cst : f32 to vector<16x64xf32>
    %5 = arith.mulf %3, %4 : vector<16x64xf32>
    %c0_6 = arith.constant 0 : index
    %c0_7 = arith.constant 0 : index
    %c0_8 = arith.constant 0 : index
    %6 = vector.load %arg3[%c0_6, %c0_7, %c0_8] : memref<1x16x128xf32, #tpu.memory_space<vmem>>, vector<1x16x64xf32>
    %7 = vector.shape_cast %6 : vector<1x16x64xf32> to vector<16x64xf32>
    %c0_9 = arith.constant 0 : index
    %c0_10 = arith.constant 0 : index
    %c0_11 = arith.constant 0 : index
    %8 = vector.load %arg4[%c0_9, %c0_10, %c0_11] : memref<1x16x128xf32, #tpu.memory_space<vmem>>, vector<1x16x64xf32>
    %9 = vector.shape_cast %8 : vector<1x16x64xf32> to vector<16x64xf32>
    %cst_12 = arith.constant dense<0.000000e+00> : vector<16x16xf32>
    %10 = tpu.matmul %5, %7, %cst_12 {dimension_numbers = #tpu.dot_dimension_numbers<[1], [1], [0], [0], [0, 0, 1, 0], [], []>} : vector<16x64xf32>, vector<16x64xf32>, vector<16x16xf32> -> vector<16x16xf32>
    %11 = vector.broadcast %1 : vector<1x16xf32> to vector<16x16xf32>
    %12 = arith.addf %10, %11 : vector<16x16xf32>
    %cst_13 = arith.constant dense<0xFF800000> : vector<16xf32>
    %13 = vector.multi_reduction <maximumf>, %12, %cst_13 [1] : vector<16x16xf32> to vector<16xf32>
    %14 = vector.shape_cast %13 : vector<16xf32> to vector<16x1xf32>
    %15 = vector.broadcast %14 : vector<16x1xf32> to vector<16x16xf32>
    %16 = arith.subf %12, %15 : vector<16x16xf32>
    %17 = math.exp %16 : vector<16x16xf32>
    %cst_14 = arith.constant dense<0.000000e+00> : vector<16xf32>
    %18 = vector.multi_reduction <add>, %17, %cst_14 [1] : vector<16x16xf32> to vector<16xf32>
    %19 = vector.shape_cast %18 : vector<16xf32> to vector<16x1xf32>
    %cst_15 = arith.constant dense<0.000000e+00> : vector<16x64xf32>
    %20 = tpu.matmul %17, %9, %cst_15 {dimension_numbers = #tpu.dot_dimension_numbers<[1], [0], [0], [1], [0, 0, 1, 1], [], []>} : vector<16x16xf32>, vector<16x64xf32>, vector<16x64xf32> -> vector<16x64xf32>
    %21 = tpu.reciprocal %19 {approx = true} : vector<16x1xf32> -> vector<16x1xf32>
    %22 = vector.broadcast %21 : vector<16x1xf32> to vector<16x64xf32>
    %23 = arith.mulf %20, %22 : vector<16x64xf32>
    %c0_16 = arith.constant 0 : index
    %c0_17 = arith.constant 0 : index
    %c64 = arith.constant 64 : index
    %24 = vector.load %arg2[%c0_16, %c0_17, %c64] : memref<1x16x128xf32, #tpu.memory_space<vmem>>, vector<1x16x64xf32>
    %25 = vector.shape_cast %24 : vector<1x16x64xf32> to vector<16x64xf32>
    %cst_18 = arith.constant 0.0883883461 : f32
    %26 = vector.broadcast %cst_18 : f32 to vector<16x64xf32>
    %27 = arith.mulf %25, %26 : vector<16x64xf32>
    %c0_19 = arith.constant 0 : index
    %c0_20 = arith.constant 0 : index
    %c64_21 = arith.constant 64 : index
    %28 = vector.load %arg3[%c0_19, %c0_20, %c64_21] : memref<1x16x128xf32, #tpu.memory_space<vmem>>, vector<1x16x64xf32>
    %29 = vector.shape_cast %28 : vector<1x16x64xf32> to vector<16x64xf32>
    %c0_22 = arith.constant 0 : index
    %c0_23 = arith.constant 0 : index
    %c64_24 = arith.constant 64 : index
    %30 = vector.load %arg4[%c0_22, %c0_23, %c64_24] : memref<1x16x128xf32, #tpu.memory_space<vmem>>, vector<1x16x64xf32>
    %31 = vector.shape_cast %30 : vector<1x16x64xf32> to vector<16x64xf32>
    %cst_25 = arith.constant dense<0.000000e+00> : vector<16x16xf32>
    %32 = tpu.matmul %27, %29, %cst_25 {dimension_numbers = #tpu.dot_dimension_numbers<[1], [1], [0], [0], [0, 0, 1, 0], [], []>} : vector<16x64xf32>, vector<16x64xf32>, vector<16x16xf32> -> vector<16x16xf32>
    %33 = vector.broadcast %1 : vector<1x16xf32> to vector<16x16xf32>
    %34 = arith.addf %32, %33 : vector<16x16xf32>
    %cst_26 = arith.constant dense<0xFF800000> : vector<16xf32>
    %35 = vector.multi_reduction <maximumf>, %34, %cst_26 [1] : vector<16x16xf32> to vector<16xf32>
    %36 = vector.shape_cast %35 : vector<16xf32> to vector<16x1xf32>
    %37 = vector.broadcast %36 : vector<16x1xf32> to vector<16x16xf32>
    %38 = arith.subf %34, %37 : vector<16x16xf32>
    %39 = math.exp %38 : vector<16x16xf32>
    %cst_27 = arith.constant dense<0.000000e+00> : vector<16xf32>
    %40 = vector.multi_reduction <add>, %39, %cst_27 [1] : vector<16x16xf32> to vector<16xf32>
    %41 = vector.shape_cast %40 : vector<16xf32> to vector<16x1xf32>
    %cst_28 = arith.constant dense<0.000000e+00> : vector<16x64xf32>
    %42 = tpu.matmul %39, %31, %cst_28 {dimension_numbers = #tpu.dot_dimension_numbers<[1], [0], [0], [1], [0, 0, 1, 1], [], []>} : vector<16x16xf32>, vector<16x64xf32>, vector<16x64xf32> -> vector<16x64xf32>
    %43 = tpu.reciprocal %41 {approx = true} : vector<16x1xf32> -> vector<16x1xf32>
    %44 = vector.broadcast %43 : vector<16x1xf32> to vector<16x64xf32>
    %45 = arith.mulf %42, %44 : vector<16x64xf32>
    %46 = tpu.concatenate %23, %45 in 1 : vector<16x64xf32>, vector<16x64xf32> -> vector<16x128xf32>
    %c0_29 = arith.constant 0 : index
    %c0_30 = arith.constant 0 : index
    %c0_31 = arith.constant 0 : index
    %47 = vector.load %arg6[%c0_29, %c0_30, %c0_31] : memref<1x16x128xf32, #tpu.memory_space<vmem>>, vector<1x16x128xf32>
    %48 = vector.shape_cast %47 : vector<1x16x128xf32> to vector<16x128xf32>
    %49 = vector.shape_cast %46 : vector<16x128xf32> to vector<1x16x128xf32>
    tpu.vector_store %arg6[%c0_29, %c0_30, %c0_31], %49 {strides = array<i32>} : memref<1x16x128xf32, #tpu.memory_space<vmem>>, vector<1x16x128xf32>,
    return
  }
  func.func @transform_0(%arg0: i32, %arg1: i32) -> (i32, i32, i32) {
    %c0_i32 = arith.constant 0 : i32
    %c0_i32_0 = arith.constant 0 : i32
    return %arg0, %arg1, %c0_i32 : i32, i32, i32
  }
  func.func @transform_1(%arg0: i32, %arg1: i32) -> (i32, i32, i32) {
    %c0_i32 = arith.constant 0 : i32
    %c1_i32 = arith.constant 1 : i32
    %c0_i32_0 = arith.constant 0 : i32
    return %arg0, %c0_i32, %c1_i32 : i32, i32, i32
  }
  func.func @transform_2(%arg0: i32, %arg1: i32) -> (i32, i32, i32) {
    %c0_i32 = arith.constant 0 : i32
    %c2_i32 = arith.constant 2 : i32
    %c0_i32_0 = arith.constant 0 : i32
    return %arg0, %c0_i32, %c2_i32 : i32, i32, i32
  }
  func.func @transform_3(%arg0: i32, %arg1: i32) -> (i32, i32, i32, i32) {
    %c0_i32 = arith.constant 0 : i32
    %c0_i32_0 = arith.constant 0 : i32
    %c0_i32_1 = arith.constant 0 : i32
    %c0_i32_2 = arith.constant 0 : i32
    return %arg0, %c0_i32, %c0_i32_0, %c0_i32_1 : i32, i32, i32, i32
  }
  func.func @transform_4(%arg0: i32, %arg1: i32) -> (i32, i32, i32) {
    %c0_i32 = arith.constant 0 : i32
    %c0_i32_0 = arith.constant 0 : i32
    return %arg0, %arg1, %c0_i32 : i32, i32, i32
  }
}

module attributes {stable_mosaic.version = 11 : i64} {
  func.func @kernel(%arg0: i32, %arg1: i32, %arg2: i32, %arg3: memref<32x128xf32, #tpu.memory_space<vmem>>, %arg4: memref<128x128xf32, #tpu.memory_space<vmem>>, %arg5: memref<1x128xf32, #tpu.memory_space<vmem>>, %arg6: memref<1x128xf32, #tpu.memory_space<vmem>>, %arg7: memref<32x128xf32, #tpu.memory_space<vmem>>) attributes {dimension_semantics = [#tpu.dimension_semantics<parallel>, #tpu.dimension_semantics<parallel>, #tpu.dimension_semantics<arbitrary>], iteration_bounds = array<i64: 1, 3, 1>, scalar_prefetch = 0 : i64, scratch_operands = 0 : i64, tpu.core_type = #tpu.core_type<tc>, window_params = [{transform_indices = @transform_0, window_bounds = array<i64: 32, 128>}, {transform_indices = @transform_1, window_bounds = array<i64: 128, 128>}, {transform_indices = @transform_2, window_bounds = array<i64: 1, 128>}, {transform_indices = @transform_3, window_bounds = array<i64: 1, 128>}, {transform_indices = @transform_4, window_bounds = array<i64: 32, 128>}]} {
    %c0 = arith.constant 0 : index
    %c0_0 = arith.constant 0 : index
    %0 = vector.load %arg3[%c0, %c0_0] : memref<32x128xf32, #tpu.memory_space<vmem>>, vector<32x128xf32>
    %cst = arith.constant dense<0.000000e+00> : vector<32xf32>
    %1 = vector.multi_reduction <add>, %0, %cst [1] : vector<32x128xf32> to vector<32xf32>
    %2 = vector.shape_cast %1 : vector<32xf32> to vector<32x1xf32>
    %cst_1 = arith.constant 1.280000e+02 : f32
    %3 = vector.broadcast %cst_1 : f32 to vector<32x1xf32>
    %4 = arith.divf %2, %3 : vector<32x1xf32>
    %5 = vector.broadcast %4 : vector<32x1xf32> to vector<32x128xf32>
    %6 = arith.subf %0, %5 : vector<32x128xf32>
    %7 = arith.mulf %6, %6 : vector<32x128xf32>
    %cst_2 = arith.constant dense<0.000000e+00> : vector<32xf32>
    %8 = vector.multi_reduction <add>, %7, %cst_2 [1] : vector<32x128xf32> to vector<32xf32>
    %9 = vector.shape_cast %8 : vector<32xf32> to vector<32x1xf32>
    %cst_3 = arith.constant 1.280000e+02 : f32
    %10 = vector.broadcast %cst_3 : f32 to vector<32x1xf32>
    %11 = arith.divf %9, %10 : vector<32x1xf32>
    %cst_4 = arith.constant 9.99999974E-6 : f32
    %12 = vector.broadcast %cst_4 : f32 to vector<32x1xf32>
    %13 = arith.addf %11, %12 : vector<32x1xf32>
    %14 = math.rsqrt %13 : vector<32x1xf32>
    %15 = vector.broadcast %14 : vector<32x1xf32> to vector<32x128xf32>
    %16 = arith.mulf %6, %15 : vector<32x128xf32>
    %c0_5 = arith.constant 0 : index
    %c0_6 = arith.constant 0 : index
    %17 = vector.load %arg5[%c0_5, %c0_6] : memref<1x128xf32, #tpu.memory_space<vmem>>, vector<1x128xf32>
    %18 = vector.broadcast %17 : vector<1x128xf32> to vector<32x128xf32>
    %19 = arith.mulf %16, %18 : vector<32x128xf32>
    %c0_7 = arith.constant 0 : index
    %c0_8 = arith.constant 0 : index
    %20 = vector.load %arg6[%c0_7, %c0_8] : memref<1x128xf32, #tpu.memory_space<vmem>>, vector<1x128xf32>
    %21 = vector.broadcast %20 : vector<1x128xf32> to vector<32x128xf32>
    %22 = arith.addf %19, %21 : vector<32x128xf32>
    %c0_9 = arith.constant 0 : index
    %c0_10 = arith.constant 0 : index
    %23 = vector.load %arg4[%c0_9, %c0_10] : memref<128x128xf32, #tpu.memory_space<vmem>>, vector<128x128xf32>
    %cst_11 = arith.constant dense<0.000000e+00> : vector<32x128xf32>
    %24 = tpu.matmul %22, %23, %cst_11 {dimension_numbers = #tpu.dot_dimension_numbers<[1], [0], [0], [1], [0, 0, 1, 1], [], []>} : vector<32x128xf32>, vector<128x128xf32>, vector<32x128xf32> -> vector<32x128xf32>
    %c0_12 = arith.constant 0 : index
    %c0_13 = arith.constant 0 : index
    %25 = vector.load %arg7[%c0_12, %c0_13] : memref<32x128xf32, #tpu.memory_space<vmem>>, vector<32x128xf32>
    tpu.vector_store %arg7[%c0_12, %c0_13], %24 {strides = array<i32>} : memref<32x128xf32, #tpu.memory_space<vmem>>, vector<32x128xf32>,
    return
  }
  func.func @transform_0(%arg0: i32, %arg1: i32, %arg2: i32) -> (i32, i32) {
    %c0_i32 = arith.constant 0 : i32
    return %arg0, %arg2 : i32, i32
  }
  func.func @transform_1(%arg0: i32, %arg1: i32, %arg2: i32) -> (i32, i32) {
    %c0_i32 = arith.constant 0 : i32
    return %arg2, %arg1 : i32, i32
  }
  func.func @transform_2(%arg0: i32, %arg1: i32, %arg2: i32) -> (i32, i32) {
    %c0_i32 = arith.constant 0 : i32
    %c0_i32_0 = arith.constant 0 : i32
    return %c0_i32, %arg2 : i32, i32
  }
  func.func @transform_3(%arg0: i32, %arg1: i32, %arg2: i32) -> (i32, i32) {
    %c0_i32 = arith.constant 0 : i32
    %c0_i32_0 = arith.constant 0 : i32
    return %c0_i32, %arg2 : i32, i32
  }
  func.func @transform_4(%arg0: i32, %arg1: i32, %arg2: i32) -> (i32, i32) {
    %c0_i32 = arith.constant 0 : i32
    return %arg0, %arg1 : i32, i32
  }
}

module attributes {stable_mosaic.version = 11 : i64} {
  func.func @kernel(%arg0: i32, %arg1: i32, %arg2: i32, %arg3: memref<32x128xf32, #tpu.memory_space<vmem>>, %arg4: memref<128x128xf32, #tpu.memory_space<vmem>>, %arg5: memref<32x128xf32, #tpu.memory_space<vmem>>, %arg6: memref<32x128xf32, #tpu.memory_space<vmem>>) attributes {dimension_semantics = [#tpu.dimension_semantics<parallel>, #tpu.dimension_semantics<parallel>, #tpu.dimension_semantics<arbitrary>], iteration_bounds = array<i64: 1, 1, 1>, scalar_prefetch = 0 : i64, scratch_operands = 0 : i64, tpu.core_type = #tpu.core_type<tc>, window_params = [{transform_indices = @transform_0, window_bounds = array<i64: 32, 128>}, {transform_indices = @transform_1, window_bounds = array<i64: 128, 128>}, {transform_indices = @transform_2, window_bounds = array<i64: 32, 128>}, {transform_indices = @transform_3, window_bounds = array<i64: 32, 128>}]} {
    %c0 = arith.constant 0 : index
    %c0_0 = arith.constant 0 : index
    %0 = vector.load %arg3[%c0, %c0_0] : memref<32x128xf32, #tpu.memory_space<vmem>>, vector<32x128xf32>
    %c0_1 = arith.constant 0 : index
    %c0_2 = arith.constant 0 : index
    %1 = vector.load %arg4[%c0_1, %c0_2] : memref<128x128xf32, #tpu.memory_space<vmem>>, vector<128x128xf32>
    %cst = arith.constant dense<0.000000e+00> : vector<32x128xf32>
    %2 = tpu.matmul %0, %1, %cst {dimension_numbers = #tpu.dot_dimension_numbers<[1], [0], [0], [1], [0, 0, 1, 1], [], []>} : vector<32x128xf32>, vector<128x128xf32>, vector<32x128xf32> -> vector<32x128xf32>
    %c0_3 = arith.constant 0 : index
    %c0_4 = arith.constant 0 : index
    %3 = vector.load %arg5[%c0_3, %c0_4] : memref<32x128xf32, #tpu.memory_space<vmem>>, vector<32x128xf32>
    %4 = arith.addf %2, %3 : vector<32x128xf32>
    %c0_5 = arith.constant 0 : index
    %c0_6 = arith.constant 0 : index
    %5 = vector.load %arg6[%c0_5, %c0_6] : memref<32x128xf32, #tpu.memory_space<vmem>>, vector<32x128xf32>
    tpu.vector_store %arg6[%c0_5, %c0_6], %4 {strides = array<i32>} : memref<32x128xf32, #tpu.memory_space<vmem>>, vector<32x128xf32>,
    return
  }
  func.func @transform_0(%arg0: i32, %arg1: i32, %arg2: i32) -> (i32, i32) {
    %c0_i32 = arith.constant 0 : i32
    return %arg0, %arg2 : i32, i32
  }
  func.func @transform_1(%arg0: i32, %arg1: i32, %arg2: i32) -> (i32, i32) {
    %c0_i32 = arith.constant 0 : i32
    return %arg2, %arg1 : i32, i32
  }
  func.func @transform_2(%arg0: i32, %arg1: i32, %arg2: i32) -> (i32, i32) {
    %c0_i32 = arith.constant 0 : i32
    return %arg0, %arg1 : i32, i32
  }
  func.func @transform_3(%arg0: i32, %arg1: i32, %arg2: i32) -> (i32, i32) {
    %c0_i32 = arith.constant 0 : i32
    return %arg0, %arg1 : i32, i32
  }
}

module attributes {stable_mosaic.version = 11 : i64} {
  func.func @kernel(%arg0: i32, %arg1: i32, %arg2: i32, %arg3: memref<32x128xf32, #tpu.memory_space<vmem>>, %arg4: memref<128x256xf32, #tpu.memory_space<vmem>>, %arg5: memref<1x128xf32, #tpu.memory_space<vmem>>, %arg6: memref<1x128xf32, #tpu.memory_space<vmem>>, %arg7: memref<1x256xf32, #tpu.memory_space<vmem>>, %arg8: memref<32x256xf32, #tpu.memory_space<vmem>>) attributes {dimension_semantics = [#tpu.dimension_semantics<parallel>, #tpu.dimension_semantics<parallel>, #tpu.dimension_semantics<arbitrary>], iteration_bounds = array<i64: 1, 1, 1>, scalar_prefetch = 0 : i64, scratch_operands = 0 : i64, tpu.core_type = #tpu.core_type<tc>, window_params = [{transform_indices = @transform_0, window_bounds = array<i64: 32, 128>}, {transform_indices = @transform_1, window_bounds = array<i64: 128, 256>}, {transform_indices = @transform_2, window_bounds = array<i64: 1, 128>}, {transform_indices = @transform_3, window_bounds = array<i64: 1, 128>}, {transform_indices = @transform_4, window_bounds = array<i64: 1, 256>}, {transform_indices = @transform_5, window_bounds = array<i64: 32, 256>}]} {
    %c0 = arith.constant 0 : index
    %c0_0 = arith.constant 0 : index
    %0 = vector.load %arg3[%c0, %c0_0] : memref<32x128xf32, #tpu.memory_space<vmem>>, vector<32x128xf32>
    %cst = arith.constant dense<0.000000e+00> : vector<32xf32>
    %1 = vector.multi_reduction <add>, %0, %cst [1] : vector<32x128xf32> to vector<32xf32>
    %2 = vector.shape_cast %1 : vector<32xf32> to vector<32x1xf32>
    %cst_1 = arith.constant 1.280000e+02 : f32
    %3 = vector.broadcast %cst_1 : f32 to vector<32x1xf32>
    %4 = arith.divf %2, %3 : vector<32x1xf32>
    %5 = vector.broadcast %4 : vector<32x1xf32> to vector<32x128xf32>
    %6 = arith.subf %0, %5 : vector<32x128xf32>
    %7 = arith.mulf %6, %6 : vector<32x128xf32>
    %cst_2 = arith.constant dense<0.000000e+00> : vector<32xf32>
    %8 = vector.multi_reduction <add>, %7, %cst_2 [1] : vector<32x128xf32> to vector<32xf32>
    %9 = vector.shape_cast %8 : vector<32xf32> to vector<32x1xf32>
    %cst_3 = arith.constant 1.280000e+02 : f32
    %10 = vector.broadcast %cst_3 : f32 to vector<32x1xf32>
    %11 = arith.divf %9, %10 : vector<32x1xf32>
    %cst_4 = arith.constant 9.99999974E-6 : f32
    %12 = vector.broadcast %cst_4 : f32 to vector<32x1xf32>
    %13 = arith.addf %11, %12 : vector<32x1xf32>
    %14 = math.rsqrt %13 : vector<32x1xf32>
    %15 = vector.broadcast %14 : vector<32x1xf32> to vector<32x128xf32>
    %16 = arith.mulf %6, %15 : vector<32x128xf32>
    %c0_5 = arith.constant 0 : index
    %c0_6 = arith.constant 0 : index
    %17 = vector.load %arg5[%c0_5, %c0_6] : memref<1x128xf32, #tpu.memory_space<vmem>>, vector<1x128xf32>
    %18 = vector.broadcast %17 : vector<1x128xf32> to vector<32x128xf32>
    %19 = arith.mulf %16, %18 : vector<32x128xf32>
    %c0_7 = arith.constant 0 : index
    %c0_8 = arith.constant 0 : index
    %20 = vector.load %arg6[%c0_7, %c0_8] : memref<1x128xf32, #tpu.memory_space<vmem>>, vector<1x128xf32>
    %21 = vector.broadcast %20 : vector<1x128xf32> to vector<32x128xf32>
    %22 = arith.addf %19, %21 : vector<32x128xf32>
    %c0_9 = arith.constant 0 : index
    %c0_10 = arith.constant 0 : index
    %23 = vector.load %arg4[%c0_9, %c0_10] : memref<128x256xf32, #tpu.memory_space<vmem>>, vector<128x256xf32>
    %cst_11 = arith.constant dense<0.000000e+00> : vector<32x256xf32>
    %24 = tpu.matmul %22, %23, %cst_11 {dimension_numbers = #tpu.dot_dimension_numbers<[1], [0], [0], [1], [0, 0, 1, 1], [], []>} : vector<32x128xf32>, vector<128x256xf32>, vector<32x256xf32> -> vector<32x256xf32>
    %c0_12 = arith.constant 0 : index
    %c0_13 = arith.constant 0 : index
    %25 = vector.load %arg7[%c0_12, %c0_13] : memref<1x256xf32, #tpu.memory_space<vmem>>, vector<1x256xf32>
    %26 = vector.broadcast %25 : vector<1x256xf32> to vector<32x256xf32>
    %27 = arith.addf %24, %26 : vector<32x256xf32>
    %cst_14 = arith.constant 0.000000e+00 : f32
    %28 = vector.broadcast %cst_14 : f32 to vector<32x256xf32>
    %29 = arith.maximumf %27, %28 : vector<32x256xf32>
    %c0_15 = arith.constant 0 : index
    %c0_16 = arith.constant 0 : index
    %30 = vector.load %arg8[%c0_15, %c0_16] : memref<32x256xf32, #tpu.memory_space<vmem>>, vector<32x256xf32>
    tpu.vector_store %arg8[%c0_15, %c0_16], %29 {strides = array<i32>} : memref<32x256xf32, #tpu.memory_space<vmem>>, vector<32x256xf32>,
    return
  }
  func.func @transform_0(%arg0: i32, %arg1: i32, %arg2: i32) -> (i32, i32) {
    %c0_i32 = arith.constant 0 : i32
    return %arg0, %arg2 : i32, i32
  }
  func.func @transform_1(%arg0: i32, %arg1: i32, %arg2: i32) -> (i32, i32) {
    %c0_i32 = arith.constant 0 : i32
    return %arg2, %arg1 : i32, i32
  }
  func.func @transform_2(%arg0: i32, %arg1: i32, %arg2: i32) -> (i32, i32) {
    %c0_i32 = arith.constant 0 : i32
    %c0_i32_0 = arith.constant 0 : i32
    return %c0_i32, %arg2 : i32, i32
  }
  func.func @transform_3(%arg0: i32, %arg1: i32, %arg2: i32) -> (i32, i32) {
    %c0_i32 = arith.constant 0 : i32
    %c0_i32_0 = arith.constant 0 : i32
    return %c0_i32, %arg2 : i32, i32
  }
  func.func @transform_4(%arg0: i32, %arg1: i32, %arg2: i32) -> (i32, i32) {
    %c0_i32 = arith.constant 0 : i32
    %c0_i32_0 = arith.constant 0 : i32
    return %c0_i32, %arg1 : i32, i32
  }
  func.func @transform_5(%arg0: i32, %arg1: i32, %arg2: i32) -> (i32, i32) {
    %c0_i32 = arith.constant 0 : i32
    return %arg0, %arg1 : i32, i32
  }
}

module attributes {stable_mosaic.version = 11 : i64} {
  func.func @kernel(%arg0: i32, %arg1: i32, %arg2: i32, %arg3: memref<32x256xf32, #tpu.memory_space<vmem>>, %arg4: memref<256x128xf32, #tpu.memory_space<vmem>>, %arg5: memref<1x128xf32, #tpu.memory_space<vmem>>, %arg6: memref<32x128xf32, #tpu.memory_space<vmem>>, %arg7: memref<32x128xf32, #tpu.memory_space<vmem>>) attributes {dimension_semantics = [#tpu.dimension_semantics<parallel>, #tpu.dimension_semantics<parallel>, #tpu.dimension_semantics<arbitrary>], iteration_bounds = array<i64: 1, 1, 1>, scalar_prefetch = 0 : i64, scratch_operands = 0 : i64, tpu.core_type = #tpu.core_type<tc>, window_params = [{transform_indices = @transform_0, window_bounds = array<i64: 32, 256>}, {transform_indices = @transform_1, window_bounds = array<i64: 256, 128>}, {transform_indices = @transform_2, window_bounds = array<i64: 1, 128>}, {transform_indices = @transform_3, window_bounds = array<i64: 32, 128>}, {transform_indices = @transform_4, window_bounds = array<i64: 32, 128>}]} {
    %c0 = arith.constant 0 : index
    %c0_0 = arith.constant 0 : index
    %0 = vector.load %arg3[%c0, %c0_0] : memref<32x256xf32, #tpu.memory_space<vmem>>, vector<32x256xf32>
    %c0_1 = arith.constant 0 : index
    %c0_2 = arith.constant 0 : index
    %1 = vector.load %arg4[%c0_1, %c0_2] : memref<256x128xf32, #tpu.memory_space<vmem>>, vector<256x128xf32>
    %cst = arith.constant dense<0.000000e+00> : vector<32x128xf32>
    %2 = tpu.matmul %0, %1, %cst {dimension_numbers = #tpu.dot_dimension_numbers<[1], [0], [0], [1], [0, 0, 1, 1], [], []>} : vector<32x256xf32>, vector<256x128xf32>, vector<32x128xf32> -> vector<32x128xf32>
    %c0_3 = arith.constant 0 : index
    %c0_4 = arith.constant 0 : index
    %3 = vector.load %arg5[%c0_3, %c0_4] : memref<1x128xf32, #tpu.memory_space<vmem>>, vector<1x128xf32>
    %4 = vector.broadcast %3 : vector<1x128xf32> to vector<32x128xf32>
    %5 = arith.addf %2, %4 : vector<32x128xf32>
    %c0_5 = arith.constant 0 : index
    %c0_6 = arith.constant 0 : index
    %6 = vector.load %arg6[%c0_5, %c0_6] : memref<32x128xf32, #tpu.memory_space<vmem>>, vector<32x128xf32>
    %7 = arith.addf %5, %6 : vector<32x128xf32>
    %c0_7 = arith.constant 0 : index
    %c0_8 = arith.constant 0 : index
    %8 = vector.load %arg7[%c0_7, %c0_8] : memref<32x128xf32, #tpu.memory_space<vmem>>, vector<32x128xf32>
    tpu.vector_store %arg7[%c0_7, %c0_8], %7 {strides = array<i32>} : memref<32x128xf32, #tpu.memory_space<vmem>>, vector<32x128xf32>,
    return
  }
  func.func @transform_0(%arg0: i32, %arg1: i32, %arg2: i32) -> (i32, i32) {
    %c0_i32 = arith.constant 0 : i32
    return %arg0, %arg2 : i32, i32
  }
  func.func @transform_1(%arg0: i32, %arg1: i32, %arg2: i32) -> (i32, i32) {
    %c0_i32 = arith.constant 0 : i32
    return %arg2, %arg1 : i32, i32
  }
  func.func @transform_2(%arg0: i32, %arg1: i32, %arg2: i32) -> (i32, i32) {
    %c0_i32 = arith.constant 0 : i32
    %c0_i32_0 = arith.constant 0 : i32
    return %c0_i32, %arg1 : i32, i32
  }
  func.func @transform_3(%arg0: i32, %arg1: i32, %arg2: i32) -> (i32, i32) {
    %c0_i32 = arith.constant 0 : i32
    return %arg0, %arg1 : i32, i32
  }
  func.func @transform_4(%arg0: i32, %arg1: i32, %arg2: i32) -> (i32, i32) {
    %c0_i32 = arith.constant 0 : i32
    return %arg0, %arg1 : i32, i32
  }
}

module attributes {stable_mosaic.version = 11 : i64} {
  func.func @_ln_kernel(%arg0: i32, %arg1: memref<32x128xf32, #tpu.memory_space<vmem>>, %arg2: memref<1x128xf32, #tpu.memory_space<vmem>>, %arg3: memref<1x128xf32, #tpu.memory_space<vmem>>, %arg4: memref<32x128xf32, #tpu.memory_space<vmem>>) attributes {dimension_semantics = [#tpu.dimension_semantics<parallel>], iteration_bounds = array<i64: 1>, scalar_prefetch = 0 : i64, scratch_operands = 0 : i64, tpu.core_type = #tpu.core_type<tc>, window_params = [{transform_indices = @transform_0, window_bounds = array<i64: 32, 128>}, {pipeline_mode = #tpu.pipeline_mode<synchronous>, transform_indices = @transform_1, window_bounds = array<i64: 1, 128>}, {pipeline_mode = #tpu.pipeline_mode<synchronous>, transform_indices = @transform_2, window_bounds = array<i64: 1, 128>}, {transform_indices = @transform_3, window_bounds = array<i64: 32, 128>}]} {
    %c0 = arith.constant 0 : index
    %c0_0 = arith.constant 0 : index
    %0 = vector.load %arg1[%c0, %c0_0] : memref<32x128xf32, #tpu.memory_space<vmem>>, vector<32x128xf32>
    %cst = arith.constant dense<0.000000e+00> : vector<32xf32>
    %1 = vector.multi_reduction <add>, %0, %cst [1] : vector<32x128xf32> to vector<32xf32>
    %2 = vector.shape_cast %1 : vector<32xf32> to vector<32x1xf32>
    %cst_1 = arith.constant 1.280000e+02 : f32
    %3 = vector.broadcast %cst_1 : f32 to vector<32x1xf32>
    %4 = arith.divf %2, %3 : vector<32x1xf32>
    %5 = vector.broadcast %4 : vector<32x1xf32> to vector<32x128xf32>
    %6 = arith.subf %0, %5 : vector<32x128xf32>
    %7 = arith.mulf %6, %6 : vector<32x128xf32>
    %cst_2 = arith.constant dense<0.000000e+00> : vector<32xf32>
    %8 = vector.multi_reduction <add>, %7, %cst_2 [1] : vector<32x128xf32> to vector<32xf32>
    %9 = vector.shape_cast %8 : vector<32xf32> to vector<32x1xf32>
    %cst_3 = arith.constant 1.280000e+02 : f32
    %10 = vector.broadcast %cst_3 : f32 to vector<32x1xf32>
    %11 = arith.divf %9, %10 : vector<32x1xf32>
    %cst_4 = arith.constant 9.99999974E-6 : f32
    %12 = vector.broadcast %cst_4 : f32 to vector<32x1xf32>
    %13 = arith.addf %11, %12 : vector<32x1xf32>
    %14 = math.rsqrt %13 : vector<32x1xf32>
    %15 = vector.broadcast %14 : vector<32x1xf32> to vector<32x128xf32>
    %16 = arith.mulf %6, %15 : vector<32x128xf32>
    %c0_5 = arith.constant 0 : index
    %c0_6 = arith.constant 0 : index
    %17 = vector.load %arg2[%c0_5, %c0_6] : memref<1x128xf32, #tpu.memory_space<vmem>>, vector<1x128xf32>
    %18 = vector.broadcast %17 : vector<1x128xf32> to vector<32x128xf32>
    %19 = arith.mulf %16, %18 : vector<32x128xf32>
    %c0_7 = arith.constant 0 : index
    %c0_8 = arith.constant 0 : index
    %20 = vector.load %arg3[%c0_7, %c0_8] : memref<1x128xf32, #tpu.memory_space<vmem>>, vector<1x128xf32>
    %21 = vector.broadcast %20 : vector<1x128xf32> to vector<32x128xf32>
    %22 = arith.addf %19, %21 : vector<32x128xf32>
    %c0_9 = arith.constant 0 : index
    %c0_10 = arith.constant 0 : index
    %23 = vector.load %arg4[%c0_9, %c0_10] : memref<32x128xf32, #tpu.memory_space<vmem>>, vector<32x128xf32>
    tpu.vector_store %arg4[%c0_9, %c0_10], %22 {strides = array<i32>} : memref<32x128xf32, #tpu.memory_space<vmem>>, vector<32x128xf32>,
    return
  }
  func.func @transform_0(%arg0: i32) -> (i32, i32) {
    %c0_i32 = arith.constant 0 : i32
    %c0_i32_0 = arith.constant 0 : i32
    return %arg0, %c0_i32 : i32, i32
  }
  func.func @transform_1(%arg0: i32) -> (i32, i32) {
    %c0_i32 = arith.constant 0 : i32
    %c0_i32_0 = arith.constant 0 : i32
    %c0_i32_1 = arith.constant 0 : i32
    return %c0_i32, %c0_i32_0 : i32, i32
  }
  func.func @transform_2(%arg0: i32) -> (i32, i32) {
    %c0_i32 = arith.constant 0 : i32
    %c0_i32_0 = arith.constant 0 : i32
    %c0_i32_1 = arith.constant 0 : i32
    return %c0_i32, %c0_i32_0 : i32, i32
  }
  func.func @transform_3(%arg0: i32) -> (i32, i32) {
    %c0_i32 = arith.constant 0 : i32
    %c0_i32_0 = arith.constant 0 : i32
    return %arg0, %c0_i32 : i32, i32
  }
}

</mosaic_0001>

<bundles_post_ra>
// kernel: _forward.13
= control target key start
LH: loop header
LB: loop body
LE: loop exit
PB: predicated region body
PF: predicated region fallthrough
CT: control target
= control target key end

     0   :  { %8 = vsyncpa [#allocation3], 0  ;;  %s486_s0 = inlined_call_operand.hbm [shape: f32[32,128], index: 0, kind: input, shape index: {}]   ;;  %s487_s1 = inlined_call_operand.hbm [shape: f32[128,128], index: 1, kind: input, shape index: {}]   ;;  %s488_s2 = inlined_call_operand.hbm [shape: f32[32,128], index: 2, kind: input, shape index: {}]   ;;  %s489_s3 = inlined_call_operand.hbm [shape: f32[32,128], index: 3, kind: output, shape index: {}]  }
   0x1   :  { %9 = vsyncpa [#allocation6], 0 }
   0x2   :  { %10 = vsyncpa [#allocation4], 0  ;;  %s393_s12 = smov [#allocation5]   ;;  %s394_s14 = smov [#allocation2]  }
   0x3   :  { %s28_s13 = sshll.u32 %s393_s12, 4  ;;  %s16_s15 = sshll.u32 %s394_s14, 4  ;;  %s29_s13 = int_to_ptr.vmem [resolvable:$true] %s28_s13  ;;  %s419_s15 = int_to_ptr.vmem [resolvable:$true] %s16_s15 }
   0x4   :  { %s299_s18 = scalar_lea.hbm %s487_s1, 2048 }
   0x5   :  { %p300_p0 = scmp.ne.s32.totalorder %s487_s1, %s299_s18  ;;  %p303_p1 = scmp.lt.u32.totalorder %s299_s18, %s487_s1 }
   0x7   :  { %p305_p2 = pnand %p303_p1, %p300_p0 }
   0x9   :  { %308 = shalt.err (!%p305_p2)
}
   0xa   :  { %s309_s23 = scalar_lea.vmem %s29_s13, 2048  ;;  %p314_p4 = scmp.lt.s32.totalorder %s29_s13, %s29_s13 }
   0xb   :  { %p310_p3 = scmp.ne.s32.totalorder %s29_s13, %s309_s23  ;;  %p315_p5 = scmp.lt.s32.totalorder %s309_s23, %s309_s23 }
   0xd   :  { %p316_p6 = por %p315_p5, %p314_p4 }
   0xf   :  { %p317_p7 = pnand %p316_p6, %p310_p3 }
  0x11   :  { %320 = shalt.err (!%p317_p7)
}
  0x12   :  { %s395_s24 = smov 128   ;;  %s396_s25 = smov 8  }
  0x13   :  { %34 = dma.hbm_to_vmem [thread:$0]  %s487_s1, 2048, %s29_s13, [#allocation6], %s395_s24, %s395_s24, %s396_s25  }
  0x14   :  { %s321_s30 = scalar_lea.hbm %s486_s0, 512 }
  0x15   :  { %p322_p8 = scmp.ne.s32.totalorder %s486_s0, %s321_s30  ;;  %p325_p9 = scmp.lt.u32.totalorder %s321_s30, %s486_s0 }
  0x17   :  { %p327_p10 = pnand %p325_p9, %p322_p8 }
  0x19   :  { %330 = shalt.err (!%p327_p10)
}
  0x1a   :  { %s331_s8 = scalar_lea.vmem %s419_s15, 512  ;;  %p336_p12 = scmp.lt.s32.totalorder %s419_s15, %s419_s15 }
  0x1b   :  { %p332_p11 = scmp.ne.s32.totalorder %s419_s15, %s331_s8  ;;  %p337_p13 = scmp.lt.s32.totalorder %s331_s8, %s331_s8 }
  0x1d   :  { %p338_p0 = por %p337_p13, %p336_p12 }
  0x1f   :  { %p339_p1 = pnand %p338_p0, %p332_p11 }
  0x21   :  { %342 = shalt.err (!%p339_p1)
}
  0x22   :  { %22 = dma.hbm_to_vmem [thread:$0]  %s486_s0, 512, %s419_s15, [#allocation3], %s395_s24, %s395_s24, %s396_s25  }
  0x23   :  { %s397_s10 = smov [#allocation7]   ;;  %s343_s14 = scalar_lea.hbm %s488_s2, 512 }
  0x24   :  { %s40_s11 = sshll.u32 %s397_s10, 4  ;;  %p344_p2 = scmp.ne.s32.totalorder %s488_s2, %s343_s14  ;;  %s41_s11 = int_to_ptr.vmem [resolvable:$true] %s40_s11 }
  0x25   :  { %p347_p3 = scmp.lt.u32.totalorder %s343_s14, %s488_s2 }
  0x27   :  { %p349_p4 = pnand %p347_p3, %p344_p2 }
  0x29   :  { %352 = shalt.err (!%p349_p4)
}
  0x2a   :  { %s353_s20 = scalar_lea.vmem %s41_s11, 512  ;;  %p358_p6 = scmp.lt.s32.totalorder %s41_s11, %s41_s11 }
  0x2b   :  { %p354_p5 = scmp.ne.s32.totalorder %s41_s11, %s353_s20  ;;  %p359_p7 = scmp.lt.s32.totalorder %s353_s20, %s353_s20 }
  0x2d   :  { %p360_p8 = por %p359_p7, %p358_p6 }
  0x2f   :  { %p361_p9 = pnand %p360_p8, %p354_p5 }
  0x31   :  { %364 = shalt.err (!%p361_p9)
}
  0x32   :  { %46 = dma.hbm_to_vmem [thread:$0]  %s488_s2, 512, %s41_s11, [#allocation6], %s395_s24, %s395_s24, %s396_s25  }
  0x33   :  { %387 = dma.done.wait [#allocation3], 512  }
  0x34   :  { %388 = vsyncadd [#allocation3], 4294966784 }
  0x35   :  { %389 = dma.done.wait [#allocation6], 2560  }
  0x36   :  { %390 = vsyncadd [#allocation6], 4294964736  ;;  %v60_v0 = vld [vmem:[#allocation5] sm:$0xff]  ;;  %v61_v1 = vld [vmem:[#allocation5 + $0x8] sm:$0xff]  ;;  %s398_s2 = smov [#allocation8]  }
  0x37   :  { %v62_v2 = vld [vmem:[#allocation5 + $0x10] sm:$0xff]  ;;  %v245_v3 = vpack.c.bf16 %v61_v1, %v60_v0  ;;  %v63_v4 = vld [vmem:[#allocation5 + $0x18] sm:$0xff]  ;;  %v64_v6 = vld [vmem:[#allocation5 + $0x20] sm:$0xff]  ;;  %s174_s21 = sshll.u32 %s398_s2, 4  ;;  %s175_s21 = int_to_ptr.vmem [resolvable:$true] %s174_s21 }
  0x38   :  { %v249_v5 = vpack.c.bf16 %v63_v4, %v62_v2  ;;  %v65_v7 = vld [vmem:[#allocation5 + $0x28] sm:$0xff]  ;;  %v56_v9 = vld [vmem:[#allocation2] sm:$0xff]  ;;  %v58_v10 = vld [vmem:[#allocation2 + $0x10] sm:$0xff]  ;;  %s365_s22 = scalar_lea.vmem %s175_s21, 512  ;;  %p370_p11 = scmp.lt.s32.totalorder %s175_s21, %s175_s21 }
  0x39   :  { %246 = vmatprep.subr.bf16.mxu0 %v245_v3  ;;  %277 = vmatprep.subr.bf16.mxu1 %v245_v3  ;;  %v253_v8 = vpack.c.bf16 %v65_v7, %v64_v6  ;;  %v66_v11 = vld [vmem:[#allocation5 + $0x30] sm:$0xff]  ;;  %v67_v12 = vld [vmem:[#allocation5 + $0x38] sm:$0xff]  ;;  %v68_v14 = vld [vmem:[#allocation5 + $0x40] sm:$0xff]  ;;  %p366_p10 = scmp.ne.s32.totalorder %s175_s21, %s365_s22  ;;  %p371_p12 = scmp.lt.s32.totalorder %s365_s22, %s365_s22 }
  0x3a   :  { %248 = vmatpush3.bf16.msra.mxu0 %v245_v3  ;;  %285 = vmatpush3.bf16.msra.mxu1 %v245_v3  ;;  %v257_v13 = vpack.c.bf16 %v67_v12, %v66_v11  ;;  %v69_v15 = vld [vmem:[#allocation5 + $0x48] sm:$0xff]  ;;  %v70_v17 = vld [vmem:[#allocation5 + $0x50] sm:$0xff]  ;;  %v71_v18 = vld [vmem:[#allocation5 + $0x58] sm:$0xff] }
  0x3b   :  { %250 = vmatprep.subr.bf16.mxu0 %v249_v5  ;;  %278 = vmatprep.subr.bf16.mxu1 %v249_v5  ;;  %v261_v16 = vpack.c.bf16 %v69_v15, %v68_v14  ;;  %v265_v19 = vpack.c.bf16 %v71_v18, %v70_v17  ;;  %v72_v20 = vld [vmem:[#allocation5 + $0x60] sm:$0xff]  ;;  %v73_v21 = vld [vmem:[#allocation5 + $0x68] sm:$0xff]  ;;  %v74_v23 = vld [vmem:[#allocation5 + $0x70] sm:$0xff]  ;;  %p372_p13 = por %p371_p12, %p370_p11 }
  0x3c   :  { %239 = vmatprep.mubr.f32.mxu0 %v56_v9  ;;  %242 = vmatprep.mubr.f32.mxu1 %v58_v10  ;;  %v269_v22 = vpack.c.bf16 %v73_v21, %v72_v20  ;;  %v75_v24 = vld [vmem:[#allocation5 + $0x78] sm:$0xff]  ;;  %v57_v26 = vld [vmem:[#allocation2 + $0x8] sm:$0xff]  ;;  %v76_v30 = vld [vmem:[#allocation7] sm:$0xff] }
  0x3d   :  { %v273_v25 = vpack.c.bf16 %v75_v24, %v74_v23  ;;  %v59_v27 = vld [vmem:[#allocation2 + $0x18] sm:$0xff]  ;;  %v77_v28 = vld [vmem:[#allocation7 + $0x8] sm:$0xff]  ;;  %v78_v31 = vld [vmem:[#allocation7 + $0x10] sm:$0xff]  ;;  %p373_p0 = pnand %p372_p13, %p366_p10 }
  0x3e   :  { %252 = vmatpush3.bf16.msra.mxu0 %v249_v5  ;;  %286 = vmatpush3.bf16.msra.mxu1 %v249_v5  ;;  %v79_v29 = vld [vmem:[#allocation7 + $0x18] sm:$0xff] }
  0x3f   :  { %254 = vmatprep.subr.bf16.mxu0 %v253_v8  ;;  %279 = vmatprep.subr.bf16.mxu1 %v253_v8 }
  0x42   :  { %256 = vmatpush3.bf16.msra.mxu0 %v253_v8  ;;  %287 = vmatpush3.bf16.msra.mxu1 %v253_v8 }
  0x43   :  { %258 = vmatprep.subr.bf16.mxu0 %v257_v13  ;;  %280 = vmatprep.subr.bf16.mxu1 %v257_v13 }
  0x46   :  { %260 = vmatpush3.bf16.msra.mxu0 %v257_v13  ;;  %288 = vmatpush3.bf16.msra.mxu1 %v257_v13 }
  0x47   :  { %262 = vmatprep.subr.bf16.mxu0 %v261_v16  ;;  %281 = vmatprep.subr.bf16.mxu1 %v261_v16 }
  0x4a   :  { %264 = vmatpush3.bf16.msra.mxu0 %v261_v16  ;;  %289 = vmatpush3.bf16.msra.mxu1 %v261_v16 }
  0x4b   :  { %266 = vmatprep.subr.bf16.mxu0 %v265_v19  ;;  %282 = vmatprep.subr.bf16.mxu1 %v265_v19 }
  0x4e   :  { %268 = vmatpush3.bf16.msra.mxu0 %v265_v19  ;;  %290 = vmatpush3.bf16.msra.mxu1 %v265_v19 }
  0x4f   :  { %270 = vmatprep.subr.bf16.mxu0 %v269_v22  ;;  %283 = vmatprep.subr.bf16.mxu1 %v269_v22 }
  0x52   :  { %272 = vmatpush3.bf16.msra.mxu0 %v269_v22  ;;  %291 = vmatpush3.bf16.msra.mxu1 %v269_v22 }
  0x53   :  { %274 = vmatprep.subr.bf16.mxu0 %v273_v25  ;;  %284 = vmatprep.subr.bf16.mxu1 %v273_v25 }
  0x56   :  { %276 = vmatpush3.bf16.msra.mxu0 %v273_v25  ;;  %292 = vmatpush3.bf16.msra.mxu1 %v273_v25 }
  0x59   :  { %240 = vmatmul.mubr.f32.vlgmr.msra.gmra.mrb[0].mxu0 %v57_v26  ;;  %243 = vmatmul.mubr.f32.vlgmr.msra.gmra.mrb[0].mxu1 %v59_v27 }
 0x12c   :  { %v241_v32 = vpop.f32.mrb[0].mxu0  ;;  %v244_v33 = vpop.f32.mrb[0].mxu1 }
 0x12d   :  { %v152_v34 = vadd.f32 %v241_v32, %v77_v28  ;;  %v162_v35 = vadd.f32 %v244_v33, %v79_v29  ;;  %v146_v36 = vpop.f32.mrb[1].mxu0  ;;  %v156_v37 = vpop.f32.mrb[1].mxu1 }
 0x12e   :  { %v147_v38 = vadd.f32 %v146_v36, %v76_v30  ;;  %v157_v39 = vadd.f32 %v156_v37, %v78_v31 }
 0x12f   :  { %166 = vst [vmem:[#allocation8 + $0x8] sm:$0xff] %v152_v34  ;;  %168 = vst [vmem:[#allocation8 + $0x18] sm:$0xff] %v162_v35 }
 0x130   :  { %165 = vst [vmem:[#allocation8] sm:$0xff] %v147_v38  ;;  %167 = vst [vmem:[#allocation8 + $0x10] sm:$0xff] %v157_v39 }
 0x131   :  { %376 = shalt.err (!%p373_p0)
}
 0x132   :  { %s377_s27 = scalar_lea.hbm %s489_s3, 512 }
 0x133   :  { %p378_p1 = scmp.ne.s32.totalorder %s489_s3, %s377_s27  ;;  %p381_p2 = scmp.lt.u32.totalorder %s377_s27, %s489_s3 }
 0x135   :  { %p383_p3 = pnand %p381_p2, %p378_p1 }
 0x137   :  { %386 = shalt.err (!%p383_p3)
}
 0x138   :  { %180 = dma.vmem_to_hbm [thread:$0]  %s175_s21, 512, %s489_s3, [#allocation4], %s395_s24, %s395_s24, %s396_s25  }
 0x139   :  { %391 = dma.done.wait [#allocation4], 512  }
 0x13a   :  { %392 = vsyncadd [#allocation4], 4294966784 }
 0x13b   :  { %184 = vsyncpa [#allocation3], 1 }
 0x13c   :  { %185 = vsyncpa [#allocation6], 1 }
 0x13d   :  { %186 = vsyncpa [#allocation4], 1 }

// kernel: _forward.11
= control target key start
LH: loop header
LB: loop body
LE: loop exit
PB: predicated region body
PF: predicated region fallthrough
CT: control target
= control target key end

     0   :  { %s1425_s0 = inlined_call_operand.hbm [shape: f32[32,128], index: 0, kind: input, shape index: {}]   ;;  %s1426_s1 = inlined_call_operand.hbm [shape: f32[128,384], index: 1, kind: input, shape index: {}]   ;;  %s1427_s2 = inlined_call_operand.hbm [shape: f32[1,128], index: 2, kind: input, shape index: {}]   ;;  %s1428_s3 = inlined_call_operand.hbm [shape: f32[1,128], index: 3, kind: input, shape index: {}]   ;;  %s1429_s4 = inlined_call_operand.hbm [shape: f32[32,384], index: 4, kind: output, shape index: {}]  }
   0x1   :  { %1437 = sst [smem:[#allocation18_spill]] %s1427_s2 }
   0x2   :  { %9 = vsyncpa [#allocation3], 0 }
   0x3   :  { %10 = vsyncpa [#allocation6], 0 }
   0x4   :  { %12 = vsyncpa [#allocation6 + $0x1], 0 }
   0x5   :  { %13 = vsyncpa [#allocation9], 0 }
   0x6   :  { %14 = vsyncpa [#allocation4], 0 }
   0x7   :  { %16 = vsyncpa [#allocation4 + $0x1], 0  ;;  %s1108_s15 = smov 0   ;;  %s1110_s16 = smov 0  }
   0x8   :  { %s1112_s17 = smov 0   ;;  %s1114_s18 = smov 0  }
   0x9   :  { %s1116_s19 = smov 0   ;;  %s1118_s20 = smov 0  }
   0xa LB: > { %1438 = sst [smem:[#allocation16_spill]] %s1050_s15  ;;  %s1139_s21 = sadd.s32 4294967295, %s1070_s20   ;;  %s1070_s20 = sphi %s1118_s20, %s22_s20   ;;  %s1066_s19 = sphi %s1116_s19, %s1467_s19   ;;  %s1062_s18 = sphi %s1114_s18, %s1466_s18   ;;  %s1058_s17 = sphi %s1112_s17, %s1465_s17   ;;  %s1054_s16 = sphi %s1110_s16, %s1464_s16   ;;  %s1050_s15 = sphi %s1108_s15, %s1463_s15  }
   0xb   : > { %s629_s22 = sadd.s32 4294967294, %s1070_s20   ;;  %p85_p0 = scmp.ne.s32.totalorder %s1058_s17, %s1054_s16 }
   0xc   : > { %p86_p1 = scmp.eq.s32.totalorder %s1070_s20, 0  ;;  %p91_p2 = scmp.ne.s32.totalorder %s1054_s16, %s1050_s15 }
   0xd   : > { %p1430_p3 = scmp.eq.s32.totalorder %s1139_s21, 0  ;;  %p169_p4 = scmp.eq.s32.totalorder %s1139_s21, 2 }
   0xe   : > { %p1150_p5 = por %p86_p1, %p85_p0  ;;  %p175_p6 = scmp.eq.s32.totalorder %s629_s22, 2 }
   0xf   : > { %p1156_p7 = por %p1430_p3, %p91_p2  ;;  %p1160_p8 = por %p169_p4, %p85_p0 }
  0x10   : > { %p1164_p9 = por %p175_p6, %p91_p2  ;;  %p630_p10 = scmp.ge.s32.totalorder %s1070_s20, 1 }
  0x11   : > { %s1440_s25 = scalar_select %p1156_p7, 1, 0 }
  0x12   : > { %s1441_s26 = scalar_select %p1160_p8, 1, 0 }
  0x13   : > { %s1442_s27 = scalar_select %p1164_p9, 1, 0 }
  0x14   : > { %p182_p11 = scmp.lt.s32.totalorder %s1070_s20, 4  ;;  %s1072_s29 = smov [#allocation7]  }
  0x15   : > { %1443 = sst [smem:[#allocation17_spill]] %s1442_s27  ;;  %s214_s30 = sshll.u32 %s1072_s29, 4  ;;  %s215_s30 = int_to_ptr.vmem [resolvable:$true] %s214_s30 }
  0x16   : > { %p1170_p12 = pnand %p630_p10, %p182_p11  ;;  %p792_p13 = scmp.lt.s32.totalorder %s1070_s20, 3 }
  0x17   : > { %s1073_s7 = smov [#allocation2]   ;;  %s1447_s2 = sld [smem:[#allocation18_spill]] }
  0x18   : > { %s1444_s28 = scalar_select %p1170_p12, 1, 0 }
  0x19   : > { %p771_p0 = pneg %p1170_p12  ;;  %p1179_p1 = pnand %p792_p13, %p1150_p5 }
  0x1a   : > { %s198_s8 = sshll.u32 %s1073_s7, 4  ;;  %s1189_s8 = int_to_ptr.vmem [resolvable:$true] %s198_s8 }
  0x1b   : > { %s1445_s5 = scalar_select %p1179_p1, 1, 0 }
  0x1c   : > { %p1185_p2 = pnand %p771_p0, %p1430_p3 }
  0x1d   : > { %s862_s11 = scalar_lea.hbm %s1447_s2, 16 }
  0x1e   : > { %p863_p4 = scmp.ne.s32.totalorder %s1447_s2, %s862_s11  ;;  %p1199_p5 = pneg %p1185_p2 }
  0x1f   : > { %p869_p11 = scmp.lt.u32.totalorder %s862_s11, %s1447_s2 }
  0x20   : > { %p865_p6 = pnand %p1199_p5, %p863_p4 }
  0x22   : > { %p866_p10 = pneg %p865_p6 }
  0x24   : > { %p871_p13 = pnand %p869_p11, %p866_p10 }
  0x26   : > { %874 = shalt.err (!%p871_p13)
}
  0x27   : > { %s875_s29 = scalar_lea.vmem %s215_s30, 16  ;;  %s882_s7 = scalar_lea.vmem %s215_s30, 32 }
  0x28   : > { %p876_p0 = scmp.ne.s32.totalorder %s215_s30, %s875_s29  ;;  %p883_p8 = scmp.lt.s32.totalorder %s215_s30, %s215_s30 }
  0x29   : > { %p884_p7 = scmp.lt.s32.totalorder %s882_s7, %s875_s29 }
  0x2a   : > { %p878_p3 = pnand %p876_p0, %p1199_p5 }
  0x2b   : > { %p885_p12 = por %p884_p7, %p883_p8 }
  0x2c   : > { %p879_p9 = pneg %p878_p3 }
  0x2e   : > { %p886_p1 = pnand %p885_p12, %p879_p9 }
  0x30   : > { %889 = shalt.err (!%p886_p1)
}
  0x31   : > { %777 = dma.hbm_to_vmem [thread:$0]  (!%p1185_p2), %s1447_s2, 16, %s215_s30, [#allocation6]  }
  0x32   : > { %s890_s13 = scalar_lea.hbm %s1425_s0, 512 }
  0x33   : > { %p891_p3 = scmp.ne.s32.totalorder %s1425_s0, %s890_s13  ;;  %p897_p8 = scmp.lt.u32.totalorder %s890_s13, %s1425_s0 }
  0x35   : > { %p893_p4 = pnand %p891_p3, %p1199_p5 }
  0x37   : > { %p894_p7 = pneg %p893_p4 }
  0x39   : > { %p899_p9 = pnand %p897_p8, %p894_p7 }
  0x3b   : > { %902 = shalt.err (!%p899_p9)
}
  0x3c   : > { %s903_s30 = scalar_lea.vmem %s1189_s8, 512  ;;  %p911_p10 = scmp.lt.s32.totalorder %s1189_s8, %s1189_s8 }
  0x3d   : > { %p904_p12 = scmp.ne.s32.totalorder %s1189_s8, %s903_s30  ;;  %p912_p11 = scmp.lt.s32.totalorder %s903_s30, %s903_s30 }
  0x3f   : > { %p906_p1 = pnand %p904_p12, %p1199_p5  ;;  %p913_p13 = por %p912_p11, %p911_p10 }
  0x41   : > { %p907_p6 = pneg %p906_p1 }
  0x43   : > { %p914_p0 = pnand %p913_p13, %p907_p6 }
  0x45   : > { %917 = shalt.err (!%p914_p0)
}
  0x46   : > { %s1074_s9 = smov 128   ;;  %s1075_s10 = smov 8  }
  0x47   : > { %774 = dma.hbm_to_vmem [thread:$0]  (!%p1185_p2), %s1425_s0, 512, %s1189_s8, [#allocation3], %s1074_s9, %s1074_s9, %s1075_s10  }
  0x48   : > { %s1076_s13 = smov [#allocation8]   ;;  %s37_s24 = sadd.s32 1, %s1066_s19 }
  0x49   : > { %s227_s22 = sshll.u32 %s1076_s13, 4  ;;  %s918_s30 = scalar_lea.hbm %s1428_s3, 16  ;;  %s228_s22 = int_to_ptr.vmem [resolvable:$true] %s227_s22 }
  0x4a   : > { %p919_p3 = scmp.ne.s32.totalorder %s1428_s3, %s918_s30  ;;  %p925_p8 = scmp.lt.u32.totalorder %s918_s30, %s1428_s3 }
  0x4c   : > { %p921_p4 = pnand %p919_p3, %p1199_p5 }
  0x4e   : > { %p922_p7 = pneg %p921_p4 }
  0x50   : > { %p927_p9 = pnand %p925_p8, %p922_p7 }
  0x52   : > { %930 = shalt.err (!%p927_p9)
}
  0x53   : > { %s931_s8 = scalar_lea.vmem %s228_s22, 16  ;;  %s938_s11 = scalar_lea.vmem %s228_s22, 32 }
  0x54   : > { %p932_p12 = scmp.ne.s32.totalorder %s228_s22, %s931_s8  ;;  %p939_p10 = scmp.lt.s32.totalorder %s228_s22, %s228_s22 }
  0x55   : > { %p940_p11 = scmp.lt.s32.totalorder %s938_s11, %s931_s8 }
  0x56   : > { %p934_p1 = pnand %p932_p12, %p1199_p5 }
  0x57   : > { %p941_p13 = por %p940_p11, %p939_p10 }
  0x58   : > { %p935_p6 = pneg %p934_p1 }
  0x5a   : > { %p942_p0 = pnand %p941_p13, %p935_p6 }
  0x5c   : > { %945 = shalt.err (!%p942_p0)
}
  0x5d   : > { %780 = dma.hbm_to_vmem [thread:$0]  (!%p1185_p2), %s1428_s3, 16, %s228_s22, [#allocation9]  }
  0x5e   : > { %p39_p5 = scmp.ge.s32.totalorder %s37_s24, 3  ;;  %s238_s15 = sand.u32 1, %s1070_s20  }
  0x5f   : > { %s240_s27 = sand.u32 1, %s1058_s17   ;;  %s636_s6 = sshll.u32 %s1066_s19, 7 }
  0x60   : > { %s1469_s24 = smov (%p39_p5, %s37_s24), 0  ;;  %s635_s14 = sshll.u32 %s240_s27, 7 }
  0x61   : > { %s74_s12 = ssub.s32 %s1066_s19, %s1469_s24  ;;  %s1270_s7 = scalar_lea.hbm %s1426_s1, %s636_s6 }
  0x62   : > { %p76_p3 = scmp.eq.s32.totalorder %s74_s12, 0  ;;  %s242_s22 = scalar_lea.vmem [#allocation5], %s635_s14 }
  0x63   : > { %s251_s30 = sshll.u32 %s242_s22, 4  ;;  %s1449_s8 = sadd.s32 1, %s1058_s17  ;;  %s1277_s30 = int_to_ptr.vmem [resolvable:$true] %s251_s30 }
  0x64   : > { %s1275_s11 = scalar_select %p76_p3, %s1058_s17, %s1449_s8  }
  0x65   : > { %s1279_s2 = scalar_lea.sflag [#allocation6], %s238_s15  ;;  %s946_s23 = scalar_lea.hbm %s1270_s7, 2048 }
  0x66   : > { %p947_p2 = scmp.ne.s32.totalorder %s1270_s7, %s946_s23  ;;  %p1450_p4 = scmp.ne.s32.totalorder %s1445_s5, 0 }
  0x67   : > { %s951_s14 = scalar_lea.hbm %s1426_s1, 6144  ;;  %p952_p12 = scmp.lt.u32.totalorder %s1270_s7, %s1426_s1 }
  0x68   : > { %p948_p7 = pneg %p1450_p4  ;;  %p953_p1 = scmp.lt.u32.totalorder %s951_s14, %s946_s23 }
  0x69   : > { %p955_p10 = scmp.lt.u32.totalorder %s946_s23, %s1270_s7 }
  0x6a   : > { %p949_p8 = pnand %p948_p7, %p947_p2  ;;  %p954_p6 = por %p953_p1, %p952_p12 }
  0x6c   : > { %p950_p9 = pneg %p949_p8  ;;  %p956_p11 = por %p955_p10, %p954_p6 }
  0x6e   : > { %p957_p13 = pnand %p956_p11, %p950_p9 }
  0x70   : > { %960 = shalt.err (!%p957_p13)
}
  0x71   : > { %s961_s15 = scalar_lea.vmem %s1277_s30, 2048  ;;  %s1077_s29 = smov [#allocation5]  }
  0x72   : > { %p962_p0 = scmp.ne.s32.totalorder %s1277_s30, %s961_s15  ;;  %s966_s22 = sshll.u32 %s1077_s29, 4  ;;  %s967_s22 = int_to_ptr.vmem [resolvable:$false] %s966_s22 }
  0x73   : > { %s968_s8 = scalar_lea.vmem %s967_s22, 4096  ;;  %p969_p2 = scmp.lt.s32.totalorder %s1277_s30, %s967_s22 }
  0x74   : > { %p964_p5 = pnand %p962_p0, %p948_p7  ;;  %p970_p8 = scmp.lt.s32.totalorder %s968_s8, %s961_s15 }
  0x76   : > { %p965_p3 = pneg %p964_p5  ;;  %p971_p12 = por %p970_p8, %p969_p2 }
  0x78   : > { %p972_p1 = pnand %p971_p12, %p965_p3 }
  0x7a   : > { %975 = shalt.err (!%p972_p1)
}
  0x7b   : > { %s1078_s23 = smov 384   ;;  %p1451_p7 = scmp.ne.s32.totalorder %s1444_s28, 0 }
  0x7c   : > { %784 = dma.hbm_to_vmem [thread:$0]  (!%p1450_p4), %s1270_s7, 2048, %s1277_s30, %s1279_s2, %s1078_s23, %s1074_s9, %s1075_s10  }
  0x7d   : > { %263 = sbr.rel (%p1451_p7) target bundleno = 693 (0x2b5), region = 36  ;;  %p1452_p9 = scmp.eq.s32.totalorder (!%p1451_p7), %s1139_s21, 0 }
  0x84   : > { %1029 = dma.done.wait (%p1452_p9), [#allocation3], 512   ;;  %p1453_p6 = pmov %p1452_p9 }
  0x85   : > { %s269_s27 = sand.u32 1, %s1139_s21   ;;  %s1317_s5 = sand.u32 1, %s1054_s16  }
  0x86   : > { %1031 = vsyncadd (%p1453_p6), [#allocation3], 4294966784  ;;  %s639_s6 = sshll.u32 %s1317_s5, 7  ;;  %s270_s14 = scalar_lea.sflag [#allocation6], %s269_s27 }
  0x87   : > { %s1320_s12 = scalar_lea.vmem [#allocation5], %s639_s6  ;;  %p1454_p4 = scmp.ne.s32.totalorder %s1440_s25, 0 }
  0x89   : > { %1033 = dma.done.wait (%p1454_p4), %s270_s14, 2048  }
  0x8a   : > { %1035 = vsyncadd (%p1454_p4), %s270_s14, 4294965248  ;;  %p1455_p10 = pmov %p1453_p6 }
  0x8b   : > { %p1456_p11 = pmov %p1453_p6 }
  0x8c   : > { %1037 = dma.done.wait (%p1455_p10), [#allocation6], 16  }
  0x8d   : > { %1039 = vsyncadd (%p1456_p11), [#allocation6], 4294967280  ;;  %p1457_p13 = pmov %p1453_p6 }
  0x8e   : > { %p1458_p0 = pmov %p1453_p6 }
  0x8f   : > { %1041 = dma.done.wait (%p1457_p13), [#allocation9], 16  }
  0x90   : > { %1043 = vsyncadd (%p1458_p0), [#allocation9], 4294967280  ;;  %v309_v0 = vld [vmem:[#allocation2] sm:$0xff]  ;;  %v310_v1 = vld [vmem:[#allocation2 + $0x8] sm:$0xff]  ;;  %s642_s21 = sshll.u32 %s1317_s5, 5  ;;  %s646_s9 = sshll.u32 %s1062_s18, 7 }
  0x91   : > { %313 = vadd.xlane.f32.xlu0 %v309_v0  ;;  %315 = vadd.xlane.f32.xlu1 %v310_v1  ;;  %v311_v2 = vld [vmem:[#allocation2 + $0x10] sm:$0xff]  ;;  %v312_v3 = vld [vmem:[#allocation2 + $0x18] sm:$0xff]  ;;  %v380_v4 = vld [vmem:[%s1320_s12] sm:$0xff]  ;;  %s305_s25 = scalar_lea.vmem [#allocation10], %s642_s21  ;;  %s1377_s30 = scalar_lea.hbm %s1429_s4, %s646_s9 }
  0x92   : > { %v381_v5 = vld [vmem:[%s1320_s12 + $0x8] sm:$0xff]  ;;  %v382_v6 = vld [vmem:[%s1320_s12 + $0x10] sm:$0xff]  ;;  %v383_v8 = vld [vmem:[%s1320_s12 + $0x18] sm:$0xff]  ;;  %s501_s28 = sshll.u32 %s305_s25, 4  ;;  %s486_s2 = scalar_lea.sflag [#allocation4], %s1317_s5  ;;  %s1372_s28 = int_to_ptr.vmem [resolvable:$true] %s501_s28 }
  0x93   : > { %v707_v7 = vpack.c.bf16 %v381_v5, %v380_v4  ;;  %v711_v9 = vpack.c.bf16 %v383_v8, %v382_v6  ;;  %v384_v26 = vld [vmem:[%s1320_s12 + $0x20] sm:$0xff]  ;;  %v385_v27 = vld [vmem:[%s1320_s12 + $0x28] sm:$0xff]  ;;  %v386_v29 = vld [vmem:[%s1320_s12 + $0x30] sm:$0xff]  ;;  %s976_s18 = scalar_lea.vmem %s1372_s28, 512  ;;  %p1459_p3 = scmp.ne.s32.totalorder %s1441_s26, 0 }
  0x94   : > { %v715_v28 = vpack.c.bf16 %v385_v27, %v384_v26  ;;  %v387_v30 = vld [vmem:[%s1320_s12 + $0x38] sm:$0xff]  ;;  %v388_v32 = vld [vmem:[%s1320_s12 + $0x40] sm:$0xff]  ;;  %v389_v33 = vld [vmem:[%s1320_s12 + $0x48] sm:$0xff]  ;;  %p977_p5 = scmp.ne.s32.totalorder %s1372_s28, %s976_s18  ;;  %s1079_s13 = smov [#allocation10]  }
  0x95   : > { %317 = vadd.xlane.f32.xlu0 %v311_v2  ;;  %319 = vadd.xlane.f32.xlu1 %v312_v3  ;;  %v719_v31 = vpack.c.bf16 %v387_v30, %v386_v29  ;;  %v723_v34 = vpack.c.bf16 %v389_v33, %v388_v32  ;;  %v390_v35 = vld [vmem:[%s1320_s12 + $0x50] sm:$0xff]  ;;  %v391_v36 = vld [vmem:[%s1320_s12 + $0x58] sm:$0xff]  ;;  %v392_v38 = vld [vmem:[%s1320_s12 + $0x60] sm:$0xff]  ;;  %s980_s15 = sshll.u32 %s1079_s13, 4  ;;  %s981_s15 = int_to_ptr.vmem [resolvable:$false] %s980_s15 }
  0x96   : > { %708 = vmatprep.subr.bf16.mxu0 %v707_v7  ;;  %739 = vmatprep.subr.bf16.mxu1 %v707_v7  ;;  %v727_v37 = vpack.c.bf16 %v391_v36, %v390_v35  ;;  %v393_v39 = vld [vmem:[%s1320_s12 + $0x68] sm:$0xff]  ;;  %v394_v41 = vld [vmem:[%s1320_s12 + $0x70] sm:$0xff]  ;;  %v395_v42 = vld [vmem:[%s1320_s12 + $0x78] sm:$0xff]  ;;  %p978_p2 = pnand %p977_p5, %p1459_p3  ;;  %s982_s29 = scalar_lea.vmem %s981_s15, 1024 }
  0x97   : > { %710 = vmatpush3.bf16.msra.mxu0 %v707_v7  ;;  %747 = vmatpush3.bf16.msra.mxu1 %v707_v7  ;;  %v731_v40 = vpack.c.bf16 %v393_v39, %v392_v38  ;;  %v735_v43 = vpack.c.bf16 %v395_v42, %v394_v41  ;;  %v643_v57 = vld [vmem:[#allocation7] ss:$0 sm:$0xff]  ;;  %v644_v59 = vld [vmem:[#allocation8] ss:$0 sm:$0xff]  ;;  %p983_p12 = scmp.lt.s32.totalorder %s1372_s28, %s981_s15  ;;  %p984_p1 = scmp.lt.s32.totalorder %s982_s29, %s976_s18 }
  0x98   : > { %712 = vmatprep.subr.bf16.mxu0 %v711_v9  ;;  %740 = vmatprep.subr.bf16.mxu1 %v711_v9  ;;  %p979_p8 = pneg %p978_p2 }
  0x99   : > { %p985_p7 = por %p984_p1, %p983_p12 }
  0x9b   : > { %714 = vmatpush3.bf16.msra.mxu0 %v711_v9  ;;  %748 = vmatpush3.bf16.msra.mxu1 %v711_v9  ;;  %p986_p9 = pnand %p985_p7, %p979_p8 }
  0x9c   : > { %716 = vmatprep.subr.bf16.mxu0 %v715_v28  ;;  %741 = vmatprep.subr.bf16.mxu1 %v715_v28 }
  0x9f   : > { %718 = vmatpush3.bf16.msra.mxu0 %v715_v28  ;;  %749 = vmatpush3.bf16.msra.mxu1 %v715_v28 }
  0xa0   : > { %720 = vmatprep.subr.bf16.mxu0 %v719_v31  ;;  %742 = vmatprep.subr.bf16.mxu1 %v719_v31 }
  0xa3   : > { %722 = vmatpush3.bf16.msra.mxu0 %v719_v31  ;;  %750 = vmatpush3.bf16.msra.mxu1 %v719_v31 }
  0xa4   : > { %724 = vmatprep.subr.bf16.mxu0 %v723_v34  ;;  %743 = vmatprep.subr.bf16.mxu1 %v723_v34 }
  0xa7   : > { %726 = vmatpush3.bf16.msra.mxu0 %v723_v34  ;;  %751 = vmatpush3.bf16.msra.mxu1 %v723_v34 }
  0xa8   : > { %728 = vmatprep.subr.bf16.mxu0 %v727_v37  ;;  %744 = vmatprep.subr.bf16.mxu1 %v727_v37 }
  0xab   : > { %730 = vmatpush3.bf16.msra.mxu0 %v727_v37  ;;  %752 = vmatpush3.bf16.msra.mxu1 %v727_v37 }
  0xac   : > { %732 = vmatprep.subr.bf16.mxu0 %v731_v40  ;;  %745 = vmatprep.subr.bf16.mxu1 %v731_v40 }
  0xaf   : > { %734 = vmatpush3.bf16.msra.mxu0 %v731_v40  ;;  %753 = vmatpush3.bf16.msra.mxu1 %v731_v40 }
  0xb0   : > { %736 = vmatprep.subr.bf16.mxu0 %v735_v43  ;;  %746 = vmatprep.subr.bf16.mxu1 %v735_v43 }
  0xb3   : > { %738 = vmatpush3.bf16.msra.mxu0 %v735_v43  ;;  %754 = vmatpush3.bf16.msra.mxu1 %v735_v43 }
 0x11e   : > { %v314_v10 = vpop.xlane.xlu0 %313  ;;  %v316_v11 = vpop.xlane.xlu1 %315 }
 0x11f   : > { %v322_v12 = vmul.f32 0.0078125, %v314_v10  ;;  %v323_v13 = vmul.f32 0.0078125, %v316_v11 }
 0x121   : > { %v1338_v14 = vsub.f32 %v309_v0, %v322_v12  ;;  %v1340_v15 = vsub.f32 %v310_v1, %v323_v13 }
 0x122   : > { %v318_v16 = vpop.xlane.xlu0 %317  ;;  %v320_v17 = vpop.xlane.xlu1 %319 }
 0x123   : > { %v324_v18 = vmul.f32 0.0078125, %v318_v16  ;;  %v330_v19 = vmul.f32 %v1338_v14, %v1338_v14  ;;  %v325_v20 = vmul.f32 0.0078125, %v320_v17  ;;  %v331_v23 = vmul.f32 %v1340_v15, %v1340_v15 }
 0x125   : > { %v1344_v21 = vsub.f32 %v311_v2, %v324_v18  ;;  %334 = vadd.xlane.f32.xlu0 %v330_v19  ;;  %v1346_v22 = vsub.f32 %v312_v3, %v325_v20 }
 0x127   : > { %v332_v24 = vmul.f32 %v1344_v21, %v1344_v21  ;;  %v333_v25 = vmul.f32 %v1346_v22, %v1346_v22 }
 0x129   : > { %336 = vadd.xlane.f32.xlu0 %v331_v23  ;;  %338 = vadd.xlane.f32.xlu1 %v332_v24 }
 0x12d   : > { %340 = vadd.xlane.f32.xlu1 %v333_v25 }
 0x1b2   : > { %v335_v44 = vpop.xlane.xlu0 %334 }
 0x1b3   : > { %v342_v45 = vmul.f32 0.0078125, %v335_v44 }
 0x1b5   : > { %v346_v46 = vadd.f32 1e-05, %v342_v45 }
 0x1b6   : > { %v339_v47 = vpop.xlane.xlu1 %338  ;;  %v337_v48 = vpop.xlane.xlu0 %336 }
 0x1b7   : > { %854 = vrsqrt.f32 %v346_v46  ;;  %v344_v49 = vmul.f32 0.0078125, %v339_v47  ;;  %v343_v50 = vmul.f32 0.0078125, %v337_v48 }
 0x1b9   : > { %v348_v51 = vadd.f32 1e-05, %v344_v49  ;;  %v347_v52 = vadd.f32 1e-05, %v343_v50 }
 0x1ba   : > { %v341_v53 = vpop.xlane.xlu1 %340 }
 0x1bb   : > { %856 = vrsqrt.f32 %v348_v51  ;;  %v345_v54 = vmul.f32 0.0078125, %v341_v53 }
 0x1bc   : > { %858 = vrsqrt.f32 %v347_v52 }
 0x1bd   : > { %v349_v55 = vadd.f32 1e-05, %v345_v54 }
 0x1bf   : > { %860 = vrsqrt.f32 %v349_v55 }
 0x1c1   : > { %v855_v56 = vpop.eup %854 }
 0x1c2   : > { %v354_v58 = vmul.f32 %v855_v56, %v1338_v14 }
 0x1c4   : > { %v365_v60 = vmul.f32 %v643_v57, %v354_v58 }
 0x1c5   : > { %v857_v61 = vpop.eup %856 }
 0x1c6   : > { %v859_v62 = vpop.eup %858  ;;  %v376_v63 = vadd.f32 %v644_v59, %v365_v60  ;;  %v356_v0 = vmul.f32 %v857_v61, %v1344_v21 }
 0x1c7   : > { %v355_v1 = vmul.f32 %v859_v62, %v1340_v15 }
 0x1c8   : > { %701 = vmatprep.mubr.f32.mxu0 %v376_v63  ;;  %v367_v2 = vmul.f32 %v643_v57, %v356_v0 }
 0x1c9   : > { %v861_v3 = vpop.eup %860  ;;  %v366_v4 = vmul.f32 %v643_v57, %v355_v1 }
 0x1ca   : > { %v378_v5 = vadd.f32 %v644_v59, %v367_v2  ;;  %v357_v6 = vmul.f32 %v861_v3, %v1346_v22 }
 0x1cb   : > { %v377_v7 = vadd.f32 %v644_v59, %v366_v4 }
 0x1cc   : > { %704 = vmatprep.mubr.f32.mxu1 %v378_v5  ;;  %v368_v8 = vmul.f32 %v643_v57, %v357_v6 }
 0x1cd   : > { %702 = vmatmul.mubr.f32.vlgmr.msra.gmra.mrb[0].mxu0 %v377_v7 }
 0x1ce   : > { %v379_v9 = vadd.f32 %v644_v59, %v368_v8 }
 0x1d0   : > { %705 = vmatmul.mubr.f32.vlgmr.msra.gmra.mrb[0].mxu1 %v379_v9 }
 0x2a0   : > { %v703_v10 = vpop.f32.mrb[0].mxu0 }
 0x2a1   : > { %482 = vst [vmem:[%s305_s25 + $0x8] sm:$0xff] %v703_v10  ;;  %v462_v11 = vpop.f32.mrb[1].mxu0 }
 0x2a2   : > { %481 = vst [vmem:[%s305_s25] sm:$0xff] %v462_v11 }
 0x2a3   : > { %v706_v12 = vpop.f32.mrb[0].mxu1 }
 0x2a4   : > { %484 = vst [vmem:[%s305_s25 + $0x18] sm:$0xff] %v706_v12  ;;  %v472_v13 = vpop.f32.mrb[1].mxu1 }
 0x2a5   : > { %483 = vst [vmem:[%s305_s25 + $0x10] sm:$0xff] %v472_v13 }
 0x2a6   : > { %989 = shalt.err (!%p986_p9)
}
 0x2a7   : > { %s990_s22 = scalar_lea.hbm %s1377_s30, 512  ;;  %s994_s27 = scalar_lea.hbm %s1429_s4, 1536 }
 0x2a8   : > { %p991_p6 = scmp.ne.s32.totalorder %s1377_s30, %s990_s22  ;;  %p995_p11 = scmp.lt.u32.totalorder %s1377_s30, %s1429_s4 }
 0x2a9   : > { %p996_p13 = scmp.lt.u32.totalorder %s994_s27, %s990_s22  ;;  %p998_p5 = scmp.lt.u32.totalorder %s990_s22, %s1377_s30 }
 0x2aa   : > { %p992_p4 = pnand %p991_p6, %p1459_p3 }
 0x2ab   : > { %p997_p0 = por %p996_p13, %p995_p11 }
 0x2ac   : > { %p993_p10 = pneg %p992_p4 }
 0x2ad   : > { %p999_p2 = por %p998_p5, %p997_p0 }
 0x2af   : > { %p1000_p8 = pnand %p999_p2, %p993_p10 }
 0x2b1   : > { %1003 = shalt.err (!%p1000_p8)
}
 0x2b2   : > { %s1080_s12 = smov 128   ;;  %s1081_s21 = smov 384  }
 0x2b3   : > { %s1082_s25 = smov 8  }
 0x2b4   : > { %769 = dma.vmem_to_hbm [thread:$0]  (%p1459_p3), %s1372_s28, 512, %s1377_s30, %s486_s2, %s1080_s12, %s1081_s21, %s1082_s25  }
 0x2b5 PF: > { %s1460_s9 = sld [smem:[#allocation16_spill]]  ;;  %s1461_s10 = sld [smem:[#allocation17_spill]] }
 0x2b6   : > { %p796_p12 = scmp.ge.s32.totalorder %s1070_s20, 2 }
 0x2bb   : > { %s516_s7 = sand.u32 1, %s1460_s9   ;;  %p1462_p1 = scmp.ne.s32.totalorder %s1461_s10, 0 }
 0x2bc   : > { %s517_s18 = scalar_lea.sflag [#allocation4], %s516_s7 }
 0x2bd   : > { %p786_p7 = pnand %p796_p12, %p1462_p1 }
 0x2bf   : > { %1045 = dma.done.wait (!%p786_p7), %s517_s18, 512  }
 0x2c0   : > { %1047 = vsyncadd (!%p786_p7), %s517_s18, 4294966784  ;;  %s22_s20 = sadd.s32 1, %s1070_s20   ;;  %s1463_s15 = smov %s1054_s16 }
 0x2c1   : > { %p19_p9 = scmp.ge.s32.totalorder %s22_s20, 5   ;;  %s1464_s16 = smov %s1058_s17 }
 0x2c2   : > { %s1465_s17 = smov %s1275_s11  ;;  %s1466_s18 = smov %s1066_s19 }
 0x2c3   : > { %s1467_s19 = smov %s1469_s24  ;;  %21 = sbr.rel (!%p19_p9) target bundleno = 10 (0xa), region = 97 }
 0x2ca   :  { %522 = vsyncpa [#allocation3], 1 }
 0x2cb   :  { %524 = vsyncpa [#allocation3 + $0x1], 1 }
 0x2cc   :  { %525 = vsyncpa [#allocation6], 1 }
 0x2cd   :  { %527 = vsyncpa [#allocation6 + $0x1], 1 }
 0x2ce   :  { %528 = vsyncpa [#allocation9], 1 }
 0x2cf   :  { %529 = vsyncpa [#allocation4], 1 }
 0x2d0   :  { %531 = vsyncpa [#allocation4 + $0x1], 1 }

// kernel: _forward.12
= control target key start
LH: loop header
LB: loop body
LE: loop exit
PB: predicated region body
PF: predicated region fallthrough
CT: control target
= control target key end

     0   :  { %s1757_s0 = inlined_call_operand.hbm [shape: f32[2,16,384], index: 0, kind: input, shape index: {}, may-alias: {0,1,2}]   ;;  %s1758_s1 = inlined_call_operand.hbm [shape: f32[2,16,384], index: 1, kind: input, shape index: {}, may-alias: {0,1,2}]   ;;  %s1759_s2 = inlined_call_operand.hbm [shape: f32[2,16,384], index: 2, kind: input, shape index: {}, may-alias: {0,1,2}]   ;;  %s1760_s3 = inlined_call_operand.hbm [shape: f32[2,1,1,16], index: 3, kind: input, shape index: {}]   ;;  %s1761_s4 = inlined_call_operand.hbm [shape: f32[2,16,128], index: 4, kind: output, shape index: {}]  }
   0x1   :  { %1776 = sst [smem:[#allocation20_spill]] %s1757_s0 }
   0x2   :  { %1777 = sst [smem:[#allocation21_spill]] %s1758_s1 }
   0x3   :  { %9 = vsyncpa [#allocation3], 0 }
   0x4   :  { %11 = vsyncpa [#allocation3 + $0x1], 0 }
   0x5   :  { %12 = vsyncpa [#allocation6], 0 }
   0x6   :  { %14 = vsyncpa [#allocation6 + $0x1], 0 }
   0x7   :  { %15 = vsyncpa [#allocation9], 0 }
   0x8   :  { %17 = vsyncpa [#allocation9 + $0x1], 0 }
   0x9   :  { %18 = vsyncpa [#allocation4], 0 }
   0xa   :  { %20 = vsyncpa [#allocation4 + $0x1], 0  ;;  %s1400_s15 = smov 0   ;;  %s1402_s16 = smov 0  }
   0xb   :  { %s1404_s17 = smov 0   ;;  %s1406_s18 = smov 0  }
   0xc   :  { %s1408_s19 = smov 0   ;;  %s1410_s20 = smov 0  }
   0xd LB: > { %1778 = sst [smem:[#allocation15_spill]] %s1350_s17  ;;  %s1431_s21 = sadd.s32 4294967295, %s1362_s20   ;;  %s1362_s20 = sphi %s1410_s20, %s26_s20   ;;  %s1358_s19 = sphi %s1408_s19, %s1811_s19   ;;  %s1354_s18 = sphi %s1406_s18, %s1810_s18   ;;  %s1350_s17 = sphi %s1404_s17, %s1806_s17   ;;  %s1346_s16 = sphi %s1402_s16, %s1809_s16   ;;  %s1342_s15 = sphi %s1400_s15, %s1808_s15  }
   0xe   : > { %1779 = sst [smem:[#allocation16_spill]] %s1362_s20  ;;  %s942_s22 = sadd.s32 4294967294, %s1362_s20  }
   0xf   : > { %s38_s23 = sadd.s32 1, %s1358_s19  ;;  %s47_s24 = sadd.s32 1, %s1350_s17 }
  0x10   : > { %p40_p0 = scmp.ge.s32.totalorder %s38_s23, 2  ;;  %p54_p1 = scmp.ne.s32.totalorder %s1350_s17, %s1346_s16 }
  0x11   : > { %p55_p2 = scmp.eq.s32.totalorder %s1362_s20, 0  ;;  %p60_p3 = scmp.ne.s32.totalorder %s1346_s16, %s1342_s15 }
  0x12   : > { %s1813_s23 = smov (%p40_p0, %s38_s23), 0  ;;  %p61_p5 = scmp.eq.s32.totalorder %s1431_s21, 0 }
  0x13   : > { %1780 = sst [smem:[#allocation17_spill]] %s1813_s23  ;;  %p1443_p4 = por %p55_p2, %p54_p1 }
  0x14   : > { %s42_s26 = ssub.s32 %s1358_s19, %s1813_s23  ;;  %p164_p6 = scmp.eq.s32.totalorder %s1431_s21, 1 }
  0x15   : > { %p45_p7 = scmp.eq.s32.totalorder %s42_s26, 0  ;;  %p1451_p8 = por %p61_p5, %p60_p3 }
  0x16   : > { %p1455_p9 = por %p164_p6, %p54_p1  ;;  %p170_p10 = scmp.eq.s32.totalorder %s942_s22, 1 }
  0x17   : > { %s1782_s27 = scalar_select %p1451_p8, 1, 0 }
  0x18   : > { %s1783_s28 = scalar_select %p1455_p9, 1, 0 }
  0x19   : > { %s1460_s29 = scalar_select %p45_p7, %s1350_s17, %s47_s24  }
  0x1a   : > { %p1462_p11 = por %p170_p10, %p60_p3  ;;  %p1068_p13 = scmp.lt.s32.totalorder %s1362_s20, 2 }
  0x1b   : > { %1784 = sst [smem:[#allocation18_spill]] %s1460_s29  ;;  %s1469_s5 = sand.u32 1, %s1350_s17  }
  0x1c   : > { %s1785_s30 = scalar_select %p1462_p11, 1, 0 }
  0x1d   : > { %s1472_s6 = sshll.u32 %s1469_s5, 4  ;;  %s1475_s7 = smul.u32 768, %s1358_s19 }
  0x1e   : > { %1786 = sst [smem:[#allocation19_spill]] %s1785_s30  ;;  %p1479_p0 = pnand %p1068_p13, %p1443_p4 }
  0x1f   : > { %s214_s9 = sand.u32 1, %s1362_s20   ;;  %s1788_s1 = sld [smem:[#allocation21_spill]] }
  0x20   : > { %s1787_s8 = scalar_select %p1479_p0, 1, 0 }
  0x21   : > { %s218_s13 = scalar_lea.vmem [#allocation5], %s1472_s6  ;;  %s1493_s24 = scalar_lea.sflag [#allocation6], %s214_s9 }
  0x22   : > { %s226_s14 = sshll.u32 %s218_s13, 4  ;;  %p1498_p2 = pneg %p1479_p0  ;;  %s1491_s14 = int_to_ptr.vmem [resolvable:$true] %s226_s14 }
  0x25   : > { %s833_s12 = scalar_lea.hbm %s1788_s1, %s1475_s7  ;;  %s1155_s13 = scalar_lea.hbm %s1788_s1, 1536 }
  0x26   : > { %s1489_s22 = scalar_lea.hbm %s833_s12, 128  ;;  %s1180_s25 = scalar_lea.hbm %s833_s12, 384 }
  0x27   : > { %p1151_p1 = scmp.ne.s32.totalorder %s1489_s22, %s1180_s25  ;;  %p1156_p5 = scmp.lt.u32.totalorder %s1489_s22, %s1788_s1 }
  0x28   : > { %p1157_p6 = scmp.lt.u32.totalorder %s1155_s13, %s1180_s25  ;;  %p1159_p10 = scmp.lt.u32.totalorder %s1180_s25, %s1489_s22 }
  0x29   : > { %p1153_p3 = pnand %p1498_p2, %p1151_p1 }
  0x2a   : > { %p1158_p7 = por %p1157_p6, %p1156_p5 }
  0x2b   : > { %p1154_p4 = pneg %p1153_p3 }
  0x2c   : > { %p1160_p13 = por %p1159_p10, %p1158_p7 }
  0x2e   : > { %p1161_p12 = pnand %p1160_p13, %p1154_p4 }
  0x30   : > { %1164 = shalt.err (!%p1161_p12)
}
  0x31   : > { %s1165_s9 = scalar_lea.vmem %s1491_s14, 256  ;;  %s1364_s12 = smov [#allocation5]  }
  0x32   : > { %p1166_p1 = scmp.ne.s32.totalorder %s1491_s14, %s1165_s9  ;;  %s1170_s10 = sshll.u32 %s1364_s12, 4  ;;  %s1171_s10 = int_to_ptr.vmem [resolvable:$false] %s1170_s10 }
  0x33   : > { %s1172_s23 = scalar_lea.vmem %s1171_s10, 512  ;;  %p1173_p9 = scmp.lt.s32.totalorder %s1491_s14, %s1171_s10 }
  0x34   : > { %p1168_p3 = pnand %p1166_p1, %p1498_p2  ;;  %p1174_p8 = scmp.lt.s32.totalorder %s1172_s23, %s1165_s9 }
  0x36   : > { %p1169_p11 = pneg %p1168_p3  ;;  %p1175_p5 = por %p1174_p8, %p1173_p9 }
  0x38   : > { %p1176_p6 = pnand %p1175_p5, %p1169_p11 }
  0x3a   : > { %1179 = shalt.err (!%p1176_p6)
}
  0x3b   : > { %s1765_s29 = smov 384   ;;  %s1767_s25 = smov 128  }
  0x3c   : > { %s1769_s11 = smov 8   ;;  %p952_p8 = scmp.ge.s32.totalorder %s1362_s20, 1 }
  0x3d   : > { %1057 = dma.hbm_to_vmem [thread:$0]  (!%p1479_p0), %s1489_s22, 256, %s1491_s14, %s1493_s24, %s1765_s29, %s1767_s25, %s1769_s11  }
  0x3e   : > { %p273_p9 = scmp.lt.s32.totalorder %s1362_s20, 3  ;;  %s1791_s0 = sld [smem:[#allocation20_spill]] }
  0x3f   : > { %s194_s23 = scalar_lea.vmem [#allocation2], %s1472_s6  ;;  %s1544_s29 = scalar_lea.hbm %s1759_s2, %s1475_s7 }
  0x40   : > { %p1527_p11 = pnand %p952_p8, %p273_p9  ;;  %s204_s1 = sshll.u32 %s194_s23, 4  ;;  %s1538_s1 = int_to_ptr.vmem [resolvable:$true] %s204_s1 }
  0x41   : > { %s191_s25 = scalar_lea.sflag [#allocation3], %s1469_s5 }
  0x42   : > { %s1790_s13 = scalar_select %p1527_p11, 1, 0 }
  0x44   : > { %s1535_s10 = scalar_lea.hbm %s1791_s0, %s1475_s7  ;;  %s1186_s17 = scalar_lea.hbm %s1791_s0, 1536 }
  0x45   : > { %s1181_s11 = scalar_lea.hbm %s1535_s10, 256  ;;  %p1187_p10 = scmp.lt.u32.totalorder %s1535_s10, %s1791_s0 }
  0x46   : > { %p1182_p12 = scmp.ne.s32.totalorder %s1535_s10, %s1181_s11  ;;  %p1188_p13 = scmp.lt.u32.totalorder %s1186_s17, %s1181_s11 }
  0x47   : > { %p1190_p3 = scmp.lt.u32.totalorder %s1181_s11, %s1535_s10 }
  0x48   : > { %p1184_p4 = pnand %p1182_p12, %p1498_p2  ;;  %p1189_p1 = por %p1188_p13, %p1187_p10 }
  0x4a   : > { %p1185_p7 = pneg %p1184_p4  ;;  %p1191_p5 = por %p1190_p3, %p1189_p1 }
  0x4c   : > { %p1192_p6 = pnand %p1191_p5, %p1185_p7 }
  0x4e   : > { %1195 = shalt.err (!%p1192_p6)
}
  0x4f   : > { %s1196_s7 = scalar_lea.vmem %s1538_s1, 256  ;;  %s1368_s23 = smov [#allocation2]  }
  0x50   : > { %p1197_p8 = scmp.ne.s32.totalorder %s1538_s1, %s1196_s7  ;;  %s1201_s14 = sshll.u32 %s1368_s23, 4  ;;  %s1202_s14 = int_to_ptr.vmem [resolvable:$false] %s1201_s14 }
  0x51   : > { %s1203_s20 = scalar_lea.vmem %s1202_s14, 512  ;;  %p1204_p4 = scmp.lt.s32.totalorder %s1538_s1, %s1202_s14 }
  0x52   : > { %p1199_p9 = pnand %p1197_p8, %p1498_p2  ;;  %p1205_p11 = scmp.lt.s32.totalorder %s1203_s20, %s1196_s7 }
  0x54   : > { %p1200_p12 = pneg %p1199_p9  ;;  %p1206_p10 = por %p1205_p11, %p1204_p4 }
  0x56   : > { %p1207_p13 = pnand %p1206_p10, %p1200_p12 }
  0x58   : > { %1210 = shalt.err (!%p1207_p13)
}
  0x59   : > { %s1792_s17 = smov 8   ;;  %s1793_s30 = smov 128  }
  0x5a   : > { %s1794_s11 = smov 384   ;;  %s1574_s22 = scalar_lea.hbm %s1544_s29, 256 }
  0x5b   : > { %1054 = dma.hbm_to_vmem [thread:$0]  (!%p1479_p0), %s1535_s10, 256, %s1538_s1, %s191_s25, %s1794_s11, %s1793_s30, %s1792_s17  }
  0x5c   : > { %s240_s9 = scalar_lea.vmem [#allocation7], %s1472_s6  ;;  %s1241_s7 = scalar_lea.hbm %s1544_s29, 512 }
  0x5d   : > { %s248_s12 = sshll.u32 %s240_s9, 4  ;;  %p1212_p11 = scmp.ne.s32.totalorder %s1574_s22, %s1241_s7  ;;  %s1577_s12 = int_to_ptr.vmem [resolvable:$true] %s248_s12 }
  0x5e   : > { %s1216_s20 = scalar_lea.hbm %s1759_s2, 1536  ;;  %p1217_p3 = scmp.lt.u32.totalorder %s1574_s22, %s1759_s2 }
  0x5f   : > { %p1214_p7 = pnand %p1212_p11, %p1498_p2  ;;  %p1218_p5 = scmp.lt.u32.totalorder %s1216_s20, %s1241_s7 }
  0x60   : > { %p1220_p8 = scmp.lt.u32.totalorder %s1241_s7, %s1574_s22 }
  0x61   : > { %p1215_p1 = pneg %p1214_p7  ;;  %p1219_p6 = por %p1218_p5, %p1217_p3 }
  0x63   : > { %p1221_p9 = por %p1220_p8, %p1219_p6 }
  0x65   : > { %p1222_p12 = pnand %p1221_p9, %p1215_p1 }
  0x67   : > { %1225 = shalt.err (!%p1222_p12)
}
  0x68   : > { %s1226_s6 = scalar_lea.vmem %s1577_s12, 256  ;;  %s1369_s29 = smov [#allocation7]  }
  0x69   : > { %p1227_p4 = scmp.ne.s32.totalorder %s1577_s12, %s1226_s6  ;;  %s1231_s25 = sshll.u32 %s1369_s29, 4  ;;  %s1232_s25 = int_to_ptr.vmem [resolvable:$false] %s1231_s25 }
  0x6a   : > { %s1233_s0 = scalar_lea.vmem %s1232_s25, 512  ;;  %p1234_p11 = scmp.lt.s32.totalorder %s1577_s12, %s1232_s25 }
  0x6b   : > { %p1229_p10 = pnand %p1227_p4, %p1498_p2  ;;  %p1235_p7 = scmp.lt.s32.totalorder %s1233_s0, %s1226_s6 }
  0x6d   : > { %p1230_p13 = pneg %p1229_p10  ;;  %p1236_p3 = por %p1235_p7, %p1234_p11 }
  0x6f   : > { %p1237_p5 = pnand %p1236_p3, %p1230_p13 }
  0x71   : > { %1240 = shalt.err (!%p1237_p5)
}
  0x72   : > { %1060 = dma.hbm_to_vmem [thread:$0]  (!%p1479_p0), %s1574_s22, 256, %s1577_s12, %s1493_s24, %s1794_s11, %s1793_s30, %s1792_s17  }
  0x73   : > { %s951_s10 = sshll.u32 %s1358_s19, 4  ;;  %s261_s14 = scalar_lea.vmem [#allocation8], %s1469_s5 }
  0x74   : > { %s1608_s23 = scalar_lea.hbm %s1760_s3, %s951_s10  ;;  %s268_s20 = sshll.u32 %s261_s14, 4  ;;  %s269_s20 = int_to_ptr.vmem [resolvable:$true] %s268_s20 }
  0x75   : > { %s259_s1 = scalar_lea.sflag [#allocation9], %s1469_s5  ;;  %s1242_s6 = scalar_lea.hbm %s1608_s23, 16 }
  0x76   : > { %p1243_p1 = scmp.ne.s32.totalorder %s1608_s23, %s1242_s6  ;;  %s1247_s30 = scalar_lea.hbm %s1760_s3, 32 }
  0x77   : > { %p1248_p9 = scmp.lt.u32.totalorder %s1608_s23, %s1760_s3  ;;  %p1249_p12 = scmp.lt.u32.totalorder %s1247_s30, %s1242_s6 }
  0x78   : > { %p1245_p6 = pnand %p1243_p1, %p1498_p2  ;;  %p1251_p10 = scmp.lt.u32.totalorder %s1242_s6, %s1608_s23 }
  0x79   : > { %p1250_p4 = por %p1249_p12, %p1248_p9 }
  0x7a   : > { %p1246_p8 = pneg %p1245_p6 }
  0x7b   : > { %p1252_p13 = por %p1251_p10, %p1250_p4 }
  0x7d   : > { %p1253_p11 = pnand %p1252_p13, %p1246_p8 }
  0x7f   : > { %1256 = shalt.err (!%p1253_p11)
}
  0x80   : > { %s1257_s5 = scalar_lea.vmem %s269_s20, 16  ;;  %s1370_s12 = smov [#allocation8]  }
  0x81   : > { %p1258_p7 = scmp.ne.s32.totalorder %s269_s20, %s1257_s5  ;;  %s1262_s29 = sshll.u32 %s1370_s12, 4  ;;  %s1263_s29 = int_to_ptr.vmem [resolvable:$false] %s1262_s29 }
  0x82   : > { %s1264_s25 = scalar_lea.vmem %s1263_s29, 32  ;;  %p1265_p1 = scmp.lt.s32.totalorder %s269_s20, %s1263_s29 }
  0x83   : > { %p1260_p3 = pnand %p1258_p7, %p1498_p2  ;;  %p1266_p6 = scmp.lt.s32.totalorder %s1264_s25, %s1257_s5 }
  0x85   : > { %p1261_p5 = pneg %p1260_p3  ;;  %p1267_p0 = por %p1266_p6, %p1265_p1 }
  0x87   : > { %p1268_p9 = pnand %p1267_p0, %p1261_p5 }
  0x89   : > { %1271 = shalt.err (!%p1268_p9)
}
  0x8a   : > { %p1795_p12 = scmp.ne.s32.totalorder %s1787_s8, 0  ;;  %p1796_p8 = scmp.ne.s32.totalorder %s1790_s13, 0 }
  0x8b   : > { %s1632_s26 = sand.u32 (!%p1796_p8), 1, %s1346_s16   ;;  %p1797_p0 = scmp.ne.s32.totalorder (!%p1796_p8), %s1782_s27, 0 }
  0x8c   : > { %1063 = dma.hbm_to_vmem [thread:$0]  (!%p1795_p12), %s1608_s23, 16, %s269_s20, %s259_s1  }
  0x8d   : > { %277 = sbr.rel (%p1796_p8) target bundleno = 1275 (0x4fb), region = 36  ;;  %s1635_s0 = sshll.u32 (!%p1796_p8), %s1632_s26, 4 }
  0x8e   : > { %s280_s10 = scalar_lea.sflag (!%p1796_p8), [#allocation3], %s1632_s26  ;;  %s283_s9 = scalar_lea.vmem (!%p1796_p8), [#allocation2], %s1635_s0 }
  0x94   : > { %1325 = dma.done.wait (%p1797_p0), %s280_s10, 256  }
  0x95   : > { %1327 = vsyncadd (%p1797_p0), %s280_s10, 4294967040  ;;  %s288_s8 = sand.u32 1, %s1431_s21   ;;  %s292_s7 = scalar_lea.vmem [#allocation5], %s1635_s0 }
  0x96   : > { %s289_s13 = scalar_lea.sflag [#allocation6], %s288_s8 }
  0x97   : > { %1329 = dma.done.wait (%p1797_p0), %s289_s13, 512  }
  0x98   : > { %1331 = vsyncadd (%p1797_p0), %s289_s13, 4294966784  ;;  %s301_s23 = scalar_lea.vmem [#allocation7], %s1635_s0  ;;  %s307_s14 = scalar_lea.sflag [#allocation9], %s1632_s26 }
  0x99   : > { %s309_s20 = scalar_lea.vmem [#allocation8], %s1632_s26 }
  0x9a   : > { %1333 = dma.done.wait (%p1797_p0), %s307_s14, 16  }
  0x9b   : > { %1335 = vsyncadd (%p1797_p0), %s307_s14, 4294967280  ;;  %vm365_vm0 = vcmask 523264   ;;  %v355_v1 = vld [vmem:[%s292_s7] sm:$0xff]  ;;  %v356_v2 = vld [vmem:[%s292_s7 + $0x8] sm:$0xff]  ;;  %s1371_s21 = smov 64   ;;  %vm453_vm2 = vcmask 130048  }
  0x9c   : > { %vm1658_vm1 = vmpackc.low %vm365_vm0, %vm365_vm0  ;;  %v351_v3 = vld [vmem:[%s283_s9] sm:$0xff]  ;;  %v1020_v4 = vpack.c.bf16 %v356_v2, %v355_v1  ;;  %v352_v6 = vld [vmem:[%s283_s9 + $0x8] sm:$0xff]  ;;  %v1124_v8 = vpack.i.bf16 %v356_v2, %v355_v1  ;;  %s347_s27 = scalar_lea.vmem [#allocation10], %s1635_s0  ;;  %s975_s6 = sshll.u32 %s1354_s18, 8 }
  0x9d   : > { %v353_v5 = vmul.f32 0.088388346, %v351_v3  ;;  %v354_v7 = vmul.f32 0.088388346, %v352_v6  ;;  %v957_v9 = vld [vmem:[%s309_s20] ss:$0 sm:$0xff]  ;;  %s1707_s30 = scalar_lea.hbm %s1761_s4, %s975_s6 }
  0x9e   : > { %1022 = vmatprep.subr.msk.bf16.mxu0 %vm1658_vm1, %v1020_v4  ;;  %1125 = vrot.lane.b32.xlu1 %v1124_v8, %s1371_s21  ;;  %v357_v16 = vld [vmem:[%s301_s23] sm:$0xff]  ;;  %v358_v17 = vld [vmem:[%s301_s23 + $0x8] sm:$0xff]  ;;  %s787_s1 = sshll.u32 %s347_s27, 4  ;;  %s772_s18 = scalar_lea.sflag [#allocation4], %s1632_s26  ;;  %s1701_s1 = int_to_ptr.vmem [resolvable:$true] %s787_s1 }
  0x9f   : > { %996 = vmatprep.mubr.msk.f32.mxu0 %vm365_vm0, %v353_v5  ;;  %1025 = vmatpush3.bf16.xpose.msk.msra.mxu0 %vm1658_vm1, %v1020_v4  ;;  %v1026_v18 = vpack.c.bf16 %v358_v17, %v357_v16  ;;  %v1129_v19 = vpack.i.bf16 %v358_v17, %v357_v16  ;;  %s1272_s11 = scalar_lea.vmem %s1701_s1, 256  ;;  %p1800_p4 = scmp.ne.s32.totalorder %s1783_s28, 0 }
  0xa0   : > { %p1273_p2 = scmp.ne.s32.totalorder %s1701_s1, %s1272_s11  ;;  %s1372_s22 = smov [#allocation10]  }
  0xa1   : > { %1027 = vmatprep.subr.bf16.mxu1 %v1026_v18  ;;  %s1276_s5 = sshll.u32 %s1372_s22, 4  ;;  %s1277_s5 = int_to_ptr.vmem [resolvable:$false] %s1276_s5 }
  0xa2   : > { %557 = vrot.lane.b32.xlu1 %v353_v5, %s1371_s21  ;;  %1029 = vmatpush3.bf16.msra.mxu1 %v1026_v18  ;;  %p1274_p10 = pnand %p1273_p2, %p1800_p4  ;;  %s1278_s12 = scalar_lea.vmem %s1277_s5, 512 }
  0xa3   : > { %p1279_p11 = scmp.lt.s32.totalorder %s1701_s1, %s1277_s5  ;;  %p1280_p7 = scmp.lt.s32.totalorder %s1278_s12, %s1272_s11 }
  0xa4   : > { %p1275_p13 = pneg %p1274_p10 }
  0xa5   : > { %p1281_p3 = por %p1280_p7, %p1279_p11 }
  0xa6   : > { %997 = vmatmul.mubr.msk.f32.vlgmr.msra.gmra.mrb[0].mxu0 %vm365_vm0, %v354_v7 }
  0xa7   : > { %p1282_p5 = pnand %p1281_p3, %p1275_p13 }
 0x110   : > { %v1126_v20 = vpop.permute.xlu1 %1125 }
 0x111   : > { %v1128_v21 = vunpack.i.h.bf16 %v1126_v20  ;;  %v1127_v22 = vunpack.i.l.bf16 %v1126_v20 }
 0x113   : > { %v1030_v23 = vpack.c.bf16 %v1128_v21, %v1127_v22 }
 0x114   : > { %v558_v31 = vpop.permute.xlu1 %557 }
 0x115   : > { %1032 = vmatprep.subr.msk.bf16.mxu1 %vm1658_vm1, %v1030_v23 }
 0x179   : > { %v998_v10 = vpop.f32.mrb[0].mxu0 }
 0x17a   : > { %v444_v11 = vpop.f32.mrb[1].mxu0  ;;  %v450_v13 = vadd.f32 %v998_v10, %v957_v9 }
 0x17b   : > { %v445_v12 = vadd.f32 %v957_v9, %v444_v11 }
 0x17c   : > { %v457_v15 = vsel %vm453_vm2, %v450_v13, -inf }
 0x17d   : > { %v454_v14 = vsel %vm453_vm2, %v445_v12, -inf }
 0x17e   : > { %455 = vmax.xlane.f32.xlu0 %v454_v14 }
 0x182   : > { %458 = vmax.xlane.f32.xlu0 %v457_v15 }
 0x198   : > { %559 = vrot.lane.b32.xlu0 %v354_v7, %s1371_s21 }
 0x20b   : > { %v456_v24 = vpop.xlane.xlu0 %455 }
 0x20c   : > { %v460_v25 = vsub.f32 %v445_v12, %v456_v24 }
 0x20e   : > { %v462_v26 = vmul.f32 1.442695, %v460_v25 }
 0x20f   : > { %v459_v27 = vpop.xlane.xlu0 %458 }
 0x210   : > { %1134 = vpow2.f32 %v462_v26  ;;  %v461_v28 = vsub.f32 %v450_v13, %v459_v27 }
 0x212   : > { %v464_v29 = vmul.f32 1.442695, %v461_v28 }
 0x213   : > { %v560_v33 = vpop.permute.xlu0 %559 }
 0x214   : > { %1136 = vpow2.f32 %v464_v29 }
 0x21a   : > { %v1135_v30 = vpop.eup %1134 }
 0x21b   : > { %1003 = vmatprep.mubr.msk.f32.mxu1 %vm453_vm2, %v1135_v30  ;;  %v466_v56 = vsel %vm453_vm2, %v1135_v30, 0.0 }
 0x21e   : > { %v1137_v32 = vpop.eup %1136 }
 0x21f   : > { %1004 = vmatmul.mubr.msk.f32.vlgmr.msra.gmra.mrb[0].mxu1 %vm453_vm2, %v1137_v32  ;;  %v469_v57 = vsel %vm453_vm2, %v1137_v32, 0.0 }
 0x220   : > { %1035 = vmatpush3.bf16.xpose.msk.msra.mxu1 %vm1658_vm1, %v1030_v23  ;;  %1010 = vmatprep.mubr.msk.f32.mxu1 %vm365_vm0, %v558_v31 }
 0x227   : > { %1011 = vmatmul.mubr.msk.f32.vlgmr.msra.gmra.mrb[2].mxu1 %vm365_vm0, %v560_v33 }
 0x2f2   : > { %v1685_v34 = vpop.f32.mrb[0].mxu1 }
 0x2f3   : > { %v544_v35 = vpop.f32.mrb[1].mxu1 }
 0x2fa   : > { %v1012_v36 = vpop.f32.mrb[2].mxu1 }
 0x2fb   : > { %v645_v37 = vadd.f32 %v1012_v36, %v957_v9  ;;  %v639_v38 = vpop.f32.mrb[3].mxu1 }
 0x2fc   : > { %v640_v39 = vadd.f32 %v957_v9, %v639_v38 }
 0x2fd   : > { %v651_v40 = vsel %vm453_vm2, %v645_v37, -inf }
 0x2fe   : > { %652 = vmax.xlane.f32.xlu0 %v651_v40  ;;  %v648_v41 = vsel %vm453_vm2, %v640_v39, -inf }
 0x2ff   : > { %649 = vmax.xlane.f32.xlu1 %v648_v41 }
 0x310   : > { %1130 = vrot.lane.b32.xlu1 %v1129_v19, %s1371_s21 }
 0x38b   : > { %v653_v42 = vpop.xlane.xlu0 %652 }
 0x38c   : > { %v655_v43 = vsub.f32 %v645_v37, %v653_v42  ;;  %v650_v44 = vpop.xlane.xlu1 %649 }
 0x38d   : > { %v654_v45 = vsub.f32 %v640_v39, %v650_v44 }
 0x38e   : > { %v658_v46 = vmul.f32 1.442695, %v655_v43 }
 0x38f   : > { %v656_v47 = vmul.f32 1.442695, %v654_v45 }
 0x390   : > { %1138 = vpow2.f32 %v658_v46  ;;  %v1131_v48 = vpop.permute.xlu1 %1130 }
 0x391   : > { %1140 = vpow2.f32 %v656_v47  ;;  %v1133_v49 = vunpack.i.h.bf16 %v1131_v48  ;;  %v1132_v50 = vunpack.i.l.bf16 %v1131_v48 }
 0x393   : > { %v1036_v51 = vpack.c.bf16 %v1133_v49, %v1132_v50 }
 0x395   : > { %1037 = vmatprep.subr.bf16.mxu0 %v1036_v51 }
 0x396   : > { %1039 = vmatpush3.bf16.msra.mxu0 %v1036_v51 }
 0x39a   : > { %v1139_v52 = vpop.eup %1138 }
 0x39b   : > { %v1141_v53 = vpop.eup %1140  ;;  %v663_v54 = vsel %vm453_vm2, %v1139_v52, 0.0 }
 0x39c   : > { %664 = vadd.xlane.f32.xlu1 %v663_v54  ;;  %1017 = vmatprep.mubr.msk.f32.mxu0 %vm453_vm2, %v1141_v53  ;;  %v660_v55 = vsel %vm453_vm2, %v1141_v53, 0.0 }
 0x39d   : > { %661 = vadd.xlane.f32.xlu0 %v660_v55  ;;  %1018 = vmatmul.mubr.msk.f32.vlgmr.msra.gmra.mrb[2].mxu0 %vm453_vm2, %v1139_v52 }
 0x3a1   : > { %467 = vadd.xlane.f32.xlu0 %v466_v56 }
 0x3a5   : > { %470 = vadd.xlane.f32.xlu0 %v469_v57 }
 0x429   : > { %v665_v59 = vpop.xlane.xlu1 %664 }
 0x42a   : > { %v662_v58 = vpop.xlane.xlu0 %661 }
 0x42b   : > { %1142 = vrcp.f32 %v662_v58 }
 0x42c   : > { %1144 = vrcp.f32 %v665_v59 }
 0x42e   : > { %v468_v2 = vpop.xlane.xlu0 %467 }
 0x42f   : > { %1146 = vrcp.f32 %v468_v2 }
 0x432   : > { %v471_v3 = vpop.xlane.xlu0 %470 }
 0x433   : > { %1148 = vrcp.f32 %v471_v3 }
 0x435   : > { %v1143_v61 = vpop.eup %1142 }
 0x436   : > { %v1145_v0 = vpop.eup %1144 }
 0x439   : > { %v1147_v4 = vpop.eup %1146 }
 0x43a   : > { %v555_v5 = vmul.f32 %v1147_v4, %v544_v35 }
 0x43d   : > { %v1149_v6 = vpop.eup %1148 }
 0x43e   : > { %v556_v9 = vmul.f32 %v1149_v6, %v1685_v34 }
 0x470   : > { %v1019_v60 = vpop.f32.mrb[2].mxu0 }
 0x471   : > { %v746_v62 = vpop.f32.mrb[3].mxu0  ;;  %v758_v1 = vmul.f32 %v1145_v0, %v1019_v60 }
 0x472   : > { %v757_v63 = vmul.f32 %v1143_v61, %v746_v62 }
 0x474   : > { %761 = vrot.lane.b32.xlu0 %v757_v63, %s1371_s21 }
 0x478   : > { %763 = vrot.lane.b32.xlu0 %v758_v1, %s1371_s21 }
 0x4e6   : > { %v762_v7 = vpop.permute.xlu0 %761 }
 0x4e7   : > { %v767_v8 = vsel %vm365_vm0, %v555_v5, %v762_v7 }
 0x4e8   : > { %769 = vst [vmem:[%s347_s27] sm:$0xff] %v767_v8 }
 0x4ea   : > { %v764_v10 = vpop.permute.xlu0 %763 }
 0x4eb   : > { %v768_v11 = vsel %vm365_vm0, %v556_v9, %v764_v10 }
 0x4ec   : > { %770 = vst [vmem:[%s347_s27 + $0x8] sm:$0xff] %v768_v11 }
 0x4ed   : > { %1285 = shalt.err (!%p1282_p5)
}
 0x4ee   : > { %s1286_s29 = scalar_lea.hbm %s1707_s30, 256  ;;  %s1290_s10 = scalar_lea.hbm %s1761_s4, 512 }
 0x4ef   : > { %p1287_p1 = scmp.ne.s32.totalorder %s1707_s30, %s1286_s29  ;;  %p1291_p12 = scmp.lt.u32.totalorder %s1707_s30, %s1761_s4 }
 0x4f0   : > { %p1292_p8 = scmp.lt.u32.totalorder %s1290_s10, %s1286_s29  ;;  %p1294_p2 = scmp.lt.u32.totalorder %s1286_s29, %s1707_s30 }
 0x4f1   : > { %p1288_p6 = pnand %p1287_p1, %p1800_p4 }
 0x4f2   : > { %p1293_p0 = por %p1292_p8, %p1291_p12 }
 0x4f3   : > { %p1289_p9 = pneg %p1288_p6 }
 0x4f4   : > { %p1295_p10 = por %p1294_p2, %p1293_p0 }
 0x4f6   : > { %p1296_p13 = pnand %p1295_p10, %p1289_p9 }
 0x4f8   : > { %1299 = shalt.err (!%p1296_p13)
}
 0x4f9   : > { %s1373_s13 = smov 128   ;;  %s1374_s7 = smov 8  }
 0x4fa   : > { %1049 = dma.vmem_to_hbm [thread:$0]  (%p1800_p4), %s1701_s1, 256, %s1707_s30, %s772_s18, %s1373_s13, %s1373_s13, %s1374_s7  }
 0x4fb PF: > { %s1801_s23 = sld [smem:[#allocation19_spill]]  ;;  %s1802_s14 = sld [smem:[#allocation16_spill]] }
 0x4fc   : > { %s802_s20 = sand.u32 1, %s1342_s15  }
 0x4fd   : > { %s803_s21 = scalar_lea.sflag [#allocation4], %s802_s20 }
 0x501   : > { %p1803_p11 = scmp.ne.s32.totalorder %s1801_s23, 0  ;;  %p1804_p7 = scmp.ge.s32.totalorder %s1802_s14, 2 }
 0x503   : > { %p1065_p3 = pnand %p1804_p7, %p1803_p11 }
 0x505   : > { %1337 = dma.done.wait (!%p1065_p3), %s803_s21, 256  }
 0x506   : > { %1339 = vsyncadd (!%p1065_p3), %s803_s21, 4294967040  ;;  %s26_s20 = sadd.s32 1, %s1802_s14   ;;  %s1805_s27 = sld [smem:[#allocation15_spill]] }
 0x507   : > { %p23_p5 = scmp.ge.s32.totalorder %s26_s20, 4   ;;  %s1806_s17 = sld [smem:[#allocation18_spill]] }
 0x508   : > { %s1807_s28 = sld [smem:[#allocation17_spill]]  ;;  %s1808_s15 = smov %s1346_s16 }
 0x509   : > { %s1810_s18 = smov %s1358_s19  ;;  %25 = sbr.rel (!%p23_p5) target bundleno = 13 (0xd), region = 118 }
 0x50c   : > { %s1809_s16 = smov %s1805_s27 }
 0x50e   : > { %s1811_s19 = smov %s1807_s28 }
 0x510   :  { %808 = vsyncpa [#allocation3], 1 }
 0x511   :  { %810 = vsyncpa [#allocation3 + $0x1], 1 }
 0x512   :  { %811 = vsyncpa [#allocation6], 1 }
 0x513   :  { %813 = vsyncpa [#allocation6 + $0x1], 1 }
 0x514   :  { %814 = vsyncpa [#allocation9], 1 }
 0x515   :  { %816 = vsyncpa [#allocation9 + $0x1], 1 }
 0x516   :  { %817 = vsyncpa [#allocation4], 1 }
 0x517   :  { %819 = vsyncpa [#allocation4 + $0x1], 1 }

// kernel: _forward.14
= control target key start
LH: loop header
LB: loop body
LE: loop exit
PB: predicated region body
PF: predicated region fallthrough
CT: control target
= control target key end

     0   :  { %10 = vsyncpa [#allocation3], 0  ;;  %s670_s0 = inlined_call_operand.hbm [shape: f32[32,128], index: 0, kind: input, shape index: {}]   ;;  %s671_s1 = inlined_call_operand.hbm [shape: f32[128,256], index: 1, kind: input, shape index: {}]   ;;  %s672_s2 = inlined_call_operand.hbm [shape: f32[1,128], index: 2, kind: input, shape index: {}]   ;;  %s673_s3 = inlined_call_operand.hbm [shape: f32[1,128], index: 3, kind: input, shape index: {}]   ;;  %s674_s4 = inlined_call_operand.hbm [shape: f32[1,256], index: 4, kind: input, shape index: {}]   ;;  %s675_s5 = inlined_call_operand.hbm [shape: f32[32,256], index: 5, kind: output, shape index: {}]  }
   0x1   :  { %11 = vsyncpa [#allocation6], 0 }
   0x2   :  { %12 = vsyncpa [#allocation9], 0 }
   0x3   :  { %13 = vsyncpa [#allocation4], 0  ;;  %s531_s18 = smov [#allocation5]   ;;  %s391_s22 = scalar_lea.hbm %s671_s1, 4096 }
   0x4   :  { %s31_s19 = sshll.u32 %s531_s18, 4  ;;  %p392_p0 = scmp.ne.s32.totalorder %s671_s1, %s391_s22  ;;  %s32_s19 = int_to_ptr.vmem [resolvable:$true] %s31_s19 }
   0x5   :  { %p395_p1 = scmp.lt.u32.totalorder %s391_s22, %s671_s1 }
   0x7   :  { %p397_p2 = pnand %p395_p1, %p392_p0 }
   0x9   :  { %400 = shalt.err (!%p397_p2)
}
   0xa   :  { %s401_s27 = scalar_lea.vmem %s32_s19, 4096  ;;  %p406_p4 = scmp.lt.s32.totalorder %s32_s19, %s32_s19 }
   0xb   :  { %p402_p3 = scmp.ne.s32.totalorder %s32_s19, %s401_s27  ;;  %p407_p5 = scmp.lt.s32.totalorder %s401_s27, %s401_s27 }
   0xd   :  { %p408_p6 = por %p407_p5, %p406_p4 }
   0xf   :  { %p409_p7 = pnand %p408_p6, %p402_p3 }
  0x11   :  { %412 = shalt.err (!%p409_p7)
}
  0x12   :  { %s532_s28 = smov 256   ;;  %s533_s29 = smov 16  }
  0x13   :  { %37 = dma.hbm_to_vmem [thread:$0]  %s671_s1, 4096, %s32_s19, [#allocation6], %s532_s28, %s532_s28, %s533_s29  }
  0x14   :  { %s534_s7 = smov [#allocation8]   ;;  %s535_s9 = smov [#allocation2]  }
  0x15   :  { %s54_s8 = sshll.u32 %s534_s7, 4  ;;  %s19_s10 = sshll.u32 %s535_s9, 4  ;;  %s55_s8 = int_to_ptr.vmem [resolvable:$true] %s54_s8  ;;  %s20_s10 = int_to_ptr.vmem [resolvable:$true] %s19_s10 }
  0x16   :  { %s413_s13 = scalar_lea.hbm %s673_s3, 16 }
  0x17   :  { %p414_p8 = scmp.ne.s32.totalorder %s673_s3, %s413_s13  ;;  %p417_p9 = scmp.lt.u32.totalorder %s413_s13, %s673_s3 }
  0x19   :  { %p419_p10 = pnand %p417_p9, %p414_p8 }
  0x1b   :  { %422 = shalt.err (!%p419_p10)
}
  0x1c   :  { %s423_s1 = scalar_lea.vmem %s55_s8, 16  ;;  %s427_s18 = scalar_lea.vmem %s55_s8, 32 }
  0x1d   :  { %p424_p11 = scmp.ne.s32.totalorder %s55_s8, %s423_s1  ;;  %p428_p12 = scmp.lt.s32.totalorder %s55_s8, %s55_s8 }
  0x1e   :  { %p429_p13 = scmp.lt.s32.totalorder %s427_s18, %s423_s1 }
  0x20   :  { %p430_p0 = por %p429_p13, %p428_p12 }
  0x22   :  { %p431_p1 = pnand %p430_p0, %p424_p11 }
  0x24   :  { %434 = shalt.err (!%p431_p1)
}
  0x25   :  { %57 = dma.hbm_to_vmem [thread:$0]  %s673_s3, 16, %s55_s8, [#allocation9]  }
  0x26   :  { %s435_s23 = scalar_lea.hbm %s670_s0, 512 }
  0x27   :  { %p436_p2 = scmp.ne.s32.totalorder %s670_s0, %s435_s23  ;;  %p439_p3 = scmp.lt.u32.totalorder %s435_s23, %s670_s0 }
  0x29   :  { %p441_p4 = pnand %p439_p3, %p436_p2 }
  0x2b   :  { %444 = shalt.err (!%p441_p4)
}
  0x2c   :  { %s445_s30 = scalar_lea.vmem %s20_s10, 512  ;;  %p450_p6 = scmp.lt.s32.totalorder %s20_s10, %s20_s10 }
  0x2d   :  { %p446_p5 = scmp.ne.s32.totalorder %s20_s10, %s445_s30  ;;  %p451_p7 = scmp.lt.s32.totalorder %s445_s30, %s445_s30 }
  0x2f   :  { %p452_p8 = por %p451_p7, %p450_p6 }
  0x31   :  { %p453_p9 = pnand %p452_p8, %p446_p5 }
  0x33   :  { %456 = shalt.err (!%p453_p9)
}
  0x34   :  { %s536_s3 = smov 128   ;;  %s537_s6 = smov 8  }
  0x35   :  { %25 = dma.hbm_to_vmem [thread:$0]  %s670_s0, 512, %s20_s10, [#allocation3], %s536_s3, %s536_s3, %s537_s6  }
  0x36   :  { %s538_s9 = smov [#allocation7]   ;;  %s539_s12 = smov [#allocation10]  }
  0x37   :  { %s44_s11 = sshll.u32 %s538_s9, 4  ;;  %s64_s13 = sshll.u32 %s539_s12, 4  ;;  %s45_s11 = int_to_ptr.vmem [resolvable:$true] %s44_s11  ;;  %s65_s13 = int_to_ptr.vmem [resolvable:$true] %s64_s13 }
  0x38   :  { %s457_s16 = scalar_lea.hbm %s672_s2, 16 }
  0x39   :  { %p458_p10 = scmp.ne.s32.totalorder %s672_s2, %s457_s16  ;;  %p461_p11 = scmp.lt.u32.totalorder %s457_s16, %s672_s2 }
  0x3b   :  { %p463_p12 = pnand %p461_p11, %p458_p10 }
  0x3d   :  { %466 = shalt.err (!%p463_p12)
}
  0x3e   :  { %s467_s0 = scalar_lea.vmem %s45_s11, 16  ;;  %s471_s10 = scalar_lea.vmem %s45_s11, 32 }
  0x3f   :  { %p468_p13 = scmp.ne.s32.totalorder %s45_s11, %s467_s0  ;;  %p472_p0 = scmp.lt.s32.totalorder %s45_s11, %s45_s11 }
  0x40   :  { %p473_p1 = scmp.lt.s32.totalorder %s471_s10, %s467_s0 }
  0x42   :  { %p474_p2 = por %p473_p1, %p472_p0 }
  0x44   :  { %p475_p3 = pnand %p474_p2, %p468_p13 }
  0x46   :  { %478 = shalt.err (!%p475_p3)
}
  0x47   :  { %47 = dma.hbm_to_vmem [thread:$0]  %s672_s2, 16, %s45_s11, [#allocation6]  }
  0x48   :  { %s479_s24 = scalar_lea.hbm %s674_s4, 32 }
  0x49   :  { %p480_p4 = scmp.ne.s32.totalorder %s674_s4, %s479_s24  ;;  %p483_p5 = scmp.lt.u32.totalorder %s479_s24, %s674_s4 }
  0x4b   :  { %p485_p6 = pnand %p483_p5, %p480_p4 }
  0x4d   :  { %488 = shalt.err (!%p485_p6)
}
  0x4e   :  { %s489_s3 = scalar_lea.vmem %s65_s13, 32  ;;  %p494_p8 = scmp.lt.s32.totalorder %s65_s13, %s65_s13 }
  0x4f   :  { %p490_p7 = scmp.ne.s32.totalorder %s65_s13, %s489_s3  ;;  %p495_p9 = scmp.lt.s32.totalorder %s489_s3, %s489_s3 }
  0x51   :  { %p496_p10 = por %p495_p9, %p494_p8 }
  0x53   :  { %p497_p11 = pnand %p496_p10, %p490_p7 }
  0x55   :  { %500 = shalt.err (!%p497_p11)
}
  0x56   :  { %67 = dma.hbm_to_vmem [thread:$0]  %s674_s4, 32, %s65_s13, [#allocation9]  }
  0x57   :  { %523 = dma.done.wait [#allocation3], 512  }
  0x58   :  { %524 = vsyncadd [#allocation3], 4294966784 }
  0x59   :  { %525 = dma.done.wait [#allocation6], 4112  }
  0x5a   :  { %526 = vsyncadd [#allocation6], 4294963184 }
  0x5b   :  { %527 = dma.done.wait [#allocation9], 48  }
  0x5c   :  { %528 = vsyncadd [#allocation9], 4294967248  ;;  %v83_v0 = vld [vmem:[#allocation2] sm:$0xff]  ;;  %v84_v1 = vld [vmem:[#allocation2 + $0x8] sm:$0xff]  ;;  %s541_s4 = smov [#allocation11]  }
  0x5d   :  { %87 = vadd.xlane.f32.xlu0 %v83_v0  ;;  %89 = vadd.xlane.f32.xlu1 %v84_v1  ;;  %v85_v2 = vld [vmem:[#allocation2 + $0x10] sm:$0xff]  ;;  %v86_v3 = vld [vmem:[#allocation2 + $0x18] sm:$0xff]  ;;  %v155_v4 = vld [vmem:[#allocation5 + $0x8] sm:$0xff]  ;;  %s308_s7 = sshll.u32 %s541_s4, 4  ;;  %s309_s7 = int_to_ptr.vmem [resolvable:$true] %s308_s7 }
  0x5e   :  { %v157_v5 = vld [vmem:[#allocation5 + $0x18] sm:$0xff]  ;;  %v154_v6 = vld [vmem:[#allocation5] sm:$0xff]  ;;  %v156_v8 = vld [vmem:[#allocation5 + $0x10] sm:$0xff]  ;;  %s501_s8 = scalar_lea.vmem %s309_s7, 1024  ;;  %p506_p13 = scmp.lt.s32.totalorder %s309_s7, %s309_s7 }
  0x5f   :  { %v324_v7 = vpack.c.bf16 %v157_v5, %v155_v4  ;;  %v159_v9 = vld [vmem:[#allocation5 + $0x28] sm:$0xff]  ;;  %v161_v10 = vld [vmem:[#allocation5 + $0x38] sm:$0xff]  ;;  %v326_v11 = vpack.c.bf16 %v156_v8, %v154_v6  ;;  %v158_v13 = vld [vmem:[#allocation5 + $0x20] sm:$0xff]  ;;  %p502_p12 = scmp.ne.s32.totalorder %s309_s7, %s501_s8  ;;  %p507_p0 = scmp.lt.s32.totalorder %s501_s8, %s501_s8 }
  0x60   :  { %v328_v12 = vpack.c.bf16 %v161_v10, %v159_v9  ;;  %v160_v14 = vld [vmem:[#allocation5 + $0x30] sm:$0xff]  ;;  %v163_v15 = vld [vmem:[#allocation5 + $0x48] sm:$0xff]  ;;  %v165_v16 = vld [vmem:[#allocation5 + $0x58] sm:$0xff] }
  0x61   :  { %91 = vadd.xlane.f32.xlu0 %v85_v2  ;;  %93 = vadd.xlane.f32.xlu1 %v86_v3  ;;  %v330_v17 = vpack.c.bf16 %v160_v14, %v158_v13  ;;  %v332_v18 = vpack.c.bf16 %v165_v16, %v163_v15  ;;  %v162_v19 = vld [vmem:[#allocation5 + $0x40] sm:$0xff]  ;;  %v164_v20 = vld [vmem:[#allocation5 + $0x50] sm:$0xff]  ;;  %v167_v38 = vld [vmem:[#allocation5 + $0x68] sm:$0xff]  ;;  %p508_p1 = por %p507_p0, %p506_p13 }
  0x62   :  { %325 = vmatprep.subr.bf16.mxu0 %v324_v7  ;;  %356 = vmatprep.subr.bf16.mxu1 %v324_v7  ;;  %v334_v21 = vpack.c.bf16 %v164_v20, %v162_v19  ;;  %v169_v39 = vld [vmem:[#allocation5 + $0x78] sm:$0xff]  ;;  %v166_v41 = vld [vmem:[#allocation5 + $0x60] sm:$0xff]  ;;  %v168_v42 = vld [vmem:[#allocation5 + $0x70] sm:$0xff] }
  0x63   :  { %327 = vmatpush1.bf16.msra.mxu0 %v326_v11  ;;  %364 = vmatpush1.bf16.msra.mxu1 %v326_v11  ;;  %v336_v40 = vpack.c.bf16 %v169_v39, %v167_v38  ;;  %v338_v43 = vpack.c.bf16 %v168_v42, %v166_v41  ;;  %v171_v44 = vld [vmem:[#allocation5 + $0x88] sm:$0xff]  ;;  %v173_v45 = vld [vmem:[#allocation5 + $0x98] sm:$0xff]  ;;  %v170_v47 = vld [vmem:[#allocation5 + $0x80] sm:$0xff]  ;;  %v188_v38 = vlaneseq  ;;  %p509_p2 = pnand %p508_p1, %p502_p12 }
  0x64   :  { %329 = vmatprep.subr.bf16.mxu0 %v328_v12  ;;  %357 = vmatprep.subr.bf16.mxu1 %v328_v12  ;;  %v340_v46 = vpack.c.bf16 %v173_v45, %v171_v44  ;;  %v172_v48 = vld [vmem:[#allocation5 + $0x90] sm:$0xff]  ;;  %v175_v50 = vld [vmem:[#allocation5 + $0xa8] sm:$0xff]  ;;  %v177_v51 = vld [vmem:[#allocation5 + $0xb8] sm:$0xff] }
  0x65   :  { %v342_v49 = vpack.c.bf16 %v172_v48, %v170_v47  ;;  %v344_v52 = vpack.c.bf16 %v177_v51, %v175_v50  ;;  %v174_v53 = vld [vmem:[#allocation5 + $0xa0] sm:$0xff]  ;;  %v176_v54 = vld [vmem:[#allocation5 + $0xb0] sm:$0xff]  ;;  %v179_v56 = vld [vmem:[#allocation5 + $0xc8] sm:$0xff]  ;;  %v189_v39 = vshrl.u32 %v188_v38, 7 }
  0x66   :  { %v346_v55 = vpack.c.bf16 %v176_v54, %v174_v53  ;;  %v181_v57 = vld [vmem:[#allocation5 + $0xd8] sm:$0xff]  ;;  %v178_v59 = vld [vmem:[#allocation5 + $0xc0] sm:$0xff]  ;;  %v180_v60 = vld [vmem:[#allocation5 + $0xd0] sm:$0xff] }
  0x67   :  { %331 = vmatpush1.bf16.msra.mxu0 %v330_v17  ;;  %365 = vmatpush1.bf16.msra.mxu1 %v330_v17  ;;  %v348_v58 = vpack.c.bf16 %v181_v57, %v179_v56  ;;  %v183_v61 = vld [vmem:[#allocation5 + $0xe8] sm:$0xff]  ;;  %v350_v62 = vpack.c.bf16 %v180_v60, %v178_v59  ;;  %v185_v63 = vld [vmem:[#allocation5 + $0xf8] sm:$0xff]  ;;  %v323_v20 = vld [vmem:[#allocation8] ss:$0 sm:$0xff] }
  0x68   :  { %333 = vmatprep.subr.bf16.mxu0 %v332_v18  ;;  %358 = vmatprep.subr.bf16.mxu1 %v332_v18  ;;  %v322_v18 = vld [vmem:[#allocation7] ss:$0 sm:$0xff] }
  0x6b   :  { %335 = vmatpush1.bf16.msra.mxu0 %v334_v21  ;;  %366 = vmatpush1.bf16.msra.mxu1 %v334_v21 }
  0x6c   :  { %337 = vmatprep.subr.bf16.mxu0 %v336_v40  ;;  %359 = vmatprep.subr.bf16.mxu1 %v336_v40  ;;  %v186_v40 = vld [vmem:[#allocation10] sm:$0x3] }
  0x6f   :  { %339 = vmatpush1.bf16.msra.mxu0 %v338_v43  ;;  %367 = vmatpush1.bf16.msra.mxu1 %v338_v43 }
  0x70   :  { %341 = vmatprep.subr.bf16.mxu0 %v340_v46  ;;  %360 = vmatprep.subr.bf16.mxu1 %v340_v46 }
  0x73   :  { %343 = vmatpush1.bf16.msra.mxu0 %v342_v49  ;;  %368 = vmatpush1.bf16.msra.mxu1 %v342_v49 }
  0x74   :  { %345 = vmatprep.subr.bf16.mxu0 %v344_v52  ;;  %361 = vmatprep.subr.bf16.mxu1 %v344_v52 }
  0x77   :  { %347 = vmatpush1.bf16.msra.mxu0 %v346_v55  ;;  %369 = vmatpush1.bf16.msra.mxu1 %v346_v55 }
  0x78   :  { %349 = vmatprep.subr.bf16.mxu0 %v348_v58  ;;  %362 = vmatprep.subr.bf16.mxu1 %v348_v58 }
  0x7b   :  { %351 = vmatpush1.bf16.msra.mxu0 %v350_v62  ;;  %370 = vmatpush1.bf16.msra.mxu1 %v350_v62 }
  0xea   :  { %v88_v22 = vpop.xlane.xlu0 %87  ;;  %v90_v23 = vpop.xlane.xlu1 %89 }
  0xeb   :  { %v96_v24 = vmul.f32 0.0078125, %v88_v22  ;;  %v97_v25 = vmul.f32 0.0078125, %v90_v23 }
  0xed   :  { %v635_v26 = vsub.f32 %v83_v0, %v96_v24  ;;  %v637_v27 = vsub.f32 %v84_v1, %v97_v25  ;;  %v182_v0 = vld [vmem:[#allocation5 + $0xe0] sm:$0xff]  ;;  %v184_v1 = vld [vmem:[#allocation5 + $0xf0] sm:$0xff] }
  0xee   :  { %v92_v28 = vpop.xlane.xlu0 %91  ;;  %v94_v29 = vpop.xlane.xlu1 %93  ;;  %v354_v4 = vpack.c.bf16 %v184_v1, %v182_v0 }
  0xef   :  { %v98_v30 = vmul.f32 0.0078125, %v92_v28  ;;  %v104_v31 = vmul.f32 %v635_v26, %v635_v26  ;;  %v99_v32 = vmul.f32 0.0078125, %v94_v29  ;;  %v105_v35 = vmul.f32 %v637_v27, %v637_v27 }
  0xf1   :  { %v641_v33 = vsub.f32 %v85_v2, %v98_v30  ;;  %108 = vadd.xlane.f32.xlu0 %v104_v31  ;;  %v643_v34 = vsub.f32 %v86_v3, %v99_v32  ;;  %v540_v2 = vmov 0.0   ;;  %v352_v3 = vpack.c.bf16 %v185_v63, %v183_v61 }
  0xf2   :  { %262 = vmatprep.mubr.f32.mxu0 %v540_v2  ;;  %274 = vmatprep.mubr.f32.mxu1 %v540_v2 }
  0xf3   :  { %v106_v36 = vmul.f32 %v641_v33, %v641_v33  ;;  %v107_v37 = vmul.f32 %v643_v34, %v643_v34  ;;  %353 = vmatprep.subr.bf16.mxu0 %v352_v3  ;;  %363 = vmatprep.subr.bf16.mxu1 %v352_v3 }
  0xf4   :  { %355 = vmatpush1.bf16.msra.mxu0 %v354_v4  ;;  %371 = vmatpush1.bf16.msra.mxu1 %v354_v4 }
  0xf5   :  { %110 = vadd.xlane.f32.xlu0 %v105_v35  ;;  %112 = vadd.xlane.f32.xlu1 %v106_v36 }
  0xf9   :  { %114 = vadd.xlane.f32.xlu1 %v107_v37 }
 0x17e   :  { %v109_v5 = vpop.xlane.xlu0 %108 }
 0x17f   :  { %v116_v6 = vmul.f32 0.0078125, %v109_v5 }
 0x181   :  { %v120_v7 = vadd.f32 1e-05, %v116_v6 }
 0x182   :  { %v113_v8 = vpop.xlane.xlu1 %112  ;;  %v111_v9 = vpop.xlane.xlu0 %110 }
 0x183   :  { %383 = vrsqrt.f32 %v120_v7  ;;  %v118_v10 = vmul.f32 0.0078125, %v113_v8  ;;  %v117_v11 = vmul.f32 0.0078125, %v111_v9 }
 0x185   :  { %v122_v12 = vadd.f32 1e-05, %v118_v10  ;;  %v121_v13 = vadd.f32 1e-05, %v117_v11 }
 0x186   :  { %v115_v14 = vpop.xlane.xlu1 %114 }
 0x187   :  { %385 = vrsqrt.f32 %v122_v12  ;;  %v119_v15 = vmul.f32 0.0078125, %v115_v14 }
 0x188   :  { %387 = vrsqrt.f32 %v121_v13 }
 0x189   :  { %v123_v16 = vadd.f32 1e-05, %v119_v15 }
 0x18b   :  { %389 = vrsqrt.f32 %v123_v16 }
 0x18d   :  { %v384_v17 = vpop.eup %383 }
 0x18e   :  { %v128_v19 = vmul.f32 %v384_v17, %v635_v26 }
 0x190   :  { %v139_v21 = vmul.f32 %v322_v18, %v128_v19 }
 0x191   :  { %v386_v22 = vpop.eup %385 }
 0x192   :  { %v388_v23 = vpop.eup %387  ;;  %v150_v24 = vadd.f32 %v323_v20, %v139_v21  ;;  %v130_v25 = vmul.f32 %v386_v22, %v641_v33  ;;  %v190_v33 = vsub.s32 0, %v189_v39 }
 0x193   :  { %v129_v28 = vmul.f32 %v388_v23, %v637_v27  ;;  %v194_v27 = vsub.s32 1, %v189_v39 }
 0x194   :  { %263 = vmatmul.mubr.f32.vlgmr.msra.gmra.mrb[0].mxu0 %v150_v24  ;;  %v141_v29 = vmul.f32 %v322_v18, %v130_v25  ;;  %v191_v41 = vrot.slane %v186_v40, %v190_v33 }
 0x195   :  { %v390_v30 = vpop.eup %389  ;;  %268 = vmatprep.mubr.f32.mxu0 %v540_v2  ;;  %v140_v31 = vmul.f32 %v322_v18, %v129_v28  ;;  %v195_v42 = vrot.slane %v186_v40, %v194_v27 }
 0x196   :  { %v152_v32 = vadd.f32 %v323_v20, %v141_v29  ;;  %v131_v35 = vmul.f32 %v390_v30, %v643_v34 }
 0x197   :  { %v151_v36 = vadd.f32 %v323_v20, %v140_v31 }
 0x198   :  { %275 = vmatmul.mubr.f32.vlgmr.msra.gmra.mrb[0].mxu1 %v152_v32  ;;  %v142_v26 = vmul.f32 %v322_v18, %v131_v35 }
 0x199   :  { %269 = vmatmul.mubr.f32.gmra.mrb[2].mxu0 %v151_v36  ;;  %280 = vmatprep.mubr.f32.mxu1 %v540_v2 }
 0x19a   :  { %v153_v37 = vadd.f32 %v323_v20, %v142_v26 }
 0x19c   :  { %281 = vmatmul.mubr.f32.gmra.mrb[2].mxu1 %v153_v37 }
 0x267   :  { %v264_v43 = vpop.f32.mrb[0].mxu0 }
 0x268   :  { %v265_v44 = vadd.f32 %v264_v43, %v191_v41  ;;  %v266_v45 = vpop.f32.mrb[1].mxu0 }
 0x269   :  { %v267_v46 = vadd.f32 %v266_v45, %v195_v42 }
 0x26a   :  { %v287_v47 = vmax.f32 %v265_v44, 0.0 }
 0x26b   :  { %v288_v34 = vmax.f32 %v267_v46, 0.0  ;;  %v276_v48 = vpop.f32.mrb[0].mxu1 }
 0x26c   :  { %295 = vst [vmem:[#allocation11] sm:$0xff] %v287_v47  ;;  %v270_v49 = vpop.f32.mrb[2].mxu0  ;;  %v277_v50 = vadd.f32 %v276_v48, %v191_v41  ;;  %v278_v51 = vpop.f32.mrb[1].mxu1 }
 0x26d   :  { %296 = vst [vmem:[#allocation11 + $0x8] sm:$0xff] %v288_v34  ;;  %v271_v52 = vadd.f32 %v270_v49, %v191_v41  ;;  %v272_v53 = vpop.f32.mrb[3].mxu0  ;;  %v279_v54 = vadd.f32 %v278_v51, %v195_v42 }
 0x26e   :  { %v291_v55 = vmax.f32 %v277_v50, 0.0  ;;  %v273_v56 = vadd.f32 %v272_v53, %v195_v42 }
 0x26f   :  { %v289_v57 = vmax.f32 %v271_v52, 0.0  ;;  %v292_v58 = vmax.f32 %v279_v54, 0.0  ;;  %v282_v59 = vpop.f32.mrb[2].mxu1 }
 0x270   :  { %299 = vst [vmem:[#allocation11 + $0x20] sm:$0xff] %v291_v55  ;;  %v290_v60 = vmax.f32 %v273_v56, 0.0  ;;  %v283_v61 = vadd.f32 %v282_v59, %v191_v41  ;;  %v284_v62 = vpop.f32.mrb[3].mxu1 }
 0x271   :  { %297 = vst [vmem:[#allocation11 + $0x10] sm:$0xff] %v289_v57  ;;  %300 = vst [vmem:[#allocation11 + $0x28] sm:$0xff] %v292_v58  ;;  %v285_v63 = vadd.f32 %v284_v62, %v195_v42 }
 0x272   :  { %298 = vst [vmem:[#allocation11 + $0x18] sm:$0xff] %v290_v60  ;;  %v293_v0 = vmax.f32 %v283_v61, 0.0 }
 0x273   :  { %v294_v1 = vmax.f32 %v285_v63, 0.0 }
 0x274   :  { %301 = vst [vmem:[#allocation11 + $0x30] sm:$0xff] %v293_v0 }
 0x275   :  { %302 = vst [vmem:[#allocation11 + $0x38] sm:$0xff] %v294_v1 }
 0x276   :  { %512 = shalt.err (!%p509_p2)
}
 0x277   :  { %s513_s12 = scalar_lea.hbm %s675_s5, 1024 }
 0x278   :  { %p514_p3 = scmp.ne.s32.totalorder %s675_s5, %s513_s12  ;;  %p517_p4 = scmp.lt.u32.totalorder %s513_s12, %s675_s5 }
 0x27a   :  { %p519_p5 = pnand %p517_p4, %p514_p3 }
 0x27c   :  { %522 = shalt.err (!%p519_p5)
}
 0x27d   :  { %314 = dma.vmem_to_hbm [thread:$0]  %s309_s7, 1024, %s675_s5, [#allocation4], %s532_s28, %s532_s28, %s533_s29  }
 0x27e   :  { %529 = dma.done.wait [#allocation4], 1024  }
 0x27f   :  { %530 = vsyncadd [#allocation4], 4294966272 }
 0x280   :  { %318 = vsyncpa [#allocation3], 1 }
 0x281   :  { %319 = vsyncpa [#allocation6], 1 }
 0x282   :  { %320 = vsyncpa [#allocation9], 1 }
 0x283   :  { %321 = vsyncpa [#allocation4], 1 }

// kernel: _forward.15
= control target key start
LH: loop header
LB: loop body
LE: loop exit
PB: predicated region body
PF: predicated region fallthrough
CT: control target
= control target key end

     0   :  { %9 = vsyncpa [#allocation3], 0  ;;  %s564_s0 = inlined_call_operand.hbm [shape: f32[32,256], index: 0, kind: input, shape index: {}]   ;;  %s565_s1 = inlined_call_operand.hbm [shape: f32[256,128], index: 1, kind: input, shape index: {}]   ;;  %s566_s2 = inlined_call_operand.hbm [shape: f32[1,128], index: 2, kind: input, shape index: {}]   ;;  %s567_s3 = inlined_call_operand.hbm [shape: f32[32,128], index: 3, kind: input, shape index: {}]   ;;  %s568_s4 = inlined_call_operand.hbm [shape: f32[32,128], index: 4, kind: output, shape index: {}]  }
   0x1   :  { %10 = vsyncpa [#allocation6], 0 }
   0x2   :  { %11 = vsyncpa [#allocation9], 0 }
   0x3   :  { %12 = vsyncpa [#allocation4], 0  ;;  %s454_s15 = smov [#allocation5]   ;;  %s336_s19 = scalar_lea.hbm %s565_s1, 4096 }
   0x4   :  { %s30_s16 = sshll.u32 %s454_s15, 4  ;;  %p337_p0 = scmp.ne.s32.totalorder %s565_s1, %s336_s19  ;;  %s31_s16 = int_to_ptr.vmem [resolvable:$true] %s30_s16 }
   0x5   :  { %p340_p1 = scmp.lt.u32.totalorder %s336_s19, %s565_s1 }
   0x7   :  { %p342_p2 = pnand %p340_p1, %p337_p0 }
   0x9   :  { %345 = shalt.err (!%p342_p2)
}
   0xa   :  { %s346_s24 = scalar_lea.vmem %s31_s16, 4096  ;;  %p351_p4 = scmp.lt.s32.totalorder %s31_s16, %s31_s16 }
   0xb   :  { %p347_p3 = scmp.ne.s32.totalorder %s31_s16, %s346_s24  ;;  %p352_p5 = scmp.lt.s32.totalorder %s346_s24, %s346_s24 }
   0xd   :  { %p353_p6 = por %p352_p5, %p351_p4 }
   0xf   :  { %p354_p7 = pnand %p353_p6, %p347_p3 }
  0x11   :  { %357 = shalt.err (!%p354_p7)
}
  0x12   :  { %s455_s25 = smov 128   ;;  %s456_s26 = smov 8  }
  0x13   :  { %36 = dma.hbm_to_vmem [thread:$0]  %s565_s1, 4096, %s31_s16, [#allocation6], %s455_s25, %s455_s25, %s456_s26  }
  0x14   :  { %s457_s29 = smov [#allocation2]   ;;  %s358_s7 = scalar_lea.hbm %s564_s0, 1024 }
  0x15   :  { %s18_s30 = sshll.u32 %s457_s29, 4  ;;  %p359_p8 = scmp.ne.s32.totalorder %s564_s0, %s358_s7  ;;  %s19_s30 = int_to_ptr.vmem [resolvable:$true] %s18_s30 }
  0x16   :  { %p362_p9 = scmp.lt.u32.totalorder %s358_s7, %s564_s0 }
  0x18   :  { %p364_p10 = pnand %p362_p9, %p359_p8 }
  0x1a   :  { %367 = shalt.err (!%p364_p10)
}
  0x1b   :  { %s368_s12 = scalar_lea.vmem %s19_s30, 1024  ;;  %p373_p12 = scmp.lt.s32.totalorder %s19_s30, %s19_s30 }
  0x1c   :  { %p369_p11 = scmp.ne.s32.totalorder %s19_s30, %s368_s12  ;;  %p374_p13 = scmp.lt.s32.totalorder %s368_s12, %s368_s12 }
  0x1e   :  { %p375_p0 = por %p374_p13, %p373_p12 }
  0x20   :  { %p376_p1 = pnand %p375_p0, %p369_p11 }
  0x22   :  { %379 = shalt.err (!%p376_p1)
}
  0x23   :  { %s458_s1 = smov 256   ;;  %s459_s13 = smov 16  }
  0x24   :  { %24 = dma.hbm_to_vmem [thread:$0]  %s564_s0, 1024, %s19_s30, [#allocation3], %s458_s1, %s458_s1, %s459_s13  }
  0x25   :  { %s460_s16 = smov [#allocation7]   ;;  %s461_s18 = smov [#allocation8]  }
  0x26   :  { %s43_s17 = sshll.u32 %s460_s16, 4  ;;  %s52_s19 = sshll.u32 %s461_s18, 4  ;;  %s44_s17 = int_to_ptr.vmem [resolvable:$true] %s43_s17  ;;  %s515_s19 = int_to_ptr.vmem [resolvable:$true] %s52_s19 }
  0x27   :  { %s380_s22 = scalar_lea.hbm %s566_s2, 16 }
  0x28   :  { %p381_p2 = scmp.ne.s32.totalorder %s566_s2, %s380_s22  ;;  %p384_p3 = scmp.lt.u32.totalorder %s380_s22, %s566_s2 }
  0x2a   :  { %p386_p4 = pnand %p384_p3, %p381_p2 }
  0x2c   :  { %389 = shalt.err (!%p386_p4)
}
  0x2d   :  { %s390_s0 = scalar_lea.vmem %s44_s17, 16  ;;  %s394_s29 = scalar_lea.vmem %s44_s17, 32 }
  0x2e   :  { %p391_p5 = scmp.ne.s32.totalorder %s44_s17, %s390_s0  ;;  %p395_p6 = scmp.lt.s32.totalorder %s44_s17, %s44_s17 }
  0x2f   :  { %p396_p7 = scmp.lt.s32.totalorder %s394_s29, %s390_s0 }
  0x31   :  { %p397_p8 = por %p396_p7, %p395_p6 }
  0x33   :  { %p398_p9 = pnand %p397_p8, %p391_p5 }
  0x35   :  { %401 = shalt.err (!%p398_p9)
}
  0x36   :  { %46 = dma.hbm_to_vmem [thread:$0]  %s566_s2, 16, %s44_s17, [#allocation6]  }
  0x37   :  { %s402_s8 = scalar_lea.hbm %s567_s3, 512 }
  0x38   :  { %p403_p10 = scmp.ne.s32.totalorder %s567_s3, %s402_s8  ;;  %p406_p11 = scmp.lt.u32.totalorder %s402_s8, %s567_s3 }
  0x3a   :  { %p408_p12 = pnand %p406_p11, %p403_p10 }
  0x3c   :  { %411 = shalt.err (!%p408_p12)
}
  0x3d   :  { %s412_s1 = scalar_lea.vmem %s515_s19, 512  ;;  %p417_p0 = scmp.lt.s32.totalorder %s515_s19, %s515_s19 }
  0x3e   :  { %p413_p13 = scmp.ne.s32.totalorder %s515_s19, %s412_s1  ;;  %p418_p1 = scmp.lt.s32.totalorder %s412_s1, %s412_s1 }
  0x40   :  { %p419_p2 = por %p418_p1, %p417_p0 }
  0x42   :  { %p420_p3 = pnand %p419_p2, %p413_p13 }
  0x44   :  { %423 = shalt.err (!%p420_p3)
}
  0x45   :  { %58 = dma.hbm_to_vmem [thread:$0]  %s567_s3, 512, %s515_s19, [#allocation9], %s455_s25, %s455_s25, %s456_s26  }
  0x46   :  { %446 = dma.done.wait [#allocation3], 1024  }
  0x47   :  { %447 = vsyncadd [#allocation3], 4294966272 }
  0x48   :  { %448 = dma.done.wait [#allocation6], 4112  }
  0x49   :  { %449 = vsyncadd [#allocation6], 4294963184 }
  0x4a   :  { %450 = dma.done.wait [#allocation9], 512  }
  0x4b   :  { %451 = vsyncadd [#allocation9], 4294966784  ;;  %v95_v0 = vld [vmem:[#allocation5 + $0x80] sm:$0xff]  ;;  %v96_v1 = vld [vmem:[#allocation5 + $0x88] sm:$0xff]  ;;  %s462_s3 = smov [#allocation10]  }
  0x4c   :  { %v79_v2 = vld [vmem:[#allocation5] sm:$0xff]  ;;  %v279_v3 = vpack.c.bf16 %v96_v1, %v95_v0  ;;  %v80_v4 = vld [vmem:[#allocation5 + $0x8] sm:$0xff]  ;;  %v97_v5 = vld [vmem:[#allocation5 + $0x90] sm:$0xff]  ;;  %s220_s14 = sshll.u32 %s462_s3, 4  ;;  %s221_s14 = int_to_ptr.vmem [resolvable:$true] %s220_s14 }
  0x4d   :  { %v98_v6 = vld [vmem:[#allocation5 + $0x98] sm:$0xff]  ;;  %v281_v7 = vpack.c.bf16 %v80_v4, %v79_v2  ;;  %v81_v9 = vld [vmem:[#allocation5 + $0x10] sm:$0xff]  ;;  %v99_v11 = vld [vmem:[#allocation5 + $0xa0] sm:$0xff]  ;;  %s424_s15 = scalar_lea.vmem %s221_s14, 512  ;;  %p429_p5 = scmp.lt.s32.totalorder %s221_s14, %s221_s14 }
  0x4e   :  { %v283_v8 = vpack.c.bf16 %v98_v6, %v97_v5  ;;  %v82_v10 = vld [vmem:[#allocation5 + $0x18] sm:$0xff]  ;;  %280 = vmatprep.subr.bf16.mxu0 %v279_v3  ;;  %311 = vmatprep.subr.bf16.mxu1 %v279_v3  ;;  %v100_v12 = vld [vmem:[#allocation5 + $0xa8] sm:$0xff]  ;;  %v83_v15 = vld [vmem:[#allocation5 + $0x20] sm:$0xff]  ;;  %p425_p4 = scmp.ne.s32.totalorder %s221_s14, %s424_s15  ;;  %p430_p6 = scmp.lt.s32.totalorder %s424_s15, %s424_s15 }
  0x4f   :  { %282 = vmatpush3.bf16.msra.mxu0 %v281_v7  ;;  %319 = vmatpush3.bf16.msra.mxu1 %v281_v7  ;;  %v285_v13 = vpack.c.bf16 %v82_v10, %v81_v9  ;;  %v287_v14 = vpack.c.bf16 %v100_v12, %v99_v11  ;;  %v84_v16 = vld [vmem:[#allocation5 + $0x28] sm:$0xff]  ;;  %v101_v17 = vld [vmem:[#allocation5 + $0xb0] sm:$0xff]  ;;  %v102_v18 = vld [vmem:[#allocation5 + $0xb8] sm:$0xff] }
  0x50   :  { %284 = vmatprep.subr.bf16.mxu0 %v283_v8  ;;  %312 = vmatprep.subr.bf16.mxu1 %v283_v8  ;;  %v289_v19 = vpack.c.bf16 %v84_v16, %v83_v15  ;;  %v291_v20 = vpack.c.bf16 %v102_v18, %v101_v17  ;;  %v85_v21 = vld [vmem:[#allocation5 + $0x30] sm:$0xff]  ;;  %v86_v22 = vld [vmem:[#allocation5 + $0x38] sm:$0xff]  ;;  %v103_v23 = vld [vmem:[#allocation5 + $0xc0] sm:$0xff]  ;;  %p431_p7 = por %p430_p6, %p429_p5 }
  0x51   :  { %v104_v24 = vld [vmem:[#allocation5 + $0xc8] sm:$0xff]  ;;  %v293_v27 = vpack.c.bf16 %v86_v22, %v85_v21  ;;  %v87_v29 = vld [vmem:[#allocation5 + $0x40] sm:$0xff]  ;;  %v105_v31 = vld [vmem:[#allocation5 + $0xd0] sm:$0xff] }
  0x52   :  { %v72_v25 = vld [vmem:[#allocation2 + $0x8] sm:$0xff]  ;;  %v295_v28 = vpack.c.bf16 %v104_v24, %v103_v23  ;;  %v106_v32 = vld [vmem:[#allocation5 + $0xd8] sm:$0xff]  ;;  %v89_v35 = vld [vmem:[#allocation5 + $0x50] sm:$0xff]  ;;  %p432_p8 = pnand %p431_p7, %p425_p4 }
  0x53   :  { %286 = vmatpush3.bf16.msra.mxu0 %v285_v13  ;;  %320 = vmatpush3.bf16.msra.mxu1 %v285_v13  ;;  %v76_v26 = vld [vmem:[#allocation2 + $0x28] sm:$0xff]  ;;  %v299_v34 = vpack.c.bf16 %v106_v32, %v105_v31  ;;  %v90_v36 = vld [vmem:[#allocation5 + $0x58] sm:$0xff]  ;;  %v107_v37 = vld [vmem:[#allocation5 + $0xe0] sm:$0xff] }
  0x54   :  { %288 = vmatprep.subr.bf16.mxu0 %v287_v14  ;;  %313 = vmatprep.subr.bf16.mxu1 %v287_v14  ;;  %v88_v30 = vld [vmem:[#allocation5 + $0x48] sm:$0xff]  ;;  %v301_v39 = vpack.c.bf16 %v90_v36, %v89_v35  ;;  %v91_v41 = vld [vmem:[#allocation5 + $0x60] sm:$0xff]  ;;  %v109_v43 = vld [vmem:[#allocation5 + $0xf0] sm:$0xff] }
  0x55   :  { %182 = vmatprep.mubr.f32.mxu0 %v72_v25  ;;  %192 = vmatprep.mubr.f32.mxu1 %v76_v26  ;;  %v297_v33 = vpack.c.bf16 %v88_v30, %v87_v29  ;;  %v108_v38 = vld [vmem:[#allocation5 + $0xe8] sm:$0xff]  ;;  %v110_v44 = vld [vmem:[#allocation5 + $0xf8] sm:$0xff]  ;;  %v93_v47 = vld [vmem:[#allocation5 + $0x70] sm:$0xff] }
  0x56   :  { %v303_v40 = vpack.c.bf16 %v108_v38, %v107_v37  ;;  %v92_v42 = vld [vmem:[#allocation5 + $0x68] sm:$0xff]  ;;  %v307_v46 = vpack.c.bf16 %v110_v44, %v109_v43  ;;  %v94_v48 = vld [vmem:[#allocation5 + $0x78] sm:$0xff]  ;;  %v71_v50 = vld [vmem:[#allocation2] sm:$0xff] }
  0x57   :  { %290 = vmatpush3.bf16.msra.mxu0 %v289_v19  ;;  %321 = vmatpush3.bf16.msra.mxu1 %v289_v19  ;;  %v305_v45 = vpack.c.bf16 %v92_v42, %v91_v41  ;;  %v309_v49 = vpack.c.bf16 %v94_v48, %v93_v47  ;;  %v75_v51 = vld [vmem:[#allocation2 + $0x20] sm:$0xff]  ;;  %v74_v52 = vld [vmem:[#allocation2 + $0x18] sm:$0xff]  ;;  %v73_v54 = vld [vmem:[#allocation2 + $0x10] sm:$0xff] }
  0x58   :  { %292 = vmatprep.subr.bf16.mxu0 %v291_v20  ;;  %314 = vmatprep.subr.bf16.mxu1 %v291_v20  ;;  %v78_v53 = vld [vmem:[#allocation2 + $0x38] sm:$0xff]  ;;  %v77_v55 = vld [vmem:[#allocation2 + $0x30] sm:$0xff]  ;;  %v234_v58 = vld [vmem:[#allocation7] ss:$0 sm:$0xff] }
  0x59   :  { %v203_v63 = vld [vmem:[#allocation8] sm:$0xff]  ;;  %v205_v0 = vld [vmem:[#allocation8 + $0x10] sm:$0xff]  ;;  %v204_v11 = vld [vmem:[#allocation8 + $0x8] sm:$0xff] }
  0x5a   :  { %v206_v12 = vld [vmem:[#allocation8 + $0x18] sm:$0xff] }
  0x5b   :  { %294 = vmatpush3.bf16.msra.mxu0 %v293_v27  ;;  %322 = vmatpush3.bf16.msra.mxu1 %v293_v27 }
  0x5c   :  { %296 = vmatprep.subr.bf16.mxu0 %v295_v28  ;;  %315 = vmatprep.subr.bf16.mxu1 %v295_v28 }
  0x5f   :  { %298 = vmatpush3.bf16.msra.mxu0 %v297_v33  ;;  %323 = vmatpush3.bf16.msra.mxu1 %v297_v33 }
  0x60   :  { %300 = vmatprep.subr.bf16.mxu0 %v299_v34  ;;  %316 = vmatprep.subr.bf16.mxu1 %v299_v34 }
  0x63   :  { %302 = vmatpush3.bf16.msra.mxu0 %v301_v39  ;;  %324 = vmatpush3.bf16.msra.mxu1 %v301_v39 }
  0x64   :  { %304 = vmatprep.subr.bf16.mxu0 %v303_v40  ;;  %317 = vmatprep.subr.bf16.mxu1 %v303_v40 }
  0x67   :  { %306 = vmatpush3.bf16.msra.mxu0 %v305_v45  ;;  %325 = vmatpush3.bf16.msra.mxu1 %v305_v45 }
  0x68   :  { %308 = vmatprep.subr.bf16.mxu0 %v307_v46  ;;  %318 = vmatprep.subr.bf16.mxu1 %v307_v46 }
  0x6b   :  { %310 = vmatpush3.bf16.msra.mxu0 %v309_v49  ;;  %326 = vmatpush3.bf16.msra.mxu1 %v309_v49 }
  0x6e   :  { %183 = vmatmul.mubr.f32.vlgmr.msra.gmra.mrb[0].mxu0 %v71_v50  ;;  %193 = vmatmul.mubr.f32.vlgmr.msra.gmra.mrb[0].mxu1 %v75_v51 }
  0x6f   :  { %187 = vmatprep.mubr.f32.mxu0 %v74_v52  ;;  %197 = vmatprep.mubr.f32.mxu1 %v78_v53 }
  0x72   :  { %188 = vmatmul.mubr.f32.gmra.mrb[2].mxu0 %v73_v54  ;;  %198 = vmatmul.mubr.f32.gmra.mrb[2].mxu1 %v77_v55 }
 0x141   :  { %v267_v56 = vpop.f32.mrb[0].mxu0  ;;  %v273_v57 = vpop.f32.mrb[0].mxu1 }
 0x142   :  { %v268_v59 = vpop.f32.mrb[1].mxu0  ;;  %v274_v60 = vpop.f32.mrb[1].mxu1 }
 0x143   :  { %v269_v61 = vadd.f32 %v268_v59, %v267_v56  ;;  %v275_v62 = vadd.f32 %v274_v60, %v273_v57 }
 0x145   :  { %v185_v1 = vadd.f32 %v269_v61, %v234_v58  ;;  %v195_v2 = vadd.f32 %v275_v62, %v234_v58  ;;  %v270_v3 = vpop.f32.mrb[2].mxu0  ;;  %v276_v4 = vpop.f32.mrb[2].mxu1 }
 0x146   :  { %v271_v5 = vpop.f32.mrb[3].mxu0  ;;  %v277_v6 = vpop.f32.mrb[3].mxu1 }
 0x147   :  { %v207_v7 = vadd.f32 %v203_v63, %v185_v1  ;;  %v209_v8 = vadd.f32 %v205_v0, %v195_v2  ;;  %v272_v9 = vadd.f32 %v271_v5, %v270_v3  ;;  %v278_v10 = vadd.f32 %v277_v6, %v276_v4 }
 0x149   :  { %211 = vst [vmem:[#allocation10] sm:$0xff] %v207_v7  ;;  %213 = vst [vmem:[#allocation10 + $0x10] sm:$0xff] %v209_v8  ;;  %v190_v13 = vadd.f32 %v272_v9, %v234_v58  ;;  %v200_v14 = vadd.f32 %v278_v10, %v234_v58 }
 0x14b   :  { %v208_v15 = vadd.f32 %v204_v11, %v190_v13  ;;  %v210_v16 = vadd.f32 %v206_v12, %v200_v14 }
 0x14d   :  { %212 = vst [vmem:[#allocation10 + $0x8] sm:$0xff] %v208_v15  ;;  %214 = vst [vmem:[#allocation10 + $0x18] sm:$0xff] %v210_v16 }
 0x14e   :  { %435 = shalt.err (!%p432_p8)
}
 0x14f   :  { %s436_s18 = scalar_lea.hbm %s568_s4, 512 }
 0x150   :  { %p437_p9 = scmp.ne.s32.totalorder %s568_s4, %s436_s18  ;;  %p440_p10 = scmp.lt.u32.totalorder %s436_s18, %s568_s4 }
 0x152   :  { %p442_p11 = pnand %p440_p10, %p437_p9 }
 0x154   :  { %445 = shalt.err (!%p442_p11)
}
 0x155   :  { %226 = dma.vmem_to_hbm [thread:$0]  %s221_s14, 512, %s568_s4, [#allocation4], %s455_s25, %s455_s25, %s456_s26  }
 0x156   :  { %452 = dma.done.wait [#allocation4], 512  }
 0x157   :  { %453 = vsyncadd [#allocation4], 4294966784 }
 0x158   :  { %230 = vsyncpa [#allocation3], 1 }
 0x159   :  { %231 = vsyncpa [#allocation6], 1 }
 0x15a   :  { %232 = vsyncpa [#allocation9], 1 }
 0x15b   :  { %233 = vsyncpa [#allocation4], 1 }

// kernel: _forward.21
= control target key start
LH: loop header
LB: loop body
LE: loop exit
PB: predicated region body
PF: predicated region fallthrough
CT: control target
= control target key end

     0   :  { %8 = vsyncpa [#allocation3], 0  ;;  %s342_s0 = inlined_call_operand.hbm [shape: f32[32,128], index: 0, kind: input, shape index: {}]   ;;  %s343_s1 = inlined_call_operand.hbm [shape: f32[1,128], index: 1, kind: input, shape index: {}]   ;;  %s344_s2 = inlined_call_operand.hbm [shape: f32[1,128], index: 2, kind: input, shape index: {}]   ;;  %s345_s3 = inlined_call_operand.hbm [shape: f32[32,128], index: 3, kind: output, shape index: {}]  }
   0x1   :  { %9 = vsyncpa [#allocation6], 0 }
   0x2   :  { %10 = vsyncpa [#allocation4], 0  ;;  %s255_s12 = smov [#allocation5]   ;;  %s256_s14 = smov [#allocation2]  }
   0x3   :  { %s29_s13 = sshll.u32 %s255_s12, 4  ;;  %s16_s15 = sshll.u32 %s256_s14, 4  ;;  %s30_s13 = int_to_ptr.vmem [resolvable:$true] %s29_s13  ;;  %s281_s15 = int_to_ptr.vmem [resolvable:$true] %s16_s15 }
   0x4   :  { %s161_s18 = scalar_lea.hbm %s343_s1, 16 }
   0x5   :  { %p162_p0 = scmp.ne.s32.totalorder %s343_s1, %s161_s18  ;;  %p165_p1 = scmp.lt.u32.totalorder %s161_s18, %s343_s1 }
   0x7   :  { %p167_p2 = pnand %p165_p1, %p162_p0 }
   0x9   :  { %170 = shalt.err (!%p167_p2)
}
   0xa   :  { %s171_s23 = scalar_lea.vmem %s30_s13, 16  ;;  %s175_s24 = scalar_lea.vmem %s30_s13, 32 }
   0xb   :  { %p172_p3 = scmp.ne.s32.totalorder %s30_s13, %s171_s23  ;;  %p176_p4 = scmp.lt.s32.totalorder %s30_s13, %s30_s13 }
   0xc   :  { %p177_p5 = scmp.lt.s32.totalorder %s175_s24, %s171_s23 }
   0xe   :  { %p178_p6 = por %p177_p5, %p176_p4 }
  0x10   :  { %p179_p7 = pnand %p178_p6, %p172_p3 }
  0x12   :  { %182 = shalt.err (!%p179_p7)
}
  0x13   :  { %32 = dma.hbm_to_vmem [thread:$0]  %s343_s1, 16, %s30_s13, [#allocation6]  }
  0x14   :  { %s183_s29 = scalar_lea.hbm %s342_s0, 512 }
  0x15   :  { %p184_p8 = scmp.ne.s32.totalorder %s342_s0, %s183_s29  ;;  %p187_p9 = scmp.lt.u32.totalorder %s183_s29, %s342_s0 }
  0x17   :  { %p189_p10 = pnand %p187_p9, %p184_p8 }
  0x19   :  { %192 = shalt.err (!%p189_p10)
}
  0x1a   :  { %s193_s7 = scalar_lea.vmem %s281_s15, 512  ;;  %p198_p12 = scmp.lt.s32.totalorder %s281_s15, %s281_s15 }
  0x1b   :  { %p194_p11 = scmp.ne.s32.totalorder %s281_s15, %s193_s7  ;;  %p199_p13 = scmp.lt.s32.totalorder %s193_s7, %s193_s7 }
  0x1d   :  { %p200_p0 = por %p199_p13, %p198_p12 }
  0x1f   :  { %p201_p1 = pnand %p200_p0, %p194_p11 }
  0x21   :  { %204 = shalt.err (!%p201_p1)
}
  0x22   :  { %s257_s1 = smov 128   ;;  %s258_s8 = smov 8  }
  0x23   :  { %22 = dma.hbm_to_vmem [thread:$0]  %s342_s0, 512, %s281_s15, [#allocation3], %s257_s1, %s257_s1, %s258_s8  }
  0x24   :  { %s259_s11 = smov [#allocation7]   ;;  %s205_s16 = scalar_lea.hbm %s344_s2, 16 }
  0x25   :  { %s39_s12 = sshll.u32 %s259_s11, 4  ;;  %p206_p2 = scmp.ne.s32.totalorder %s344_s2, %s205_s16  ;;  %s40_s12 = int_to_ptr.vmem [resolvable:$true] %s39_s12 }
  0x26   :  { %p209_p3 = scmp.lt.u32.totalorder %s205_s16, %s344_s2 }
  0x28   :  { %p211_p4 = pnand %p209_p3, %p206_p2 }
  0x2a   :  { %214 = shalt.err (!%p211_p4)
}
  0x2b   :  { %s215_s21 = scalar_lea.vmem %s40_s12, 16  ;;  %s219_s0 = scalar_lea.vmem %s40_s12, 32 }
  0x2c   :  { %p216_p5 = scmp.ne.s32.totalorder %s40_s12, %s215_s21  ;;  %p220_p6 = scmp.lt.s32.totalorder %s40_s12, %s40_s12 }
  0x2d   :  { %p221_p7 = scmp.lt.s32.totalorder %s219_s0, %s215_s21 }
  0x2f   :  { %p222_p8 = por %p221_p7, %p220_p6 }
  0x31   :  { %p223_p9 = pnand %p222_p8, %p216_p5 }
  0x33   :  { %226 = shalt.err (!%p223_p9)
}
  0x34   :  { %42 = dma.hbm_to_vmem [thread:$0]  %s344_s2, 16, %s40_s12, [#allocation6]  }
  0x35   :  { %249 = dma.done.wait [#allocation3], 512  }
  0x36   :  { %250 = vsyncadd [#allocation3], 4294966784 }
  0x37   :  { %251 = dma.done.wait [#allocation6], 32  }
  0x38   :  { %252 = vsyncadd [#allocation6], 4294967264  ;;  %v52_v0 = vld [vmem:[#allocation2] sm:$0xff]  ;;  %v54_v1 = vld [vmem:[#allocation2 + $0x10] sm:$0xff]  ;;  %s260_s2 = smov [#allocation8]  }
  0x39   :  { %56 = vadd.xlane.f32.xlu0 %v52_v0  ;;  %60 = vadd.xlane.f32.xlu1 %v54_v1  ;;  %v53_v2 = vld [vmem:[#allocation2 + $0x8] sm:$0xff]  ;;  %v55_v3 = vld [vmem:[#allocation2 + $0x18] sm:$0xff]  ;;  %v145_v33 = vld [vmem:[#allocation5] ss:$0 sm:$0xff]  ;;  %s132_s23 = sshll.u32 %s260_s2, 4  ;;  %s133_s23 = int_to_ptr.vmem [resolvable:$true] %s132_s23 }
  0x3a   :  { %v146_v35 = vld [vmem:[#allocation7] ss:$0 sm:$0xff]  ;;  %s227_s24 = scalar_lea.vmem %s133_s23, 512  ;;  %p232_p11 = scmp.lt.s32.totalorder %s133_s23, %s133_s23 }
  0x3b   :  { %p228_p10 = scmp.ne.s32.totalorder %s133_s23, %s227_s24  ;;  %p233_p12 = scmp.lt.s32.totalorder %s227_s24, %s227_s24 }
  0x3d   :  { %58 = vadd.xlane.f32.xlu0 %v53_v2  ;;  %62 = vadd.xlane.f32.xlu1 %v55_v3  ;;  %p234_p13 = por %p233_p12, %p232_p11 }
  0x3f   :  { %p235_p0 = pnand %p234_p13, %p228_p10 }
  0xc6   :  { %v57_v4 = vpop.xlane.xlu0 %56  ;;  %v61_v5 = vpop.xlane.xlu1 %60 }
  0xc7   :  { %v65_v6 = vmul.f32 0.0078125, %v57_v4  ;;  %v67_v7 = vmul.f32 0.0078125, %v61_v5 }
  0xc9   :  { %v69_v8 = vsub.f32 %v52_v0, %v65_v6  ;;  %v71_v9 = vsub.f32 %v54_v1, %v67_v7 }
  0xca   :  { %v59_v10 = vpop.xlane.xlu0 %58  ;;  %v63_v11 = vpop.xlane.xlu1 %62 }
  0xcb   :  { %v66_v12 = vmul.f32 0.0078125, %v59_v10  ;;  %v73_v13 = vmul.f32 %v69_v8, %v69_v8  ;;  %v68_v14 = vmul.f32 0.0078125, %v63_v11  ;;  %v75_v17 = vmul.f32 %v71_v9, %v71_v9 }
  0xcd   :  { %v70_v15 = vsub.f32 %v53_v2, %v66_v12  ;;  %77 = vadd.xlane.f32.xlu0 %v73_v13  ;;  %v72_v16 = vsub.f32 %v55_v3, %v68_v14 }
  0xcf   :  { %v74_v18 = vmul.f32 %v70_v15, %v70_v15  ;;  %v76_v19 = vmul.f32 %v72_v16, %v72_v16 }
  0xd1   :  { %81 = vadd.xlane.f32.xlu0 %v75_v17  ;;  %79 = vadd.xlane.f32.xlu1 %v74_v18 }
  0xd5   :  { %83 = vadd.xlane.f32.xlu1 %v76_v19 }
 0x15a   :  { %v78_v20 = vpop.xlane.xlu0 %77 }
 0x15b   :  { %v85_v21 = vmul.f32 0.0078125, %v78_v20 }
 0x15d   :  { %v89_v22 = vadd.f32 1e-05, %v85_v21 }
 0x15e   :  { %v80_v23 = vpop.xlane.xlu1 %79  ;;  %v82_v24 = vpop.xlane.xlu0 %81 }
 0x15f   :  { %153 = vrsqrt.f32 %v89_v22  ;;  %v86_v25 = vmul.f32 0.0078125, %v80_v23  ;;  %v87_v26 = vmul.f32 0.0078125, %v82_v24 }
 0x161   :  { %v90_v27 = vadd.f32 1e-05, %v86_v25  ;;  %v91_v28 = vadd.f32 1e-05, %v87_v26 }
 0x162   :  { %v84_v29 = vpop.xlane.xlu1 %83 }
 0x163   :  { %155 = vrsqrt.f32 %v90_v27  ;;  %v88_v30 = vmul.f32 0.0078125, %v84_v29 }
 0x164   :  { %157 = vrsqrt.f32 %v91_v28 }
 0x165   :  { %v92_v31 = vadd.f32 1e-05, %v88_v30 }
 0x167   :  { %159 = vrsqrt.f32 %v92_v31 }
 0x169   :  { %v154_v32 = vpop.eup %153 }
 0x16a   :  { %v97_v34 = vmul.f32 %v154_v32, %v69_v8 }
 0x16c   :  { %v108_v36 = vmul.f32 %v145_v33, %v97_v34 }
 0x16d   :  { %v156_v37 = vpop.eup %155 }
 0x16e   :  { %v158_v38 = vpop.eup %157  ;;  %v98_v39 = vmul.f32 %v156_v37, %v70_v15  ;;  %v119_v40 = vadd.f32 %v146_v35, %v108_v36 }
 0x16f   :  { %v99_v41 = vmul.f32 %v158_v38, %v71_v9 }
 0x170   :  { %v109_v42 = vmul.f32 %v145_v33, %v98_v39  ;;  %123 = vst [vmem:[#allocation8] sm:$0xff] %v119_v40 }
 0x171   :  { %v160_v43 = vpop.eup %159  ;;  %v110_v44 = vmul.f32 %v145_v33, %v99_v41 }
 0x172   :  { %v100_v45 = vmul.f32 %v160_v43, %v72_v16  ;;  %v120_v46 = vadd.f32 %v146_v35, %v109_v42 }
 0x173   :  { %v121_v47 = vadd.f32 %v146_v35, %v110_v44 }
 0x174   :  { %v111_v48 = vmul.f32 %v145_v33, %v100_v45  ;;  %124 = vst [vmem:[#allocation8 + $0x8] sm:$0xff] %v120_v46 }
 0x175   :  { %125 = vst [vmem:[#allocation8 + $0x10] sm:$0xff] %v121_v47 }
 0x176   :  { %v122_v49 = vadd.f32 %v146_v35, %v111_v48 }
 0x178   :  { %126 = vst [vmem:[#allocation8 + $0x18] sm:$0xff] %v122_v49 }
 0x179   :  { %238 = shalt.err (!%p235_p0)
}
 0x17a   :  { %s239_s27 = scalar_lea.hbm %s345_s3, 512 }
 0x17b   :  { %p240_p1 = scmp.ne.s32.totalorder %s345_s3, %s239_s27  ;;  %p243_p2 = scmp.lt.u32.totalorder %s239_s27, %s345_s3 }
 0x17d   :  { %p245_p3 = pnand %p243_p2, %p240_p1 }
 0x17f   :  { %248 = shalt.err (!%p245_p3)
}
 0x180   :  { %138 = dma.vmem_to_hbm [thread:$0]  %s133_s23, 512, %s345_s3, [#allocation4], %s257_s1, %s257_s1, %s258_s8  }
 0x181   :  { %253 = dma.done.wait [#allocation4], 512  }
 0x182   :  { %254 = vsyncadd [#allocation4], 4294966784 }
 0x183   :  { %142 = vsyncpa [#allocation3], 1 }
 0x184   :  { %143 = vsyncpa [#allocation6], 1 }
 0x185   :  { %144 = vsyncpa [#allocation4], 1 }

</bundles_post_ra>
